<compile_context>
chip_gen: v6e
topology: v6e:2x2x1
jax: 0.10.0
libtpu: 0.0.40
codegen_flags: <defaults>
</compile_context>

<pallas_src>
import functools

import jax
import jax.numpy as jnp
from jax.experimental import pallas as pl
from jax.experimental.pallas import tpu as pltpu

LANE = 128  # TPU lane width; channel dim is padded to a multiple of this.


def _basic_block_kernel(x_ref, w1_ref, s1_ref, b1_ref, w2_ref, s2_ref, b2_ref,
                        o_ref, xpad_ref, *, H, W, C):
    """Whole BasicBlock for one image; all tensors lane-dense (C % 128 == 0).

    x_ref   : (1, H, W, C)   channel-padded input (also the residual)
    w*_ref  : (9*C, C)       im2col conv weights, rows ordered (kh, kw, cin)
    s*/b*   : (1, C)         folded BatchNorm scale / bias
    o_ref   : (1, H, W, C)   output
    xpad_ref: (H+2, W+2, C)  VMEM halo buffer, reused for both convs
    """
    # Zero the halo buffer, then place x in its interior (1-pixel zero pad).
    xpad_ref[...] = jnp.zeros_like(xpad_ref)
    xpad_ref[1:H + 1, 1:W + 1, :] = x_ref[0]

    def conv3x3(w_ref):
        xp = xpad_ref[...]                                        # (H+2, W+2, C)
        # im2col: build one (H*W, 9*C) patch -> single MXU contraction (K = 9*C).
        patch = jnp.concatenate(
            [xp[kh:kh + H, kw:kw + W, :] for kh in range(3) for kw in range(3)],
            axis=-1,
        ).reshape(H * W, 9 * C)
        return jnp.dot(patch, w_ref[...], preferred_element_type=jnp.float32)

    # conv1 -> bn1 -> relu; intermediate stays in VMEM (written back into xpad,
    # whose halo is still zero).
    a1 = jnp.maximum(conv3x3(w1_ref) * s1_ref[...] + b1_ref[...], 0.0)
    xpad_ref[1:H + 1, 1:W + 1, :] = a1.reshape(H, W, C)

    # conv2 -> bn2 -> + residual -> relu.
    res = x_ref[0].reshape(H * W, C)
    out = jnp.maximum(conv3x3(w2_ref) * s2_ref[...] + b2_ref[...] + res, 0.0)
    o_ref[0] = out.reshape(H, W, C).astype(o_ref.dtype)


def basic_block_fused_nhwc(x, w1, s1, b1, w2, s2, b2):
    """Fused BasicBlock. x: (N, H, W, Cin) NHWC; returns (N, H, W, Cout)."""
    N, H, W, Cin = x.shape
    Cout = w1.shape[-1]
    assert Cin == Cout, "stride=1 / downsample=None path requires Cin == Cout"
    C = max(((Cin + LANE - 1) // LANE) * LANE, LANE)   # lane-dense channels

    def pad_w(w):
        wp = jnp.zeros((3, 3, C, C), jnp.float32).at[:, :, :Cin, :Cout].set(w)
        return wp.reshape(9 * C, C)                    # rows: (kh, kw, cin)

    def pad_vec(v):
        return jnp.zeros((1, C), jnp.float32).at[0, :Cout].set(v)

    xc = jnp.pad(x.astype(jnp.float32), ((0, 0), (0, 0), (0, 0), (0, C - Cin)))

    kernel = functools.partial(_basic_block_kernel, H=H, W=W, C=C)
    out = pl.pallas_call(
        kernel,
        out_shape=jax.ShapeDtypeStruct((N, H, W, C), jnp.float32),
        grid=(N,),
        in_specs=[
            pl.BlockSpec((1, H, W, C), lambda n: (n, 0, 0, 0)),   # x / residual
            pl.BlockSpec((9 * C, C), lambda n: (0, 0)),           # w1 (im2col)
            pl.BlockSpec((1, C), lambda n: (0, 0)),               # scale1
            pl.BlockSpec((1, C), lambda n: (0, 0)),               # bias1
            pl.BlockSpec((9 * C, C), lambda n: (0, 0)),           # w2 (im2col)
            pl.BlockSpec((1, C), lambda n: (0, 0)),               # scale2
            pl.BlockSpec((1, C), lambda n: (0, 0)),               # bias2
        ],
        out_specs=pl.BlockSpec((1, H, W, C), lambda n: (n, 0, 0, 0)),
        scratch_shapes=[pltpu.VMEM((H + 2, W + 2, C), jnp.float32)],
        compiler_params=pltpu.CompilerParams(
            dimension_semantics=("parallel",),
            vmem_limit_bytes=32 * 1024 * 1024,
        ),
    )(xc, pad_w(w1), pad_vec(s1), pad_vec(b1), pad_w(w2), pad_vec(s2), pad_vec(b2))
    return out[..., :Cout]


def make_basic_block_params(key, inplanes, planes):
    """Deterministic parameter init matching BasicBlock.__init__ shapes."""
    k = jax.random.split(key, 10)

    def conv_w(kk, cin, cout):
        fan_in = 3 * 3 * cin
        return jax.random.normal(kk, (3, 3, cin, cout), jnp.float32) * (2.0 / fan_in) ** 0.5

    def bn(kk0, kk1, kk2, c):
        gamma = 1.0 + 0.1 * jax.random.normal(kk0, (c,), jnp.float32)
        beta = 0.1 * jax.random.normal(kk1, (c,), jnp.float32)
        running_mean = 0.1 * jax.random.normal(kk2, (c,), jnp.float32)
        running_var = jnp.ones((c,), jnp.float32)
        eps = 1e-5
        scale = gamma / jnp.sqrt(running_var + eps)
        bias = beta - running_mean * scale
        return scale, bias

    w1 = conv_w(k[0], inplanes, planes)
    w2 = conv_w(k[1], planes, planes)
    s1, b1 = bn(k[2], k[3], k[4], planes)
    s2, b2 = bn(k[5], k[6], k[7], planes)
    return dict(w1=w1, s1=s1, b1=b1, w2=w2, s2=s2, b2=b2)


def basic_block_forward(x_nchw, params):
    """BasicBlock forward. Input/output in PyTorch NCHW layout (boundary only;
    the kernel itself is NHWC end-to-end)."""
    x = jnp.transpose(x_nchw, (0, 2, 3, 1))  # -> NHWC
    out = basic_block_fused_nhwc(x, params["w1"], params["s1"], params["b1"],
                                 params["w2"], params["s2"], params["b2"])
    return jnp.transpose(out, (0, 3, 1, 2))  # -> NCHW


def _reference_forward(x_nchw, params):
    """Pure-JAX reference (lax conv) for the correctness check."""
    x = jnp.transpose(x_nchw, (0, 2, 3, 1))

    def conv(v, w):
        return jax.lax.conv_general_dilated(
            v, w, window_strides=(1, 1), padding=((1, 1), (1, 1)),
            dimension_numbers=("NHWC", "HWIO", "NHWC"))

    out = jnp.maximum(conv(x, params["w1"]) * params["s1"] + params["b1"], 0.0)
    out = conv(out, params["w2"]) * params["s2"] + params["b2"] + x
    out = jnp.maximum(out, 0.0)
    return jnp.transpose(out, (0, 3, 1, 2))


if __name__ == "__main__":
    key = jax.random.PRNGKey(0)
    k_x, k_p = jax.random.split(key)

    N, C, H, W = 2, 4, 16, 16          # inplanes = planes = 4, stride = 1
    x = jax.random.normal(k_x, (N, C, H, W), jnp.float32)
    params = make_basic_block_params(k_p, C, C)

    out = jax.block_until_ready(basic_block_forward(x, params))
    ref = jax.block_until_ready(_reference_forward(x, params))

    assert out.shape == (N, C, H, W)
    assert jnp.allclose(out, ref, atol=1e-4, rtol=1e-4)

    print("KERNEL_OK")
</pallas_src>

<mosaic_0001>
module attributes {stable_mosaic.version = 11 : i64} {
  func.func @_basic_block_kernel(%arg0: i32, %arg1: memref<1x16x16x128xf32, #tpu.memory_space<vmem>>, %arg2: memref<1152x128xf32, #tpu.memory_space<vmem>>, %arg3: memref<1x128xf32, #tpu.memory_space<vmem>>, %arg4: memref<1x128xf32, #tpu.memory_space<vmem>>, %arg5: memref<1152x128xf32, #tpu.memory_space<vmem>>, %arg6: memref<1x128xf32, #tpu.memory_space<vmem>>, %arg7: memref<1x128xf32, #tpu.memory_space<vmem>>, %arg8: memref<1x16x16x128xf32, #tpu.memory_space<vmem>>, %arg9: memref<18x18x128xf32, #tpu.memory_space<vmem>>) attributes {dimension_semantics = [#tpu.dimension_semantics<parallel>], iteration_bounds = array<i64: 2>, scalar_prefetch = 0 : i64, scratch_operands = 1 : i64, tpu.core_type = #tpu.core_type<tc>, window_params = [{transform_indices = @transform_0, window_bounds = array<i64: 1, 16, 16, 128>}, {pipeline_mode = #tpu.pipeline_mode<synchronous>, transform_indices = @transform_1, window_bounds = array<i64: 1152, 128>}, {pipeline_mode = #tpu.pipeline_mode<synchronous>, transform_indices = @transform_2, window_bounds = array<i64: 1, 128>}, {pipeline_mode = #tpu.pipeline_mode<synchronous>, transform_indices = @transform_3, window_bounds = array<i64: 1, 128>}, {pipeline_mode = #tpu.pipeline_mode<synchronous>, transform_indices = @transform_4, window_bounds = array<i64: 1152, 128>}, {pipeline_mode = #tpu.pipeline_mode<synchronous>, transform_indices = @transform_5, window_bounds = array<i64: 1, 128>}, {pipeline_mode = #tpu.pipeline_mode<synchronous>, transform_indices = @transform_6, window_bounds = array<i64: 1, 128>}, {transform_indices = @transform_7, window_bounds = array<i64: 1, 16, 16, 128>}]} {
    %cst = arith.constant 0.000000e+00 : f32
    %0 = vector.broadcast %cst : f32 to vector<18x18x128xf32>
    %c0 = arith.constant 0 : index
    %c0_0 = arith.constant 0 : index
    %c0_1 = arith.constant 0 : index
    %1 = vector.load %arg9[%c0, %c0_0, %c0_1] : memref<18x18x128xf32, #tpu.memory_space<vmem>>, vector<18x18x128xf32>
    tpu.vector_store %arg9[%c0, %c0_0, %c0_1], %0 {strides = array<i32>} : memref<18x18x128xf32, #tpu.memory_space<vmem>>, vector<18x18x128xf32>,
    %c0_2 = arith.constant 0 : index
    %c0_3 = arith.constant 0 : index
    %c0_4 = arith.constant 0 : index
    %c0_5 = arith.constant 0 : index
    %2 = vector.load %arg1[%c0_2, %c0_3, %c0_4, %c0_5] : memref<1x16x16x128xf32, #tpu.memory_space<vmem>>, vector<1x16x16x128xf32>
    %3 = vector.shape_cast %2 : vector<1x16x16x128xf32> to vector<16x16x128xf32>
    %c1 = arith.constant 1 : index
    %c1_6 = arith.constant 1 : index
    %c0_7 = arith.constant 0 : index
    %4 = vector.load %arg9[%c1, %c1_6, %c0_7] : memref<18x18x128xf32, #tpu.memory_space<vmem>>, vector<16x16x128xf32>
    tpu.vector_store %arg9[%c1, %c1_6, %c0_7], %3 {strides = array<i32>} : memref<18x18x128xf32, #tpu.memory_space<vmem>>, vector<16x16x128xf32>,
    %c0_8 = arith.constant 0 : index
    %c0_9 = arith.constant 0 : index
    %c0_10 = arith.constant 0 : index
    %5 = vector.load %arg9[%c0_8, %c0_9, %c0_10] : memref<18x18x128xf32, #tpu.memory_space<vmem>>, vector<18x18x128xf32>
    %6 = vector.extract_strided_slice %5 {offsets = [0, 0, 0], sizes = [16, 16, 128], strides = [1, 1, 1]} : vector<18x18x128xf32> to vector<16x16x128xf32>
    %7 = vector.extract_strided_slice %5 {offsets = [0, 1, 0], sizes = [16, 16, 128], strides = [1, 1, 1]} : vector<18x18x128xf32> to vector<16x16x128xf32>
    %8 = vector.extract_strided_slice %5 {offsets = [0, 2, 0], sizes = [16, 16, 128], strides = [1, 1, 1]} : vector<18x18x128xf32> to vector<16x16x128xf32>
    %9 = vector.extract_strided_slice %5 {offsets = [1, 0, 0], sizes = [16, 16, 128], strides = [1, 1, 1]} : vector<18x18x128xf32> to vector<16x16x128xf32>
    %10 = vector.extract_strided_slice %5 {offsets = [1, 1, 0], sizes = [16, 16, 128], strides = [1, 1, 1]} : vector<18x18x128xf32> to vector<16x16x128xf32>
    %11 = vector.extract_strided_slice %5 {offsets = [1, 2, 0], sizes = [16, 16, 128], strides = [1, 1, 1]} : vector<18x18x128xf32> to vector<16x16x128xf32>
    %12 = vector.extract_strided_slice %5 {offsets = [2, 0, 0], sizes = [16, 16, 128], strides = [1, 1, 1]} : vector<18x18x128xf32> to vector<16x16x128xf32>
    %13 = vector.extract_strided_slice %5 {offsets = [2, 1, 0], sizes = [16, 16, 128], strides = [1, 1, 1]} : vector<18x18x128xf32> to vector<16x16x128xf32>
    %14 = vector.extract_strided_slice %5 {offsets = [2, 2, 0], sizes = [16, 16, 128], strides = [1, 1, 1]} : vector<18x18x128xf32> to vector<16x16x128xf32>
    %15 = tpu.concatenate %6, %7, %8, %9, %10, %11, %12, %13, %14 in 2 : vector<16x16x128xf32>, vector<16x16x128xf32>, vector<16x16x128xf32>, vector<16x16x128xf32>, vector<16x16x128xf32>, vector<16x16x128xf32>, vector<16x16x128xf32>, vector<16x16x128xf32>, vector<16x16x128xf32> -> vector<16x16x1152xf32>
    %16 = vector.shape_cast %15 : vector<16x16x1152xf32> to vector<256x1152xf32>
    %c0_11 = arith.constant 0 : index
    %c0_12 = arith.constant 0 : index
    %17 = vector.load %arg2[%c0_11, %c0_12] : memref<1152x128xf32, #tpu.memory_space<vmem>>, vector<1152x128xf32>
    %cst_13 = arith.constant dense<0.000000e+00> : vector<256x128xf32>
    %18 = tpu.matmul %16, %17, %cst_13 {dimension_numbers = #tpu.dot_dimension_numbers<[1], [0], [0], [1], [0, 0, 1, 1], [], []>} : vector<256x1152xf32>, vector<1152x128xf32>, vector<256x128xf32> -> vector<256x128xf32>
    %c0_14 = arith.constant 0 : index
    %c0_15 = arith.constant 0 : index
    %19 = vector.load %arg3[%c0_14, %c0_15] : memref<1x128xf32, #tpu.memory_space<vmem>>, vector<1x128xf32>
    %20 = vector.broadcast %19 : vector<1x128xf32> to vector<256x128xf32>
    %21 = arith.mulf %18, %20 : vector<256x128xf32>
    %c0_16 = arith.constant 0 : index
    %c0_17 = arith.constant 0 : index
    %22 = vector.load %arg4[%c0_16, %c0_17] : memref<1x128xf32, #tpu.memory_space<vmem>>, vector<1x128xf32>
    %23 = vector.broadcast %22 : vector<1x128xf32> to vector<256x128xf32>
    %24 = arith.addf %21, %23 : vector<256x128xf32>
    %cst_18 = arith.constant 0.000000e+00 : f32
    %25 = vector.broadcast %cst_18 : f32 to vector<256x128xf32>
    %26 = arith.maximumf %24, %25 : vector<256x128xf32>
    %27 = vector.shape_cast %26 : vector<256x128xf32> to vector<16x16x128xf32>
    %c1_19 = arith.constant 1 : index
    %c1_20 = arith.constant 1 : index
    %c0_21 = arith.constant 0 : index
    %28 = vector.load %arg9[%c1_19, %c1_20, %c0_21] : memref<18x18x128xf32, #tpu.memory_space<vmem>>, vector<16x16x128xf32>
    tpu.vector_store %arg9[%c1_19, %c1_20, %c0_21], %27 {strides = array<i32>} : memref<18x18x128xf32, #tpu.memory_space<vmem>>, vector<16x16x128xf32>,
    %c0_22 = arith.constant 0 : index
    %c0_23 = arith.constant 0 : index
    %c0_24 = arith.constant 0 : index
    %c0_25 = arith.constant 0 : index
    %29 = vector.load %arg1[%c0_22, %c0_23, %c0_24, %c0_25] : memref<1x16x16x128xf32, #tpu.memory_space<vmem>>, vector<1x16x16x128xf32>
    %30 = vector.shape_cast %29 : vector<1x16x16x128xf32> to vector<16x16x128xf32>
    %31 = vector.shape_cast %30 : vector<16x16x128xf32> to vector<256x128xf32>
    %c0_26 = arith.constant 0 : index
    %c0_27 = arith.constant 0 : index
    %c0_28 = arith.constant 0 : index
    %32 = vector.load %arg9[%c0_26, %c0_27, %c0_28] : memref<18x18x128xf32, #tpu.memory_space<vmem>>, vector<18x18x128xf32>
    %33 = vector.extract_strided_slice %32 {offsets = [0, 0, 0], sizes = [16, 16, 128], strides = [1, 1, 1]} : vector<18x18x128xf32> to vector<16x16x128xf32>
    %34 = vector.extract_strided_slice %32 {offsets = [0, 1, 0], sizes = [16, 16, 128], strides = [1, 1, 1]} : vector<18x18x128xf32> to vector<16x16x128xf32>
    %35 = vector.extract_strided_slice %32 {offsets = [0, 2, 0], sizes = [16, 16, 128], strides = [1, 1, 1]} : vector<18x18x128xf32> to vector<16x16x128xf32>
    %36 = vector.extract_strided_slice %32 {offsets = [1, 0, 0], sizes = [16, 16, 128], strides = [1, 1, 1]} : vector<18x18x128xf32> to vector<16x16x128xf32>
    %37 = vector.extract_strided_slice %32 {offsets = [1, 1, 0], sizes = [16, 16, 128], strides = [1, 1, 1]} : vector<18x18x128xf32> to vector<16x16x128xf32>
    %38 = vector.extract_strided_slice %32 {offsets = [1, 2, 0], sizes = [16, 16, 128], strides = [1, 1, 1]} : vector<18x18x128xf32> to vector<16x16x128xf32>
    %39 = vector.extract_strided_slice %32 {offsets = [2, 0, 0], sizes = [16, 16, 128], strides = [1, 1, 1]} : vector<18x18x128xf32> to vector<16x16x128xf32>
    %40 = vector.extract_strided_slice %32 {offsets = [2, 1, 0], sizes = [16, 16, 128], strides = [1, 1, 1]} : vector<18x18x128xf32> to vector<16x16x128xf32>
    %41 = vector.extract_strided_slice %32 {offsets = [2, 2, 0], sizes = [16, 16, 128], strides = [1, 1, 1]} : vector<18x18x128xf32> to vector<16x16x128xf32>
    %42 = tpu.concatenate %33, %34, %35, %36, %37, %38, %39, %40, %41 in 2 : vector<16x16x128xf32>, vector<16x16x128xf32>, vector<16x16x128xf32>, vector<16x16x128xf32>, vector<16x16x128xf32>, vector<16x16x128xf32>, vector<16x16x128xf32>, vector<16x16x128xf32>, vector<16x16x128xf32> -> vector<16x16x1152xf32>
    %43 = vector.shape_cast %42 : vector<16x16x1152xf32> to vector<256x1152xf32>
    %c0_29 = arith.constant 0 : index
    %c0_30 = arith.constant 0 : index
    %44 = vector.load %arg5[%c0_29, %c0_30] : memref<1152x128xf32, #tpu.memory_space<vmem>>, vector<1152x128xf32>
    %cst_31 = arith.constant dense<0.000000e+00> : vector<256x128xf32>
    %45 = tpu.matmul %43, %44, %cst_31 {dimension_numbers = #tpu.dot_dimension_numbers<[1], [0], [0], [1], [0, 0, 1, 1], [], []>} : vector<256x1152xf32>, vector<1152x128xf32>, vector<256x128xf32> -> vector<256x128xf32>
    %c0_32 = arith.constant 0 : index
    %c0_33 = arith.constant 0 : index
    %46 = vector.load %arg6[%c0_32, %c0_33] : memref<1x128xf32, #tpu.memory_space<vmem>>, vector<1x128xf32>
    %47 = vector.broadcast %46 : vector<1x128xf32> to vector<256x128xf32>
    %48 = arith.mulf %45, %47 : vector<256x128xf32>
    %c0_34 = arith.constant 0 : index
    %c0_35 = arith.constant 0 : index
    %49 = vector.load %arg7[%c0_34, %c0_35] : memref<1x128xf32, #tpu.memory_space<vmem>>, vector<1x128xf32>
    %50 = vector.broadcast %49 : vector<1x128xf32> to vector<256x128xf32>
    %51 = arith.addf %48, %50 : vector<256x128xf32>
    %52 = arith.addf %51, %31 : vector<256x128xf32>
    %cst_36 = arith.constant 0.000000e+00 : f32
    %53 = vector.broadcast %cst_36 : f32 to vector<256x128xf32>
    %54 = arith.maximumf %52, %53 : vector<256x128xf32>
    %55 = vector.shape_cast %54 : vector<256x128xf32> to vector<16x16x128xf32>
    %c0_37 = arith.constant 0 : index
    %c0_38 = arith.constant 0 : index
    %c0_39 = arith.constant 0 : index
    %c0_40 = arith.constant 0 : index
    %56 = vector.load %arg8[%c0_37, %c0_38, %c0_39, %c0_40] : memref<1x16x16x128xf32, #tpu.memory_space<vmem>>, vector<1x16x16x128xf32>
    %57 = vector.shape_cast %56 : vector<1x16x16x128xf32> to vector<16x16x128xf32>
    %58 = vector.shape_cast %55 : vector<16x16x128xf32> to vector<1x16x16x128xf32>
    tpu.vector_store %arg8[%c0_37, %c0_38, %c0_39, %c0_40], %58 {strides = array<i32>} : memref<1x16x16x128xf32, #tpu.memory_space<vmem>>, vector<1x16x16x128xf32>,
    return
  }
  func.func @transform_0(%arg0: i32) -> (i32, i32, i32, i32) {
    %c0_i32 = arith.constant 0 : i32
    %c0_i32_0 = arith.constant 0 : i32
    %c0_i32_1 = arith.constant 0 : i32
    %c0_i32_2 = arith.constant 0 : i32
    return %arg0, %c0_i32, %c0_i32_0, %c0_i32_1 : i32, i32, i32, i32
  }
  func.func @transform_1(%arg0: i32) -> (i32, i32) {
    %c0_i32 = arith.constant 0 : i32
    %c0_i32_0 = arith.constant 0 : i32
    %c0_i32_1 = arith.constant 0 : i32
    return %c0_i32, %c0_i32_0 : i32, i32
  }
  func.func @transform_2(%arg0: i32) -> (i32, i32) {
    %c0_i32 = arith.constant 0 : i32
    %c0_i32_0 = arith.constant 0 : i32
    %c0_i32_1 = arith.constant 0 : i32
    return %c0_i32, %c0_i32_0 : i32, i32
  }
  func.func @transform_3(%arg0: i32) -> (i32, i32) {
    %c0_i32 = arith.constant 0 : i32
    %c0_i32_0 = arith.constant 0 : i32
    %c0_i32_1 = arith.constant 0 : i32
    return %c0_i32, %c0_i32_0 : i32, i32
  }
  func.func @transform_4(%arg0: i32) -> (i32, i32) {
    %c0_i32 = arith.constant 0 : i32
    %c0_i32_0 = arith.constant 0 : i32
    %c0_i32_1 = arith.constant 0 : i32
    return %c0_i32, %c0_i32_0 : i32, i32
  }
  func.func @transform_5(%arg0: i32) -> (i32, i32) {
    %c0_i32 = arith.constant 0 : i32
    %c0_i32_0 = arith.constant 0 : i32
    %c0_i32_1 = arith.constant 0 : i32
    return %c0_i32, %c0_i32_0 : i32, i32
  }
  func.func @transform_6(%arg0: i32) -> (i32, i32) {
    %c0_i32 = arith.constant 0 : i32
    %c0_i32_0 = arith.constant 0 : i32
    %c0_i32_1 = arith.constant 0 : i32
    return %c0_i32, %c0_i32_0 : i32, i32
  }
  func.func @transform_7(%arg0: i32) -> (i32, i32, i32, i32) {
    %c0_i32 = arith.constant 0 : i32
    %c0_i32_0 = arith.constant 0 : i32
    %c0_i32_1 = arith.constant 0 : i32
    %c0_i32_2 = arith.constant 0 : i32
    return %arg0, %c0_i32, %c0_i32_0, %c0_i32_1 : i32, i32, i32, i32
  }
}

</mosaic_0001>

<bundles_post_ra>
// kernel: tpu_custom_call.1
= control target key start
LH: loop header
LB: loop body
LE: loop exit
PB: predicated region body
PF: predicated region fallthrough
CT: control target
= control target key end

     0   :  { %s7120_s0 = inlined_call_operand.hbm [shape: f32[2,16,16,128], index: 0, kind: input, shape index: {}]   ;;  %s7121_s1 = inlined_call_operand.hbm [shape: f32[1152,128], index: 1, kind: input, shape index: {}]   ;;  %s7122_s2 = inlined_call_operand.vmem [shape: f32[1,128], index: 2, kind: input, shape index: {}]   ;;  %s7123_s3 = inlined_call_operand.vmem [shape: f32[1,128], index: 3, kind: input, shape index: {}]   ;;  %s7124_s4 = inlined_call_operand.hbm [shape: f32[1152,128], index: 4, kind: input, shape index: {}]   ;;  %s7125_s5 = inlined_call_operand.vmem [shape: f32[1,128], index: 5, kind: input, shape index: {}]   ;;  %s7126_s6 = inlined_call_operand.vmem [shape: f32[1,128], index: 6, kind: input, shape index: {}]   ;;  %s7127_s7 = inlined_call_operand.hbm [shape: f32[2,16,16,128], index: 7, kind: output, shape index: {}]  }
   0x1   :  { %7238 = sst [smem:[#allocation47_spill]] %s7121_s1 }
   0x2   :  { %12 = vsyncpa [#allocation4], 0 }
   0x3   :  { %14 = vsyncpa [#allocation4 + $0x1], 0 }
   0x4   :  { %15 = vsyncpa [#allocation7], 0 }
   0x5   :  { %16 = vsyncpa [#allocation5], 0 }
   0x6   :  { %18 = vsyncpa [#allocation5 + $0x1], 0  ;;  %s4721_s24 = smov 0   ;;  %s4723_s25 = smov 0  }
   0x7   :  { %s4725_s26 = smov 0   ;;  %s4727_s27 = smov 0  }
   0x8 LB: > { %s4742_s28 = sadd.s32 4294967295, %s4670_s27   ;;  %s4159_s29 = sadd.s32 4294967294, %s4670_s27   ;;  %s4670_s27 = sphi %s4727_s27, %s7388_s27   ;;  %s4666_s26 = sphi %s4725_s26, %s7387_s26   ;;  %s4662_s25 = sphi %s4723_s25, %s7386_s25   ;;  %s4658_s24 = sphi %s4721_s24, %s7385_s24  }
   0x9   : > { %p44_p0 = scmp.ne.s32.totalorder %s4662_s25, %s4658_s24  ;;  %p7129_p1 = scmp.eq.s32.totalorder %s4742_s28, 0 }
   0xa   : > { %p194_p2 = scmp.eq.s32.totalorder %s4742_s28, 1  ;;  %p200_p3 = scmp.eq.s32.totalorder %s4159_s29, 1 }
   0xb   : > { %p4751_p4 = por %p7129_p1, %p44_p0  ;;  %p4160_p5 = scmp.ge.s32.totalorder %s4670_s27, 1 }
   0xc   : > { %p4756_p6 = por %p200_p3, %p44_p0  ;;  %p207_p7 = scmp.lt.s32.totalorder %s4670_s27, 3 }
   0xd   : > { %s7239_s30 = scalar_select %p4751_p4, 1, 0 }
   0xe   : > { %s7240_s8 = scalar_select %p4756_p6, 1, 0 }
   0xf   : > { %p4761_p8 = pnand %p4160_p5, %p207_p7  ;;  %s4672_s10 = smov [#allocation6]  }
  0x10   : > { %s219_s11 = sshll.u32 %s4672_s10, 4  ;;  %s4673_s13 = smov [#allocation8]   ;;  %s220_s11 = int_to_ptr.vmem [resolvable:$true] %s219_s11 }
  0x11   : > { %s7241_s9 = scalar_select %p4761_p8, 1, 0 }
  0x12   : > { %p4451_p9 = pneg %p4761_p8  ;;  %s238_s14 = sshll.u32 %s4673_s13, 4  ;;  %s239_s14 = int_to_ptr.vmem [resolvable:$true] %s238_s14 }
  0x13   : > { %s4533_s15 = scalar_lea.vmem %s220_s11, 18432  ;;  %p4541_p5 = scmp.lt.s32.totalorder %s220_s11, %s220_s11 }
  0x14   : > { %p4770_p11 = pnand %p4451_p9, %p7129_p1  ;;  %p4534_p13 = scmp.ne.s32.totalorder %s220_s11, %s4533_s15 }
  0x15   : > { %p4542_p7 = scmp.lt.s32.totalorder %s4533_s15, %s4533_s15 }
  0x16   : > { %p4524_p12 = pneg %p4770_p11 }
  0x17   : > { %p4543_p10 = por %p4542_p7, %p4541_p5 }
  0x18   : > { %p4536_p0 = pnand %p4534_p13, %p4524_p12 }
  0x1a   : > { %p4537_p3 = pneg %p4536_p0 }
  0x1c   : > { %p4544_p9 = pnand %p4543_p10, %p4537_p3 }
  0x1e   : > { %4547 = shalt.err (!%p4544_p9)
}
  0x1f   : > { %s7128_s16 = smov 128   ;;  %s7130_s17 = smov 8  }
  0x20   : > { %s7243_s1 = sld [smem:[#allocation47_spill]]  ;;  %s4559_s20 = scalar_lea.vmem %s239_s14, 18432 }
  0x21   : > { %p4560_p13 = scmp.ne.s32.totalorder %s239_s14, %s4559_s20  ;;  %p4567_p10 = scmp.lt.s32.totalorder %s239_s14, %s239_s14 }
  0x22   : > { %p4568_p3 = scmp.lt.s32.totalorder %s4559_s20, %s4559_s20 }
  0x23   : > { %p4562_p0 = pnand %p4560_p13, %p4524_p12 }
  0x24   : > { %p4569_p7 = por %p4568_p3, %p4567_p10 }
  0x25   : > { %p4563_p5 = pneg %p4562_p0 }
  0x26   : > { %4454 = dma.hbm_to_vmem [thread:$0]  (!%p4770_p11), %s7243_s1, 18432, %s220_s11, [#allocation7], %s7128_s16, %s7128_s16, %s7130_s17  }
  0x27   : > { %p4570_p9 = pnand %p4569_p7, %p4563_p5 }
  0x29   : > { %4573 = shalt.err (!%p4570_p9)
}
  0x2a   : > { %4457 = dma.hbm_to_vmem [thread:$0]  (!%p4770_p11), %s7124_s4, 18432, %s239_s14, [#allocation7], %s7128_s16, %s7128_s16, %s7130_s17  }
  0x2b   : > { %s4799_s23 = sadd.s32 1, %s4670_s27   ;;  %s31_s29 = sadd.s32 1, %s4666_s26 }
  0x2c   : > { %s28_s10 = ssub.s32 %s4670_s27, %s4799_s23  ;;  %p38_p12 = scmp.ne.s32.totalorder %s4666_s26, %s4662_s25 }
  0x2d   : > { %p29_p13 = scmp.eq.s32.totalorder %s28_s10, 0  ;;  %p39_p0 = scmp.eq.s32.totalorder %s4670_s27, 0 }
  0x2e   : > { %p4809_p5 = por %p194_p2, %p38_p12  ;;  %p4468_p10 = scmp.lt.s32.totalorder %s4670_s27, 2 }
  0x2f   : > { %s4815_s12 = scalar_select %p29_p13, %s4666_s26, %s31_s29  }
  0x30   : > { %s7244_s11 = scalar_select %p4809_p5, 1, 0 }
  0x31   : > { %p40_p3 = por %p39_p0, %p38_p12  ;;  %s258_s13 = sand.u32 1, %s4666_s26  }
  0x32   : > { %s4164_s15 = sshll.u32 %s258_s13, 8  ;;  %s4181_s14 = sshll.u32 %s4670_s27, 12 }
  0x33   : > { %s4822_s20 = scalar_lea.hbm %s7120_s0, %s4181_s14  ;;  %s262_s21 = scalar_lea.vmem [#allocation3], %s4164_s15 }
  0x34   : > { %s269_s22 = sshll.u32 %s262_s21, 4  ;;  %p4826_p2 = pnand %p4468_p10, %p40_p3  ;;  %s4824_s22 = int_to_ptr.vmem [resolvable:$true] %s269_s22 }
  0x35   : > { %s4830_s29 = scalar_lea.sflag [#allocation4], %s258_s13  ;;  %s4574_s16 = scalar_lea.hbm %s4822_s20, 4096 }
  0x36   : > { %p4575_p11 = scmp.ne.s32.totalorder %s4822_s20, %s4574_s16  ;;  %p4576_p7 = pneg %p4826_p2 }
  0x37   : > { %s4579_s15 = scalar_lea.hbm %s7120_s0, 8192  ;;  %p4580_p13 = scmp.lt.s32.totalorder %s4822_s20, %s7120_s0 }
  0x38   : > { %p4577_p9 = pnand %p4576_p7, %p4575_p11  ;;  %p4581_p0 = scmp.lt.s32.totalorder %s4579_s15, %s4574_s16 }
  0x3a   : > { %p4578_p12 = pneg %p4577_p9  ;;  %p4582_p10 = por %p4581_p0, %p4580_p13 }
  0x3c   : > { %p4583_p3 = pnand %p4582_p10, %p4578_p12 }
  0x3e   : > { %4586 = shalt.err (!%p4583_p3)
}
  0x3f   : > { %s4587_s13 = scalar_lea.vmem %s4824_s22, 4096  ;;  %s4676_s17 = smov [#allocation3]  }
  0x40   : > { %p4588_p1 = scmp.ne.s32.totalorder %s4824_s22, %s4587_s13  ;;  %s4592_s1 = sshll.u32 %s4676_s17, 4  ;;  %s4593_s1 = int_to_ptr.vmem [resolvable:$false] %s4592_s1 }
  0x41   : > { %s4594_s14 = scalar_lea.vmem %s4593_s1, 8192  ;;  %p4595_p9 = scmp.lt.s32.totalorder %s4824_s22, %s4593_s1 }
  0x42   : > { %p4590_p6 = pnand %p4588_p1, %p4576_p7  ;;  %p4596_p5 = scmp.lt.s32.totalorder %s4594_s14, %s4587_s13 }
  0x44   : > { %p4591_p11 = pneg %p4590_p6  ;;  %p4597_p4 = por %p4596_p5, %p4595_p9 }
  0x46   : > { %p4598_p8 = pnand %p4597_p4, %p4591_p11 }
  0x48   : > { %4601 = shalt.err (!%p4598_p8)
}
  0x49   : > { %s7246_s16 = smov 8   ;;  %s7247_s18 = smov 128  }
  0x4a   : > { %4461 = dma.hbm_to_vmem [thread:$0]  (!%p4826_p2), %s4822_s20, 4096, %s4824_s22, %s4830_s29, %s7247_s18, %s7247_s18, %s7246_s16  }
  0x4b   : > { %p7248_p1 = scmp.ne.s32.totalorder %s7241_s9, 0 }
  0x4d   : > { %281 = sbr.rel (%p7248_p1) target bundleno = 1155 (0x483), region = 48 }
  0x52   : > { %s4857_s17 = sand.u32 1, %s4662_s25   ;;  %p7249_p4 = scmp.ne.s32.totalorder %s7239_s30, 0 }
  0x53   : > { %s4168_s1 = sshll.u32 %s4857_s17, 8  ;;  %s284_s15 = scalar_lea.sflag [#allocation4], %s4857_s17 }
  0x54   : > { %s4863_s10 = scalar_lea.vmem [#allocation3], %s4168_s1 }
  0x55   : > { %4645 = dma.done.wait (%p7249_p4), %s284_s15, 4096  }
  0x56   : > { %4647 = vsyncadd (%p7249_p4), %s284_s15, 4294963200  ;;  %p7250_p6 = scmp.eq.s32.totalorder %s4742_s28, 0 }
  0x58   : > { %4649 = dma.done.wait (%p7250_p6), [#allocation7], 36864   ;;  %p7251_p8 = pmov %p7250_p6 }
  0x59   : > { %vm547_vm0 = vcmask 1046528   ;;  %v4677_v0 = vmov 0.0   ;;  %v822_v2 = vld [vmem:[#allocation6 + $0x78] sm:$0xff]  ;;  %v821_v4 = vld [vmem:[#allocation6 + $0x70] sm:$0xff]  ;;  %v820_v6 = vld [vmem:[#allocation6 + $0x68] sm:$0xff]  ;;  %vm660_vm1 = vcmask 1045504  }
  0x5a   : > { %4651 = vsyncadd (%p7251_p8), [#allocation7], 4294930432  ;;  %951 = vmatprep.subr.mxu0 %v4677_v0  ;;  %326 = vst [vmem:[#allocation2] sm:$0xff] %v4677_v0  ;;  %1176 = vmatprep.subr.mxu1 %v4677_v0  ;;  %v4927_v1 = vrot.slane %v4677_v0, 1  ;;  %v854_v3 = vld [vmem:[#allocation6 + $0x178] sm:$0xff]  ;;  %v853_v5 = vld [vmem:[#allocation6 + $0x170] sm:$0xff] }
  0x5b   : > { %328 = vst [vmem:[#allocation2 + $0x10] sm:$0x3] %v4677_v0  ;;  %329 = vst [vmem:[#allocation2 + $0x18] sm:$0xff] %v4677_v0  ;;  %952 = vmatpush1.msra.mxu0 %v822_v2  ;;  %1177 = vmatpush1.msra.mxu1 %v854_v3  ;;  %v852_v7 = vld [vmem:[#allocation6 + $0x168] sm:$0xff]  ;;  %v819_v8 = vld [vmem:[#allocation6 + $0x60] sm:$0xff]  ;;  %s6921_s14 = scalar_lea.vmem [#allocation9], %s4168_s1 }
  0x5c   : > { %330 = vst [vmem:[#allocation2 + $0x20] sm:$0xff] %v4677_v0  ;;  %331 = vst [vmem:[#allocation2 + $0x28] sm:$0x3] %v4677_v0  ;;  %1015 = vmatprep.mubr.f32.mxu0 %v4927_v1  ;;  %953 = vmatprep.subr.mxu0 %v4677_v0  ;;  %v851_v9 = vld [vmem:[#allocation6 + $0x160] sm:$0xff]  ;;  %v818_v10 = vld [vmem:[#allocation6 + $0x58] sm:$0xff]  ;;  %s4182_s16 = sshll.u32 %s4742_s28, 12 }
  0x5d   : > { %332 = vst [vmem:[#allocation2 + $0x30] sm:$0xff] %v4677_v0  ;;  %333 = vst [vmem:[#allocation2 + $0x38] sm:$0xff] %v4677_v0  ;;  %1178 = vmatprep.subr.mxu1 %v4677_v0  ;;  %954 = vmatpush1.msra.mxu0 %v821_v4  ;;  %v850_v11 = vld [vmem:[#allocation6 + $0x158] sm:$0xff]  ;;  %v817_v12 = vld [vmem:[#allocation6 + $0x50] sm:$0xff]  ;;  %s4067_s18 = sshll.u32 %s6921_s14, 4  ;;  %s7073_s30 = scalar_lea.hbm %s7127_s7, %s4182_s16  ;;  %s7075_s18 = int_to_ptr.vmem [resolvable:$true] %s4067_s18 }
  0x5e   : > { %334 = vst [vmem:[#allocation2 + $0x40] sm:$0x3] %v4677_v0  ;;  %335 = vst [vmem:[#allocation2 + $0x48] sm:$0xff] %v4677_v0  ;;  %1179 = vmatpush1.msra.mxu1 %v853_v5  ;;  %955 = vmatprep.subr.mxu0 %v4677_v0  ;;  %v849_v13 = vld [vmem:[#allocation6 + $0x150] sm:$0xff]  ;;  %v816_v14 = vld [vmem:[#allocation6 + $0x48] sm:$0xff]  ;;  %s4602_s28 = scalar_lea.vmem %s7075_s18, 4096 }
  0x5f   : > { %336 = vst [vmem:[#allocation2 + $0x50] sm:$0xff] %v4677_v0  ;;  %337 = vst [vmem:[#allocation2 + $0x58] sm:$0x3] %v4677_v0  ;;  %1180 = vmatprep.subr.mxu1 %v4677_v0  ;;  %956 = vmatpush1.msra.mxu0 %v820_v6  ;;  %v848_v15 = vld [vmem:[#allocation6 + $0x148] sm:$0xff]  ;;  %v815_v16 = vld [vmem:[#allocation6 + $0x40] sm:$0xff]  ;;  %p4603_p5 = scmp.ne.s32.totalorder %s7075_s18, %s4602_s28  ;;  %p7382_p2 = scmp.ne.s32.totalorder %s7244_s11, 0 }
  0x60   : > { %338 = vst [vmem:[#allocation2 + $0x60] sm:$0xff] %v4677_v0  ;;  %339 = vst [vmem:[#allocation2 + $0x68] sm:$0xff] %v4677_v0  ;;  %1181 = vmatpush1.msra.mxu1 %v852_v7  ;;  %957 = vmatprep.subr.mxu0 %v4677_v0  ;;  %v847_v17 = vld [vmem:[#allocation6 + $0x140] sm:$0xff]  ;;  %v814_v18 = vld [vmem:[#allocation6 + $0x38] sm:$0xff]  ;;  %s4678_s9 = smov [#allocation9]  }
  0x61   : > { %340 = vst [vmem:[#allocation2 + $0x70] sm:$0x3] %v4677_v0  ;;  %341 = vst [vmem:[#allocation2 + $0x78] sm:$0xff] %v4677_v0  ;;  %1182 = vmatprep.subr.mxu1 %v4677_v0  ;;  %958 = vmatpush1.msra.mxu0 %v819_v8  ;;  %v846_v19 = vld [vmem:[#allocation6 + $0x138] sm:$0xff]  ;;  %v813_v20 = vld [vmem:[#allocation6 + $0x30] sm:$0xff]  ;;  %p4604_p7 = pnand %p4603_p5, %p7382_p2  ;;  %s4606_s20 = sshll.u32 %s4678_s9, 4  ;;  %s4607_s20 = int_to_ptr.vmem [resolvable:$false] %s4606_s20 }
  0x62   : > { %342 = vst [vmem:[#allocation2 + $0x80] sm:$0xff] %v4677_v0  ;;  %343 = vst [vmem:[#allocation2 + $0x88] sm:$0x3] %v4677_v0  ;;  %1183 = vmatpush1.msra.mxu1 %v851_v9  ;;  %959 = vmatprep.subr.mxu0 %v4677_v0  ;;  %v845_v21 = vld [vmem:[#allocation6 + $0x130] sm:$0xff]  ;;  %v812_v22 = vld [vmem:[#allocation6 + $0x28] sm:$0xff]  ;;  %s4608_s22 = scalar_lea.vmem %s4607_s20, 8192  ;;  %p4609_p13 = scmp.lt.s32.totalorder %s7075_s18, %s4607_s20 }
  0x63   : > { %344 = vst [vmem:[#allocation2 + $0x90] sm:$0xff] %v4677_v0  ;;  %345 = vst [vmem:[#allocation2 + $0x98] sm:$0xff] %v4677_v0  ;;  %1184 = vmatprep.subr.mxu1 %v4677_v0  ;;  %960 = vmatpush1.msra.mxu0 %v818_v10  ;;  %v844_v23 = vld [vmem:[#allocation6 + $0x128] sm:$0xff]  ;;  %v811_v24 = vld [vmem:[#allocation6 + $0x20] sm:$0xff]  ;;  %p4605_p12 = pneg %p4604_p7  ;;  %p4610_p0 = scmp.lt.s32.totalorder %s4608_s22, %s4602_s28 }
  0x64   : > { %346 = vst [vmem:[#allocation2 + $0xa0] sm:$0x3] %v4677_v0  ;;  %347 = vst [vmem:[#allocation2 + $0xa8] sm:$0xff] %v4677_v0  ;;  %1185 = vmatpush1.msra.mxu1 %v850_v11  ;;  %961 = vmatprep.subr.mxu0 %v4677_v0  ;;  %v843_v25 = vld [vmem:[#allocation6 + $0x120] sm:$0xff]  ;;  %v810_v27 = vld [vmem:[#allocation6 + $0x18] sm:$0xff] }
  0x65   : > { %348 = vst [vmem:[#allocation2 + $0xb0] sm:$0xff] %v4677_v0  ;;  %349 = vst [vmem:[#allocation2 + $0xb8] sm:$0x3] %v4677_v0  ;;  %1186 = vmatprep.subr.mxu1 %v4677_v0  ;;  %962 = vmatpush1.msra.mxu0 %v817_v12  ;;  %v380_v26 = vld [vmem:[%s4863_s10] sm:$0xff]  ;;  %v842_v28 = vld [vmem:[#allocation6 + $0x118] sm:$0xff]  ;;  %p4611_p10 = por %p4610_p0, %p4609_p13 }
  0x66   : > { %350 = vst [vmem:[#allocation2 + $0xc0] sm:$0xff] %v4677_v0  ;;  %351 = vst [vmem:[#allocation2 + $0xc8] sm:$0xff] %v4677_v0  ;;  %1187 = vmatpush1.msra.mxu1 %v849_v13  ;;  %963 = vmatprep.subr.mxu0 %v4677_v0  ;;  %v381_v29 = vld [vmem:[%s4863_s10 + $0x8] sm:$0xff]  ;;  %v382_v30 = vld [vmem:[%s4863_s10 + $0x10] sm:$0xff] }
  0x67   : > { %352 = vst [vmem:[#allocation2 + $0xd0] sm:$0x3] %v4677_v0  ;;  %353 = vst [vmem:[#allocation2 + $0xd8] sm:$0xff] %v4677_v0  ;;  %1188 = vmatprep.subr.mxu1 %v4677_v0  ;;  %964 = vmatpush1.msra.mxu0 %v816_v14  ;;  %v383_v31 = vld [vmem:[%s4863_s10 + $0x18] sm:$0xff]  ;;  %v809_v32 = vld [vmem:[#allocation6 + $0x10] sm:$0xff]  ;;  %p4612_p3 = pnand %p4611_p10, %p4605_p12 }
  0x68   : > { %354 = vst [vmem:[#allocation2 + $0xe0] sm:$0xff] %v4677_v0  ;;  %355 = vst [vmem:[#allocation2 + $0xe8] sm:$0x3] %v4677_v0  ;;  %1189 = vmatpush1.msra.mxu1 %v848_v15  ;;  %965 = vmatprep.subr.mxu0 %v4677_v0  ;;  %v841_v33 = vld [vmem:[#allocation6 + $0x110] sm:$0xff]  ;;  %v384_v34 = vld [vmem:[%s4863_s10 + $0x20] sm:$0xff] }
  0x69   : > { %356 = vst [vmem:[#allocation2 + $0xf0] sm:$0xff] %v4677_v0  ;;  %357 = vst [vmem:[#allocation2 + $0xf8] sm:$0xff] %v4677_v0  ;;  %1190 = vmatprep.subr.mxu1 %v4677_v0  ;;  %966 = vmatpush1.msra.mxu0 %v815_v16  ;;  %v385_v35 = vld [vmem:[%s4863_s10 + $0x28] sm:$0xff]  ;;  %v386_v36 = vld [vmem:[%s4863_s10 + $0x30] sm:$0xff] }
  0x6a   : > { %358 = vst [vmem:[#allocation2 + $0x100] sm:$0x3] %v4677_v0  ;;  %359 = vst [vmem:[#allocation2 + $0x108] sm:$0xff] %v4677_v0  ;;  %1191 = vmatpush1.msra.mxu1 %v847_v17  ;;  %967 = vmatprep.subr.mxu0 %v4677_v0  ;;  %v808_v37 = vld [vmem:[#allocation6 + $0x8] sm:$0xff]  ;;  %v387_v39 = vld [vmem:[%s4863_s10 + $0x38] sm:$0xff] }
  0x6b   : > { %360 = vst [vmem:[#allocation2 + $0x110] sm:$0xff] %v4677_v0  ;;  %361 = vst [vmem:[#allocation2 + $0x118] sm:$0x3] %v4677_v0  ;;  %1192 = vmatprep.subr.mxu1 %v4677_v0  ;;  %968 = vmatpush1.msra.mxu0 %v814_v18  ;;  %v840_v38 = vld [vmem:[#allocation6 + $0x108] sm:$0xff]  ;;  %v388_v40 = vld [vmem:[%s4863_s10 + $0x40] sm:$0xff] }
  0x6c   : > { %362 = vst [vmem:[#allocation2 + $0x120] sm:$0xff] %v4677_v0  ;;  %363 = vst [vmem:[#allocation2 + $0x128] sm:$0xff] %v4677_v0  ;;  %1193 = vmatpush1.msra.mxu1 %v846_v19  ;;  %969 = vmatprep.subr.mxu0 %v4677_v0  ;;  %v389_v41 = vld [vmem:[%s4863_s10 + $0x48] sm:$0xff]  ;;  %v807_v42 = vld [vmem:[#allocation6] sm:$0xff] }
  0x6d   : > { %364 = vst [vmem:[#allocation2 + $0x130] sm:$0x3] %v4677_v0  ;;  %365 = vst [vmem:[#allocation2 + $0x138] sm:$0xff] %v4677_v0  ;;  %1194 = vmatprep.subr.mxu1 %v4677_v0  ;;  %970 = vmatpush1.msra.mxu0 %v813_v20  ;;  %v839_v43 = vld [vmem:[#allocation6 + $0x100] sm:$0xff]  ;;  %v390_v44 = vld [vmem:[%s4863_s10 + $0x50] sm:$0xff] }
  0x6e   : > { %366 = vst [vmem:[#allocation2 + $0x140] sm:$0xff] %v4677_v0  ;;  %367 = vst [vmem:[#allocation2 + $0x148] sm:$0x3] %v4677_v0  ;;  %1195 = vmatpush1.msra.mxu1 %v845_v21  ;;  %971 = vmatprep.subr.mxu0 %v4677_v0  ;;  %v391_v45 = vld [vmem:[%s4863_s10 + $0x58] sm:$0xff]  ;;  %v392_v48 = vld [vmem:[%s4863_s10 + $0x60] sm:$0xff] }
  0x6f   : > { %368 = vst [vmem:[#allocation2 + $0x150] sm:$0xff] %v4677_v0  ;;  %369 = vst [vmem:[#allocation2 + $0x158] sm:$0xff] %v4677_v0  ;;  %1196 = vmatprep.subr.mxu1 %v4677_v0  ;;  %972 = vmatpush1.msra.mxu0 %v812_v22  ;;  %v838_v46 = vld [vmem:[#allocation6 + $0xf8] sm:$0xff]  ;;  %v837_v49 = vld [vmem:[#allocation6 + $0xf0] sm:$0xff] }
  0x70   : > { %370 = vst [vmem:[#allocation2 + $0x160] sm:$0x3] %v4677_v0  ;;  %371 = vst [vmem:[#allocation2 + $0x168] sm:$0xff] %v4677_v0  ;;  %1197 = vmatpush1.msra.mxu1 %v844_v23  ;;  %973 = vmatprep.subr.mxu0 %v4677_v0  ;;  %v870_v47 = vld [vmem:[#allocation6 + $0x1f8] sm:$0xff]  ;;  %v869_v50 = vld [vmem:[#allocation6 + $0x1f0] sm:$0xff] }
  0x71   : > { %372 = vst [vmem:[#allocation2 + $0x170] sm:$0xff] %v4677_v0  ;;  %373 = vst [vmem:[#allocation2 + $0x178] sm:$0x3] %v4677_v0  ;;  %1198 = vmatprep.subr.mxu1 %v4677_v0  ;;  %974 = vmatpush1.msra.mxu0 %v811_v24  ;;  %v836_v51 = vld [vmem:[#allocation6 + $0xe8] sm:$0xff]  ;;  %v835_v53 = vld [vmem:[#allocation6 + $0xe0] sm:$0xff] }
  0x72   : > { %374 = vst [vmem:[#allocation2 + $0x180] sm:$0xff] %v4677_v0  ;;  %375 = vst [vmem:[#allocation2 + $0x188] sm:$0xff] %v4677_v0  ;;  %1199 = vmatpush1.msra.mxu1 %v843_v25  ;;  %975 = vmatprep.subr.mxu0 %v4677_v0  ;;  %v868_v52 = vld [vmem:[#allocation6 + $0x1e8] sm:$0xff]  ;;  %v867_v54 = vld [vmem:[#allocation6 + $0x1e0] sm:$0xff] }
  0x73   : > { %376 = vst [vmem:[#allocation2 + $0x190] sm:$0x3] %v4677_v0  ;;  %379 = vst [vmem:[#allocation2 + $0x1a8] sm:$0x3] %v4677_v0  ;;  %1200 = vmatprep.subr.mxu1 %v4677_v0  ;;  %976 = vmatpush1.msra.mxu0 %v810_v27  ;;  %v393_v55 = vld [vmem:[%s4863_s10 + $0x68] sm:$0xff]  ;;  %v834_v56 = vld [vmem:[#allocation6 + $0xd8] sm:$0xff] }
  0x74   : > { %413 = vst [vmem:[#allocation2 + $0x19] sm:$0xff] %v380_v26  ;;  %414 = vst [vmem:[#allocation2 + $0x21] sm:$0xff] %v381_v29  ;;  %1201 = vmatpush1.msra.mxu1 %v842_v28  ;;  %977 = vmatprep.subr.mxu0 %v4677_v0  ;;  %v866_v57 = vld [vmem:[#allocation6 + $0x1d8] sm:$0xff]  ;;  %v394_v58 = vld [vmem:[%s4863_s10 + $0x70] sm:$0xff]  ;;  %v661_v29 = vrot.slane %v4677_v0, 2 }
  0x75   : > { %415 = vst [vmem:[#allocation2 + $0x31] sm:$0xff] %v382_v30  ;;  %416 = vst [vmem:[#allocation2 + $0x39] sm:$0xff] %v383_v31  ;;  %1202 = vmatprep.subr.mxu1 %v4677_v0  ;;  %978 = vmatpush1.msra.mxu0 %v809_v32  ;;  %v395_v59 = vld [vmem:[%s4863_s10 + $0x78] sm:$0xff]  ;;  %v833_v60 = vld [vmem:[#allocation6 + $0xd0] sm:$0xff] }
  0x76   : > { %417 = vst [vmem:[#allocation2 + $0x49] sm:$0xff] %v384_v34  ;;  %418 = vst [vmem:[#allocation2 + $0x51] sm:$0xff] %v385_v35  ;;  %1203 = vmatpush1.msra.mxu1 %v841_v33  ;;  %979 = vmatprep.subr.mxu0 %v4677_v0  ;;  %v865_v61 = vld [vmem:[#allocation6 + $0x1d0] sm:$0xff]  ;;  %v396_v62 = vld [vmem:[%s4863_s10 + $0x80] sm:$0xff] }
  0x77   : > { %419 = vst [vmem:[#allocation2 + $0x61] sm:$0xff] %v386_v36  ;;  %420 = vst [vmem:[#allocation2 + $0x69] sm:$0xff] %v387_v39  ;;  %1204 = vmatprep.subr.mxu1 %v4677_v0  ;;  %980 = vmatpush1.msra.mxu0 %v808_v37  ;;  %v397_v63 = vld [vmem:[%s4863_s10 + $0x88] sm:$0xff]  ;;  %v398_v4 = vld [vmem:[%s4863_s10 + $0x90] sm:$0xff] }
  0x78   : > { %421 = vst [vmem:[#allocation2 + $0x79] sm:$0xff] %v388_v40  ;;  %422 = vst [vmem:[#allocation2 + $0x81] sm:$0xff] %v389_v41  ;;  %1205 = vmatpush1.msra.mxu1 %v840_v38  ;;  %981 = vmatprep.subr.mxu0 %v4677_v0  ;;  %v832_v2 = vld [vmem:[#allocation6 + $0xc8] sm:$0xff]  ;;  %v399_v5 = vld [vmem:[%s4863_s10 + $0x98] sm:$0xff] }
  0x79   : > { %423 = vst [vmem:[#allocation2 + $0x91] sm:$0xff] %v390_v44  ;;  %1206 = vmatprep.subr.mxu1 %v4677_v0  ;;  %424 = vst [vmem:[#allocation2 + $0x99] sm:$0xff] %v391_v45  ;;  %982 = vmatpush1.msra.mxu0 %v807_v42  ;;  %v864_v3 = vld [vmem:[#allocation6 + $0x1c8] sm:$0xff]  ;;  %v831_v6 = vld [vmem:[#allocation6 + $0xc0] sm:$0xff] }
  0x7a   : > { %1207 = vmatpush1.msra.mxu1 %v839_v43  ;;  %425 = vst [vmem:[#allocation2 + $0xa9] sm:$0xff] %v392_v48  ;;  %983 = vmatprep.subr.mxu0 %v4677_v0  ;;  %426 = vst [vmem:[#allocation2 + $0xb1] sm:$0xff] %v393_v55  ;;  %v863_v7 = vld [vmem:[#allocation6 + $0x1c0] sm:$0xff]  ;;  %v830_v9 = vld [vmem:[#allocation6 + $0xb8] sm:$0xff] }
  0x7b   : > { %1208 = vmatprep.subr.mxu1 %v4677_v0  ;;  %984 = vmatpush2.msra.mxu0 %v838_v46  ;;  %427 = vst [vmem:[#allocation2 + $0xc1] sm:$0xff] %v394_v58  ;;  %428 = vst [vmem:[#allocation2 + $0xc9] sm:$0xff] %v395_v59  ;;  %v400_v8 = vld [vmem:[%s4863_s10 + $0xa0] sm:$0xff]  ;;  %v862_v10 = vld [vmem:[#allocation6 + $0x1b8] sm:$0xff] }
  0x7c   : > { %1209 = vmatpush2.msra.mxu1 %v870_v47  ;;  %985 = vmatprep.subr.mxu0 %v4677_v0  ;;  %429 = vst [vmem:[#allocation2 + $0xd9] sm:$0xff] %v396_v62  ;;  %430 = vst [vmem:[#allocation2 + $0xe1] sm:$0xff] %v397_v63  ;;  %v829_v11 = vld [vmem:[#allocation6 + $0xb0] sm:$0xff]  ;;  %v401_v13 = vld [vmem:[%s4863_s10 + $0xa8] sm:$0xff] }
  0x7d   : > { %1210 = vmatprep.subr.mxu1 %v4677_v0  ;;  %986 = vmatpush2.msra.mxu0 %v837_v49  ;;  %431 = vst [vmem:[#allocation2 + $0xf1] sm:$0xff] %v398_v4  ;;  %432 = vst [vmem:[#allocation2 + $0xf9] sm:$0xff] %v399_v5  ;;  %v861_v12 = vld [vmem:[#allocation6 + $0x1b0] sm:$0xff]  ;;  %v828_v14 = vld [vmem:[#allocation6 + $0xa8] sm:$0xff] }
  0x7e   : > { %1211 = vmatpush2.msra.mxu1 %v869_v50  ;;  %987 = vmatprep.subr.mxu0 %v4677_v0  ;;  %433 = vst [vmem:[#allocation2 + $0x109] sm:$0xff] %v400_v8  ;;  %434 = vst [vmem:[#allocation2 + $0x111] sm:$0xff] %v401_v13  ;;  %v860_v15 = vld [vmem:[#allocation6 + $0x1a8] sm:$0xff]  ;;  %v402_v16 = vld [vmem:[%s4863_s10 + $0xb0] sm:$0xff] }
  0x7f   : > { %1212 = vmatprep.subr.mxu1 %v4677_v0  ;;  %988 = vmatpush2.msra.mxu0 %v836_v51  ;;  %v827_v17 = vld [vmem:[#allocation6 + $0xa0] sm:$0xff]  ;;  %435 = vst [vmem:[#allocation2 + $0x121] sm:$0xff] %v402_v16  ;;  %v403_v19 = vld [vmem:[%s4863_s10 + $0xb8] sm:$0xff]  ;;  %v825_v23 = vld [vmem:[#allocation6 + $0x90] sm:$0xff] }
  0x80   : > { %1213 = vmatpush2.msra.mxu1 %v868_v52  ;;  %989 = vmatprep.subr.mxu0 %v4677_v0  ;;  %v859_v18 = vld [vmem:[#allocation6 + $0x1a0] sm:$0xff]  ;;  %v826_v20 = vld [vmem:[#allocation6 + $0x98] sm:$0xff]  ;;  %436 = vst [vmem:[#allocation2 + $0x129] sm:$0xff] %v403_v19  ;;  %v857_v24 = vld [vmem:[#allocation6 + $0x190] sm:$0xff] }
  0x81   : > { %1214 = vmatprep.subr.mxu1 %v4677_v0  ;;  %990 = vmatpush2.msra.mxu0 %v835_v53  ;;  %v858_v21 = vld [vmem:[#allocation6 + $0x198] sm:$0xff]  ;;  %v404_v22 = vld [vmem:[%s4863_s10 + $0xc0] sm:$0xff]  ;;  %v405_v26 = vld [vmem:[%s4863_s10 + $0xc8] sm:$0xff] }
  0x82   : > { %1215 = vmatpush2.msra.mxu1 %v867_v54  ;;  %991 = vmatprep.subr.mxu0 %v4677_v0  ;;  %437 = vst [vmem:[#allocation2 + $0x139] sm:$0xff] %v404_v22  ;;  %v447_v25 = vld [vmem:[#allocation2 + $0x10] sm:$0x3]  ;;  %438 = vst [vmem:[#allocation2 + $0x141] sm:$0xff] %v405_v26  ;;  %v824_v27 = vld [vmem:[#allocation6 + $0x88] sm:$0xff] }
  0x83   : > { %1216 = vmatprep.subr.mxu1 %v4677_v0  ;;  %992 = vmatpush2.msra.mxu0 %v834_v56  ;;  %v856_v28 = vld [vmem:[#allocation6 + $0x188] sm:$0xff]  ;;  %v406_v30 = vld [vmem:[%s4863_s10 + $0xd0] sm:$0xff]  ;;  %v823_v31 = vld [vmem:[#allocation6 + $0x80] sm:$0xff]  ;;  %v551_v32 = vrot.slane %v447_v25, 1  ;;  %v664_v37 = vrot.slane %v447_v25, 2 }
  0x84   : > { %1217 = vmatpush2.msra.mxu1 %v866_v57  ;;  %993 = vmatprep.subr.mxu0 %v4677_v0  ;;  %439 = vst [vmem:[#allocation2 + $0x151] sm:$0xff] %v406_v30  ;;  %v855_v33 = vld [vmem:[#allocation6 + $0x180] sm:$0xff]  ;;  %v5018_v34 = vld [vmem:[#allocation2 + $0x20] sm:$0xff]  ;;  %v407_v35 = vld [vmem:[%s4863_s10 + $0xd8] sm:$0xff] }
  0x85   : > { %1218 = vmatprep.subr.mxu1 %v4677_v0  ;;  %994 = vmatpush2.msra.mxu0 %v833_v60  ;;  %v448_v36 = vld [vmem:[#allocation2 + $0x18] sm:$0xff]  ;;  %440 = vst [vmem:[#allocation2 + $0x159] sm:$0xff] %v407_v35  ;;  %v408_v38 = vld [vmem:[%s4863_s10 + $0xe0] sm:$0xff]  ;;  %v886_v39 = vld [vmem:[#allocation6 + $0x278] sm:$0xff]  ;;  %v552_v40 = vsel %vm547_vm0, %v4927_v1, %v551_v32  ;;  %v554_v42 = vrot.slane %v5018_v34, 1  ;;  %v665_v45 = vsel %vm660_vm1, %v661_v29, %v664_v37  ;;  %v667_v47 = vrot.slane %v5018_v34, 2 }
  0x86   : > { %1219 = vmatpush2.msra.mxu1 %v865_v61  ;;  %995 = vmatprep.subr.mxu0 %v4677_v0  ;;  %v553_v41 = vrot.slane %v448_v36, 1  ;;  %441 = vst [vmem:[#allocation2 + $0x169] sm:$0xff] %v408_v38  ;;  %v450_v43 = vld [vmem:[#allocation2 + $0x28] sm:$0x3]  ;;  %v409_v44 = vld [vmem:[%s4863_s10 + $0xe8] sm:$0xff]  ;;  %v885_v1 = vld [vmem:[#allocation6 + $0x270] sm:$0xff] }
  0x87   : > { %1220 = vmatprep.subr.mxu1 %v4677_v0  ;;  %996 = vmatpush2.msra.mxu0 %v832_v2  ;;  %442 = vst [vmem:[#allocation2 + $0x171] sm:$0xff] %v409_v44  ;;  %v666_v46 = vrot.slane %v448_v36, 2  ;;  %v410_v48 = vld [vmem:[%s4863_s10 + $0xf0] sm:$0xff]  ;;  %v5038_v50 = vld [vmem:[#allocation2 + $0x30] sm:$0xff]  ;;  %v556_v51 = vrot.slane %v450_v43, 1  ;;  %v411_v52 = vld [vmem:[%s4863_s10 + $0xf8] sm:$0xff] }
  0x88   : > { %1221 = vmatpush2.msra.mxu1 %v864_v3  ;;  %997 = vmatprep.subr.mxu0 %v4677_v0  ;;  %v5036_v49 = vsel %vm547_vm0, %v553_v41, %v554_v42  ;;  %443 = vst [vmem:[#allocation2 + $0x181] sm:$0xff] %v410_v48  ;;  %v5042_v53 = vld [vmem:[#allocation2 + $0x38] sm:$0xff]  ;;  %v918_v54 = vld [vmem:[#allocation6 + $0x378] sm:$0xff]  ;;  %444 = vst [vmem:[#allocation2 + $0x189] sm:$0xff] %v411_v52  ;;  %v669_v57 = vrot.slane %v450_v43, 2  ;;  %v558_v59 = vrot.slane %v5038_v50, 1 }
  0x89   : > { %1222 = vmatprep.subr.mxu1 %v4677_v0  ;;  %998 = vmatpush2.msra.mxu0 %v831_v6  ;;  %v5048_v55 = vsel %vm660_vm1, %v666_v46, %v667_v47  ;;  %v884_v56 = vld [vmem:[#allocation6 + $0x268] sm:$0xff]  ;;  %v5052_v58 = vsel %vm547_vm0, %v554_v42, %v556_v51  ;;  %v559_v60 = vrot.slane %v5042_v53, 1  ;;  %v453_v61 = vld [vmem:[#allocation2 + $0x40] sm:$0x3]  ;;  %v883_v2 = vld [vmem:[#allocation6 + $0x260] sm:$0xff]  ;;  %v671_v3 = vrot.slane %v5038_v50, 2 }
  0x8a   : > { %1223 = vmatpush2.msra.mxu1 %v863_v7  ;;  %999 = vmatprep.subr.mxu0 %v4677_v0  ;;  %v917_v62 = vld [vmem:[#allocation6 + $0x370] sm:$0xff]  ;;  %v5061_v63 = vsel %vm660_vm1, %v667_v47, %v669_v57  ;;  %v672_v4 = vrot.slane %v5042_v53, 2  ;;  %v5069_v6 = vld [vmem:[#allocation2 + $0x48] sm:$0xff]  ;;  %v561_v7 = vrot.slane %v453_v61, 1  ;;  %v5072_v8 = vld [vmem:[#allocation2 + $0x50] sm:$0xff] }
  0x8b   : > { %1224 = vmatprep.subr.mxu1 %v4677_v0  ;;  %1000 = vmatpush2.msra.mxu0 %v830_v9  ;;  %v5067_v5 = vsel %vm547_vm0, %v558_v59, %v559_v60  ;;  %v916_v9 = vld [vmem:[#allocation6 + $0x368] sm:$0xff]  ;;  %v881_v19 = vld [vmem:[#allocation6 + $0x250] sm:$0xff]  ;;  %v5104_v25 = vld [vmem:[#allocation2 + $0x68] sm:$0xff] }
  0x8c   : > { %1225 = vmatpush2.msra.mxu1 %v862_v10  ;;  %1001 = vmatprep.subr.mxu0 %v4677_v0  ;;  %v5079_v10 = vsel %vm660_vm1, %v671_v3, %v672_v4  ;;  %v5083_v13 = vsel %vm547_vm0, %v559_v60, %v561_v7  ;;  %v456_v16 = vld [vmem:[#allocation2 + $0x58] sm:$0x3]  ;;  %v914_v26 = vld [vmem:[#allocation6 + $0x358] sm:$0xff]  ;;  %v569_v32 = vrot.slane %v5104_v25, 1  ;;  %v682_v38 = vrot.slane %v5104_v25, 2  ;;  %v5136_v42 = vld [vmem:[#allocation2 + $0x80] sm:$0xff] }
  0x8d   : > { %1226 = vmatprep.subr.mxu1 %v4677_v0  ;;  %1002 = vmatpush2.msra.mxu0 %v829_v11  ;;  %v882_v11 = vld [vmem:[#allocation6 + $0x258] sm:$0xff]  ;;  %v912_v43 = vld [vmem:[#allocation6 + $0x348] sm:$0xff]  ;;  %v574_v48 = vrot.slane %v5136_v42, 1  ;;  %v911_v52 = vld [vmem:[#allocation6 + $0x340] sm:$0xff]  ;;  %v687_v57 = vrot.slane %v5136_v42, 2 }
  0x8e   : > { %1227 = vmatpush2.msra.mxu1 %v861_v12  ;;  %1003 = vmatprep.subr.mxu0 %v4677_v0  ;;  %v674_v12 = vrot.slane %v453_v61, 2  ;;  %v462_v51 = vld [vmem:[#allocation2 + $0x88] sm:$0x3]  ;;  %v5165_v60 = vld [vmem:[#allocation2 + $0x90] sm:$0xff] }
  0x8f   : > { %1228 = vmatprep.subr.mxu1 %v4677_v0  ;;  %1004 = vmatpush2.msra.mxu0 %v828_v14  ;;  %v563_v14 = vrot.slane %v5069_v6, 1  ;;  %v576_v61 = vrot.slane %v462_v51, 1  ;;  %v689_v7 = vrot.slane %v462_v51, 2  ;;  %v5231_v51 = vld [vmem:[#allocation2 + $0xc0] sm:$0xff] }
  0x90   : > { %1229 = vmatpush2.msra.mxu1 %v860_v15  ;;  %1005 = vmatprep.subr.mxu0 %v4677_v0  ;;  %v564_v15 = vrot.slane %v5072_v8, 1 }
  0x91   : > { %1230 = vmatprep.subr.mxu1 %v4677_v0  ;;  %1006 = vmatpush2.msra.mxu0 %v827_v17  ;;  %v915_v17 = vld [vmem:[#allocation6 + $0x360] sm:$0xff] }
  0x92   : > { %1231 = vmatpush2.msra.mxu1 %v859_v18  ;;  %1007 = vmatprep.subr.mxu0 %v4677_v0  ;;  %v5093_v18 = vsel %vm660_vm1, %v672_v4, %v674_v12  ;;  %v5099_v22 = vsel %vm547_vm0, %v563_v14, %v564_v15  ;;  %v876_v4 = vld [vmem:[#allocation6 + $0x228] sm:$0xff]  ;;  %v465_v14 = vld [vmem:[#allocation2 + $0xa0] sm:$0x3] }
  0x93   : > { %1232 = vmatprep.subr.mxu1 %v4677_v0  ;;  %1008 = vmatpush2.msra.mxu0 %v826_v20  ;;  %v676_v20 = vrot.slane %v5069_v6, 2 }
  0x94   : > { %1233 = vmatpush2.msra.mxu1 %v858_v21  ;;  %1009 = vmatprep.subr.mxu0 %v4677_v0  ;;  %v677_v21 = vrot.slane %v5072_v8, 2 }
  0x95   : > { %1234 = vmatprep.subr.mxu1 %v4677_v0  ;;  %1010 = vmatpush2.msra.mxu0 %v825_v23  ;;  %v5101_v23 = vld [vmem:[#allocation2 + $0x60] sm:$0xff] }
  0x96   : > { %1235 = vmatpush2.msra.mxu1 %v857_v24  ;;  %1011 = vmatprep.subr.mxu0 %v4677_v0  ;;  %v566_v24 = vrot.slane %v456_v16, 1  ;;  %v681_v37 = vrot.slane %v5101_v23, 2 }
  0x97   : > { %1236 = vmatprep.subr.mxu1 %v4677_v0  ;;  %1012 = vmatpush2.msra.mxu0 %v824_v27  ;;  %v5111_v27 = vsel %vm660_vm1, %v676_v20, %v677_v21 }
  0x98   : > { %1237 = vmatpush2.msra.mxu1 %v856_v28  ;;  %1013 = vmatprep.subr.mxu0 %v4677_v0  ;;  %v880_v28 = vld [vmem:[#allocation6 + $0x248] sm:$0xff]  ;;  %v5115_v30 = vsel %vm547_vm0, %v564_v15, %v566_v24  ;;  %v5143_v44 = vsel %vm660_vm1, %v681_v37, %v682_v38  ;;  %v909_v15 = vld [vmem:[#allocation6 + $0x330] sm:$0xff]  ;;  %v5197_v24 = vld [vmem:[#allocation2 + $0xa8] sm:$0xff] }
  0x99   : > { %1238 = vmatprep.subr.mxu1 %v4677_v0  ;;  %1014 = vmatpush2.msra.mxu0 %v823_v31  ;;  %v568_v31 = vrot.slane %v5101_v23, 1 }
  0x9a   : > { %1239 = vmatpush2.msra.mxu1 %v855_v33  ;;  %1016 = vmatmul.mubr.f32.vlgmr.msra.gmra.mxu0 %v4677_v0  ;;  %v459_v33 = vld [vmem:[#allocation2 + $0x70] sm:$0x3] }
  0x9b   : > { %1240 = vmatprep.mubr.f32.mxu1 %v448_v36  ;;  %1401 = vmatprep.subr.mxu0 %v4677_v0  ;;  %v571_v41 = vrot.slane %v459_v33, 1 }
  0x9c   : > { %1241 = vmatmul.mubr.f32.vlgmr.msra.gmra.mxu1 %v661_v29  ;;  %1402 = vmatpush1.msra.mxu0 %v886_v39  ;;  %v679_v29 = vrot.slane %v456_v16, 2  ;;  %v5131_v39 = vsel %vm547_vm0, %v568_v31, %v569_v32  ;;  %v5189_v16 = vsel %vm660_vm1, %v687_v57, %v689_v7  ;;  %v588_v7 = vrot.slane %v5231_v51, 1 }
  0x9d   : > { %1020 = vmatprep.mubr.f32.mxu0 %v552_v40  ;;  %1245 = vmatprep.mubr.f32.mxu1 %v5018_v34  ;;  %v5133_v40 = vld [vmem:[#allocation2 + $0x78] sm:$0xff]  ;;  %v5147_v46 = vsel %vm547_vm0, %v569_v32, %v571_v41  ;;  %v874_v32 = vld [vmem:[#allocation6 + $0x218] sm:$0xff]  ;;  %v907_v41 = vld [vmem:[#allocation6 + $0x320] sm:$0xff] }
  0x9e   : > { %1403 = vmatprep.subr.mxu0 %v4677_v0  ;;  %1021 = vmatmul.mubr.f32.gmra.mxu0 %v4677_v0  ;;  %v5125_v35 = vsel %vm660_vm1, %v677_v21, %v679_v29  ;;  %v573_v47 = vrot.slane %v5133_v40, 1  ;;  %v908_v29 = vld [vmem:[#allocation6 + $0x328] sm:$0xff] }
  0x9f   : > { %1626 = vmatprep.subr.mxu1 %v4677_v0  ;;  %1404 = vmatpush1.msra.mxu0 %v885_v1  ;;  %v684_v1 = vrot.slane %v459_v33, 2  ;;  %v694_v33 = vrot.slane %v465_v14, 2 }
  0xa0   : > { %1246 = vmatmul.mubr.f32.gmra.mxu1 %v665_v45  ;;  %1025 = vmatprep.mubr.f32.mxu0 %v5036_v49  ;;  %v878_v45 = vld [vmem:[#allocation6 + $0x238] sm:$0xff]  ;;  %v5163_v59 = vsel %vm547_vm0, %v573_v47, %v574_v48 }
  0xa1   : > { %1250 = vmatprep.mubr.f32.mxu1 %v5038_v50  ;;  %1405 = vmatprep.subr.mxu0 %v4677_v0 }
  0xa2   : > { %1627 = vmatpush1.msra.mxu1 %v918_v54  ;;  %1026 = vmatmul.mubr.f32.gmra.mxu0 %v448_v36  ;;  %v879_v36 = vld [vmem:[#allocation6 + $0x240] sm:$0xff]  ;;  %v877_v54 = vld [vmem:[#allocation6 + $0x230] sm:$0xff] }
  0xa3   : > { %1628 = vmatprep.subr.mxu1 %v4677_v0  ;;  %1406 = vmatpush1.msra.mxu0 %v884_v56  ;;  %v686_v56 = vrot.slane %v5133_v40, 2 }
  0xa4   : > { %1251 = vmatmul.mubr.f32.gmra.mxu1 %v5048_v55  ;;  %1030 = vmatprep.mubr.f32.mxu0 %v5052_v58 }
  0xa5   : > { %1255 = vmatprep.mubr.f32.mxu1 %v5042_v53  ;;  %1407 = vmatprep.subr.mxu0 %v4677_v0  ;;  %v5175_v3 = vsel %vm660_vm1, %v686_v56, %v687_v57  ;;  %v906_v56 = vld [vmem:[#allocation6 + $0x318] sm:$0xff] }
  0xa6   : > { %1629 = vmatpush1.msra.mxu1 %v917_v62  ;;  %1031 = vmatmul.mubr.f32.gmra.mxu0 %v5018_v34  ;;  %v913_v34 = vld [vmem:[#allocation6 + $0x350] sm:$0xff]  ;;  %v5168_v62 = vld [vmem:[#allocation2 + $0x98] sm:$0xff] }
  0xa7   : > { %1630 = vmatprep.subr.mxu1 %v4677_v0  ;;  %1408 = vmatpush1.msra.mxu0 %v883_v2  ;;  %v910_v2 = vld [vmem:[#allocation6 + $0x338] sm:$0xff]  ;;  %v579_v12 = vrot.slane %v5168_v62, 1  ;;  %v692_v20 = vrot.slane %v5168_v62, 2 }
  0xa8   : > { %1256 = vmatmul.mubr.f32.gmra.mxu1 %v5061_v63  ;;  %1035 = vmatprep.mubr.f32.mxu0 %v5067_v5 }
  0xa9   : > { %1260 = vmatprep.mubr.f32.mxu1 %v5069_v6  ;;  %1409 = vmatprep.subr.mxu0 %v4677_v0 }
  0xaa   : > { %1631 = vmatpush1.msra.mxu1 %v916_v9  ;;  %1036 = vmatmul.mubr.f32.gmra.mxu0 %v5038_v50  ;;  %v5179_v9 = vsel %vm547_vm0, %v574_v48, %v576_v61  ;;  %v872_v61 = vld [vmem:[#allocation6 + $0x208] sm:$0xff] }
  0xab   : > { %1632 = vmatprep.subr.mxu1 %v4677_v0  ;;  %1410 = vmatpush1.msra.mxu0 %v882_v11  ;;  %v578_v11 = vrot.slane %v5165_v60, 1 }
  0xac   : > { %1261 = vmatmul.mubr.f32.gmra.mxu1 %v5079_v10  ;;  %1040 = vmatprep.mubr.f32.mxu0 %v5083_v13 }
  0xad   : > { %1265 = vmatprep.mubr.f32.mxu1 %v5072_v8  ;;  %1411 = vmatprep.subr.mxu0 %v4677_v0  ;;  %v5195_v21 = vsel %vm547_vm0, %v578_v11, %v579_v12 }
  0xae   : > { %1633 = vmatpush1.msra.mxu1 %v915_v17  ;;  %1041 = vmatmul.mubr.f32.gmra.mxu0 %v5042_v53  ;;  %v5157_v53 = vsel %vm660_vm1, %v682_v38, %v684_v1  ;;  %v875_v17 = vld [vmem:[#allocation6 + $0x220] sm:$0xff]  ;;  %v468_v38 = vld [vmem:[#allocation2 + $0xb8] sm:$0x3]  ;;  %v696_v1 = vrot.slane %v5197_v24, 2 }
  0xaf   : > { %1634 = vmatprep.subr.mxu1 %v4677_v0  ;;  %1412 = vmatpush1.msra.mxu0 %v881_v19  ;;  %v691_v19 = vrot.slane %v5165_v60, 2 }
  0xb0   : > { %1266 = vmatmul.mubr.f32.gmra.mxu1 %v5093_v18  ;;  %1045 = vmatprep.mubr.f32.mxu0 %v5099_v22 }
  0xb1   : > { %1270 = vmatprep.mubr.f32.mxu1 %v5101_v23  ;;  %1413 = vmatprep.subr.mxu0 %v4677_v0  ;;  %v5207_v31 = vsel %vm660_vm1, %v691_v19, %v692_v20  ;;  %v701_v19 = vrot.slane %v5231_v51, 2 }
  0xb2   : > { %1635 = vmatpush1.msra.mxu1 %v914_v26  ;;  %1046 = vmatmul.mubr.f32.gmra.mxu0 %v5069_v6  ;;  %v581_v26 = vrot.slane %v465_v14, 1  ;;  %v905_v14 = vld [vmem:[#allocation6 + $0x310] sm:$0xff] }
  0xb3   : > { %1636 = vmatprep.subr.mxu1 %v4677_v0  ;;  %1414 = vmatpush1.msra.mxu0 %v880_v28  ;;  %v5200_v28 = vld [vmem:[#allocation2 + $0xb0] sm:$0xff] }
  0xb4   : > { %1271 = vmatmul.mubr.f32.gmra.mxu1 %v5111_v27  ;;  %1050 = vmatprep.mubr.f32.mxu0 %v5115_v30  ;;  %v584_v37 = vrot.slane %v5200_v28, 1  ;;  %v697_v47 = vrot.slane %v5200_v28, 2 }
  0xb5   : > { %1275 = vmatprep.mubr.f32.mxu1 %v5104_v25  ;;  %1415 = vmatprep.subr.mxu0 %v4677_v0 }
  0xb6   : > { %1637 = vmatpush1.msra.mxu1 %v913_v34  ;;  %1051 = vmatmul.mubr.f32.gmra.mxu0 %v5072_v8  ;;  %v5209_v34 = vld [vmem:[#allocation2] sm:$0xff]  ;;  %v5241_v57 = vsel %vm660_vm1, %v696_v1, %v697_v47 }
  0xb7   : > { %1638 = vmatprep.subr.mxu1 %v4677_v0  ;;  %1416 = vmatpush1.msra.mxu0 %v879_v36  ;;  %v5213_v36 = vsel %vm547_vm0, %v579_v12, %v581_v26  ;;  %v471_v12 = vld [vmem:[#allocation2 + $0xd0] sm:$0x3] }
  0xb8   : > { %1276 = vmatmul.mubr.f32.gmra.mxu1 %v5125_v35  ;;  %1055 = vmatprep.mubr.f32.mxu0 %v5131_v39 }
  0xb9   : > { %1280 = vmatprep.mubr.f32.mxu1 %v5133_v40  ;;  %1417 = vmatprep.subr.mxu0 %v4677_v0 }
  0xba   : > { %1639 = vmatpush1.msra.mxu1 %v912_v43  ;;  %1056 = vmatmul.mubr.f32.gmra.mxu0 %v5101_v23  ;;  %v5223_v43 = vsel %vm660_vm1, %v692_v20, %v694_v33  ;;  %v5266_v33 = vld [vmem:[#allocation2 + $0xe0] sm:$0xff] }
  0xbb   : > { %1640 = vmatprep.subr.mxu1 %v4677_v0  ;;  %1418 = vmatpush1.msra.mxu0 %v878_v45  ;;  %v873_v45 = vld [vmem:[#allocation6 + $0x210] sm:$0xff]  ;;  %7253 = vst [vmem:[#allocation14_spill] sm:$0xff] %v5266_v33 }
  0xbc   : > { %1281 = vmatmul.mubr.f32.gmra.mxu1 %v5143_v44  ;;  %1060 = vmatprep.mubr.f32.mxu0 %v5147_v46 }
  0xbd   : > { %1285 = vmatprep.mubr.f32.mxu1 %v5136_v42  ;;  %1419 = vmatprep.subr.mxu0 %v4677_v0 }
  0xbe   : > { %1641 = vmatpush1.msra.mxu1 %v911_v52  ;;  %1061 = vmatmul.mubr.f32.gmra.mxu0 %v5104_v25  ;;  %v586_v52 = vrot.slane %v468_v38, 1 }
  0xbf   : > { %1642 = vmatprep.subr.mxu1 %v4677_v0  ;;  %1420 = vmatpush1.msra.mxu0 %v877_v54  ;;  %v5234_v54 = vld [vmem:[#allocation2 + $0xc8] sm:$0xff] }
  0xc0   : > { %1286 = vmatmul.mubr.f32.gmra.mxu1 %v5157_v53  ;;  %1065 = vmatprep.mubr.f32.mxu0 %v5163_v59  ;;  %v589_v11 = vrot.slane %v5234_v54, 1  ;;  %v702_v20 = vrot.slane %v5234_v54, 2 }
  0xc1   : > { %1290 = vmatprep.mubr.f32.mxu1 %v5165_v60  ;;  %1421 = vmatprep.subr.mxu0 %v4677_v0 }
  0xc2   : > { %1643 = vmatpush1.msra.mxu1 %v910_v2  ;;  %1066 = vmatmul.mubr.f32.gmra.mxu0 %v5133_v40  ;;  %v699_v2 = vrot.slane %v468_v38, 2  ;;  %v5261_v26 = vsel %vm547_vm0, %v588_v7, %v589_v11  ;;  %v902_v38 = vld [vmem:[#allocation6 + $0x2f8] sm:$0xff] }
  0xc3   : > { %1644 = vmatprep.subr.mxu1 %v4677_v0  ;;  %1422 = vmatpush1.msra.mxu0 %v876_v4  ;;  %v5245_v4 = vsel %vm547_vm0, %v584_v37, %v586_v52  ;;  %v474_v52 = vld [vmem:[#allocation2 + $0xe8] sm:$0x3] }
  0xc4   : > { %1291 = vmatmul.mubr.f32.gmra.mxu1 %v5175_v3  ;;  %1070 = vmatprep.mubr.f32.mxu0 %v5179_v9 }
  0xc5   : > { %1295 = vmatprep.mubr.f32.mxu1 %v5168_v62  ;;  %1423 = vmatprep.subr.mxu0 %v4677_v0 }
  0xc6   : > { %1645 = vmatpush1.msra.mxu1 %v909_v15  ;;  %1071 = vmatmul.mubr.f32.gmra.mxu0 %v5136_v42  ;;  %v5255_v15 = vsel %vm660_vm1, %v697_v47, %v699_v2  ;;  %v594_v47 = vrot.slane %v5266_v33, 1  ;;  %v901_v2 = vld [vmem:[#allocation6 + $0x2f0] sm:$0xff] }
  0xc7   : > { %1646 = vmatprep.subr.mxu1 %v4677_v0  ;;  %1424 = vmatpush1.msra.mxu0 %v875_v17  ;;  %v583_v0 = vrot.slane %v5197_v24, 1  ;;  %v871_v17 = vld [vmem:[#allocation6 + $0x200] sm:$0xff] }
  0xc8   : > { %1296 = vmatmul.mubr.f32.gmra.mxu1 %v5189_v16  ;;  %1075 = vmatprep.mubr.f32.mxu0 %v5195_v21 }
  0xc9   : > { %1300 = vmatprep.mubr.f32.mxu1 %v5197_v24  ;;  %1425 = vmatprep.subr.mxu0 %v5209_v34  ;;  %v5229_v48 = vsel %vm547_vm0, %v583_v0, %v584_v37  ;;  %v904_v0 = vld [vmem:[#allocation6 + $0x308] sm:$0xff]  ;;  %v5273_v37 = vsel %vm660_vm1, %v701_v19, %v702_v20 }
  0xca   : > { %1647 = vmatpush1.msra.mxu1 %v908_v29  ;;  %1076 = vmatmul.mubr.f32.gmra.mxu0 %v5165_v60  ;;  %v5263_v29 = vld [vmem:[#allocation2 + $0xd8] sm:$0xff] }
  0xcb   : > { %1648 = vmatprep.subr.mxu1 %v5209_v34  ;;  %1426 = vmatpush1.msra.mxu0 %v874_v32  ;;  %7252 = vst [vmem:[#allocation13_spill] sm:$0xff] %v5263_v29  ;;  %v591_v32 = vrot.slane %v471_v12, 1  ;;  %v593_v1 = vrot.slane %v5263_v29, 1  ;;  %v706_v7 = vrot.slane %v5263_v29, 2  ;;  %v5298_v19 = vld [vmem:[#allocation2 + $0xf8] sm:$0xff] }
  0xcc   : > { %1301 = vmatmul.mubr.f32.gmra.mxu1 %v5207_v31  ;;  %1080 = vmatprep.mubr.f32.mxu0 %v5213_v36  ;;  %7257 = vst [vmem:[#allocation18_spill] sm:$0xff] %v5298_v19 }
  0xcd   : > { %1305 = vmatprep.mubr.f32.mxu1 %v5200_v28  ;;  %1427 = vmatprep.subr.mxu0 %v5209_v34 }
  0xce   : > { %1649 = vmatpush1.msra.mxu1 %v907_v41  ;;  %1081 = vmatmul.mubr.f32.gmra.mxu0 %v5168_v62  ;;  %v704_v41 = vrot.slane %v471_v12, 2  ;;  %v5293_v12 = vsel %vm547_vm0, %v593_v1, %v594_v47 }
  0xcf   : > { %1650 = vmatprep.subr.mxu1 %v5209_v34  ;;  %1428 = vmatpush1.msra.mxu0 %v873_v45  ;;  %v5277_v45 = vsel %vm547_vm0, %v589_v11, %v591_v32  ;;  %v707_v11 = vrot.slane %v5266_v33, 2  ;;  %7255 = vst [vmem:[#allocation16_spill] sm:$0xff] %v5293_v12 }
  0xd0   : > { %1306 = vmatmul.mubr.f32.gmra.mxu1 %v5223_v43  ;;  %1085 = vmatprep.mubr.f32.mxu0 %v5229_v48 }
  0xd1   : > { %1310 = vmatprep.mubr.f32.mxu1 %v5231_v51  ;;  %1429 = vmatprep.subr.mxu0 %v5209_v34  ;;  %v5305_v32 = vsel %vm660_vm1, %v706_v7, %v707_v11 }
  0xd2   : > { %1651 = vmatpush1.msra.mxu1 %v906_v56  ;;  %1086 = vmatmul.mubr.f32.gmra.mxu0 %v5197_v24  ;;  %v903_v56 = vld [vmem:[#allocation6 + $0x300] sm:$0xff]  ;;  %7258 = vst [vmem:[#allocation19_spill] sm:$0xff] %v5305_v32 }
  0xd3   : > { %1652 = vmatprep.subr.mxu1 %v5209_v34  ;;  %1430 = vmatpush1.msra.mxu0 %v872_v61  ;;  %v5287_v61 = vsel %vm660_vm1, %v702_v20, %v704_v41  ;;  %v934_v20 = vld [vmem:[#allocation6 + $0x3f8] sm:$0xff] }
  0xd4   : > { %1311 = vmatmul.mubr.f32.gmra.mxu1 %v5241_v57  ;;  %1090 = vmatprep.mubr.f32.mxu0 %v5245_v4  ;;  %7254 = vst [vmem:[#allocation15_spill] sm:$0xff] %v5287_v61 }
  0xd5   : > { %1315 = vmatprep.mubr.f32.mxu1 %v5234_v54  ;;  %1431 = vmatprep.subr.mxu0 %v5209_v34 }
  0xd6   : > { %1653 = vmatpush1.msra.mxu1 %v905_v14  ;;  %1091 = vmatmul.mubr.f32.gmra.mxu0 %v5200_v28  ;;  %v5295_v14 = vld [vmem:[#allocation2 + $0xf0] sm:$0xff] }
  0xd7   : > { %1654 = vmatprep.subr.mxu1 %v5209_v34  ;;  %1432 = vmatpush1.msra.mxu0 %v871_v17  ;;  %7256 = vst [vmem:[#allocation17_spill] sm:$0xff] %v5295_v14  ;;  %v596_v17 = vrot.slane %v474_v52, 1  ;;  %v598_v1 = vrot.slane %v5295_v14, 1  ;;  %v711_v7 = vrot.slane %v5295_v14, 2 }
  0xd8   : > { %1316 = vmatmul.mubr.f32.gmra.mxu1 %v5255_v15  ;;  %1095 = vmatprep.mubr.f32.mxu0 %v5261_v26 }
  0xd9   : > { %1320 = vmatprep.mubr.f32.mxu1 %v5263_v29  ;;  %1433 = vmatprep.subr.mxu0 %v5209_v34  ;;  %v5309_v41 = vsel %vm547_vm0, %v594_v47, %v596_v17  ;;  %v712_v17 = vrot.slane %v5298_v19, 2 }
  0xda   : > { %1655 = vmatpush1.msra.mxu1 %v904_v0  ;;  %1096 = vmatmul.mubr.f32.gmra.mxu0 %v5231_v51  ;;  %v900_v0 = vld [vmem:[#allocation6 + $0x2e8] sm:$0xff]  ;;  %7259 = vst [vmem:[#allocation20_spill] sm:$0xff] %v5309_v41 }
  0xdb   : > { %1656 = vmatprep.subr.mxu1 %v5209_v34  ;;  %1434 = vmatpush2.msra.mxu0 %v902_v38  ;;  %v709_v38 = vrot.slane %v474_v52, 2  ;;  %v899_v52 = vld [vmem:[#allocation6 + $0x2e0] sm:$0xff] }
  0xdc   : > { %1321 = vmatmul.mubr.f32.gmra.mxu1 %v5273_v37  ;;  %1100 = vmatprep.mubr.f32.mxu0 %v5277_v45 }
  0xdd   : > { %1325 = vmatprep.mubr.f32.mxu1 %v5266_v33  ;;  %1435 = vmatprep.subr.mxu0 %v5209_v34  ;;  %v5319_v47 = vsel %vm660_vm1, %v707_v11, %v709_v38  ;;  %v932_v11 = vld [vmem:[#allocation6 + $0x3e8] sm:$0xff]  ;;  %v5337_v38 = vsel %vm660_vm1, %v711_v7, %v712_v17 }
  0xde   : > { %1657 = vmatpush1.msra.mxu1 %v903_v56  ;;  %1101 = vmatmul.mubr.f32.gmra.mxu0 %v5234_v54  ;;  %v599_v56 = vrot.slane %v5298_v19, 1  ;;  %7260 = vst [vmem:[#allocation21_spill] sm:$0xff] %v5319_v47  ;;  %7264 = vst [vmem:[#allocation25_spill] sm:$0xff] %v5337_v38 }
  0xdf   : > { %1658 = vmatprep.subr.mxu1 %v5209_v34  ;;  %1436 = vmatpush2.msra.mxu0 %v901_v2  ;;  %v477_v2 = vld [vmem:[#allocation2 + $0x100] sm:$0x3] }
  0xe0   : > { %1326 = vmatmul.mubr.f32.gmra.mxu1 %v5287_v61  ;;  %1105 = vmatprep.mubr.f32.mxu0 %v5293_v12  ;;  %v933_v61 = vld [vmem:[#allocation6 + $0x3f0] sm:$0xff] }
  0xe1   : > { %1330 = vmatprep.mubr.f32.mxu1 %v5295_v14  ;;  %1437 = vmatprep.subr.mxu0 %v5209_v34 }
  0xe2   : > { %1659 = vmatpush2.msra.mxu1 %v934_v20  ;;  %1106 = vmatmul.mubr.f32.gmra.mxu0 %v5263_v29  ;;  %v5325_v20 = vsel %vm547_vm0, %v598_v1, %v599_v56  ;;  %v5327_v29 = vld [vmem:[#allocation2 + $0x108] sm:$0xff] }
  0xe3   : > { %1660 = vmatprep.subr.mxu1 %v5209_v34  ;;  %1438 = vmatpush2.msra.mxu0 %v900_v0  ;;  %7261 = vst [vmem:[#allocation22_spill] sm:$0xff] %v5325_v20  ;;  %7262 = vst [vmem:[#allocation23_spill] sm:$0xff] %v5327_v29  ;;  %v601_v0 = vrot.slane %v477_v2, 1  ;;  %v898_v1 = vld [vmem:[#allocation6 + $0x2d8] sm:$0xff]  ;;  %v716_v7 = vrot.slane %v5327_v29, 2 }
  0xe4   : > { %1331 = vmatmul.mubr.f32.gmra.mxu1 %v5305_v32  ;;  %1110 = vmatprep.mubr.f32.mxu0 %v5309_v41  ;;  %v5330_v32 = vld [vmem:[#allocation2 + $0x110] sm:$0xff]  ;;  %v714_v41 = vrot.slane %v477_v2, 2  ;;  %v897_v2 = vld [vmem:[#allocation6 + $0x2d0] sm:$0xff] }
  0xe5   : > { %1335 = vmatprep.mubr.f32.mxu1 %v5298_v19  ;;  %1439 = vmatprep.subr.mxu0 %v5209_v34  ;;  %7263 = vst [vmem:[#allocation24_spill] sm:$0xff] %v5330_v32  ;;  %v604_v12 = vrot.slane %v5330_v32, 1 }
  0xe6   : > { %1661 = vmatpush2.msra.mxu1 %v933_v61  ;;  %1111 = vmatmul.mubr.f32.gmra.mxu0 %v5266_v33  ;;  %v5341_v61 = vsel %vm547_vm0, %v599_v56, %v601_v0  ;;  %v603_v33 = vrot.slane %v5327_v29, 1  ;;  %v5351_v56 = vsel %vm660_vm1, %v712_v17, %v714_v41  ;;  %v717_v0 = vrot.slane %v5330_v32, 2  ;;  %v930_v41 = vld [vmem:[#allocation6 + $0x3d8] sm:$0xff]  ;;  %v896_v17 = vld [vmem:[#allocation6 + $0x2c8] sm:$0xff] }
  0xe7   : > { %1662 = vmatprep.subr.mxu1 %v5209_v34  ;;  %1440 = vmatpush2.msra.mxu0 %v899_v52  ;;  %7265 = vst [vmem:[#allocation26_spill] sm:$0xff] %v5341_v61  ;;  %v480_v52 = vld [vmem:[#allocation2 + $0x118] sm:$0x3]  ;;  %7266 = vst [vmem:[#allocation27_spill] sm:$0xff] %v5351_v56 }
  0xe8   : > { %1336 = vmatmul.mubr.f32.gmra.mxu1 %v5319_v47  ;;  %1115 = vmatprep.mubr.f32.mxu0 %v5325_v20  ;;  %v931_v47 = vld [vmem:[#allocation6 + $0x3e0] sm:$0xff] }
  0xe9   : > { %1340 = vmatprep.mubr.f32.mxu1 %v5327_v29  ;;  %1441 = vmatprep.subr.mxu0 %v5209_v34 }
  0xea   : > { %1663 = vmatpush2.msra.mxu1 %v932_v11  ;;  %1116 = vmatmul.mubr.f32.gmra.mxu0 %v5295_v14  ;;  %v5357_v11 = vsel %vm547_vm0, %v603_v33, %v604_v12  ;;  %v5359_v14 = vld [vmem:[#allocation2 + $0x120] sm:$0xff]  ;;  %v5369_v33 = vsel %vm660_vm1, %v716_v7, %v717_v0 }
  0xeb   : > { %1664 = vmatprep.subr.mxu1 %v5209_v34  ;;  %1442 = vmatpush2.msra.mxu0 %v898_v1  ;;  %7267 = vst [vmem:[#allocation28_spill] sm:$0xff] %v5357_v11  ;;  %7268 = vst [vmem:[#allocation29_spill] sm:$0xff] %v5359_v14  ;;  %v606_v1 = vrot.slane %v480_v52, 1  ;;  %v721_v7 = vrot.slane %v5359_v14, 2 }
  0xec   : > { %1341 = vmatmul.mubr.f32.gmra.mxu1 %v5337_v38  ;;  %1120 = vmatprep.mubr.f32.mxu0 %v5341_v61  ;;  %v5362_v38 = vld [vmem:[#allocation2 + $0x128] sm:$0xff]  ;;  %7270 = vst [vmem:[#allocation31_spill] sm:$0xff] %v5369_v33  ;;  %v719_v61 = vrot.slane %v480_v52, 2  ;;  %v895_v52 = vld [vmem:[#allocation6 + $0x2c0] sm:$0xff] }
  0xed   : > { %1345 = vmatprep.mubr.f32.mxu1 %v5330_v32  ;;  %1443 = vmatprep.subr.mxu0 %v5209_v34  ;;  %7269 = vst [vmem:[#allocation30_spill] sm:$0xff] %v5362_v38  ;;  %v609_v20 = vrot.slane %v5362_v38, 1 }
  0xee   : > { %1665 = vmatpush2.msra.mxu1 %v931_v47  ;;  %1121 = vmatmul.mubr.f32.gmra.mxu0 %v5298_v19  ;;  %v5373_v47 = vsel %vm547_vm0, %v604_v12, %v606_v1  ;;  %v608_v19 = vrot.slane %v5359_v14, 1  ;;  %v5383_v12 = vsel %vm660_vm1, %v717_v0, %v719_v61  ;;  %v722_v1 = vrot.slane %v5362_v38, 2  ;;  %v928_v61 = vld [vmem:[#allocation6 + $0x3c8] sm:$0xff]  ;;  %v894_v0 = vld [vmem:[#allocation6 + $0x2b8] sm:$0xff] }
  0xef   : > { %1666 = vmatprep.subr.mxu1 %v5209_v34  ;;  %1444 = vmatpush2.msra.mxu0 %v897_v2  ;;  %7271 = vst [vmem:[#allocation32_spill] sm:$0xff] %v5373_v47  ;;  %v483_v2 = vld [vmem:[#allocation2 + $0x130] sm:$0x3]  ;;  %7272 = vst [vmem:[#allocation33_spill] sm:$0xff] %v5383_v12 }
  0xf0   : > { %1346 = vmatmul.mubr.f32.gmra.mxu1 %v5351_v56  ;;  %1125 = vmatprep.mubr.f32.mxu0 %v5357_v11  ;;  %v929_v56 = vld [vmem:[#allocation6 + $0x3d0] sm:$0xff] }
  0xf1   : > { %1350 = vmatprep.mubr.f32.mxu1 %v5359_v14  ;;  %1445 = vmatprep.subr.mxu0 %v5209_v34 }
  0xf2   : > { %1667 = vmatpush2.msra.mxu1 %v930_v41  ;;  %1126 = vmatmul.mubr.f32.gmra.mxu0 %v5327_v29  ;;  %v5389_v41 = vsel %vm547_vm0, %v608_v19, %v609_v20  ;;  %v5391_v29 = vld [vmem:[#allocation2 + $0x138] sm:$0xff]  ;;  %v5401_v19 = vsel %vm660_vm1, %v721_v7, %v722_v1 }
  0xf3   : > { %1668 = vmatprep.subr.mxu1 %v5209_v34  ;;  %1446 = vmatpush2.msra.mxu0 %v896_v17  ;;  %7273 = vst [vmem:[#allocation34_spill] sm:$0xff] %v5389_v41  ;;  %7274 = vst [vmem:[#allocation35_spill] sm:$0xff] %v5391_v29  ;;  %v611_v17 = vrot.slane %v483_v2, 1  ;;  %v726_v7 = vrot.slane %v5391_v29, 2 }
  0xf4   : > { %1351 = vmatmul.mubr.f32.gmra.mxu1 %v5369_v33  ;;  %1130 = vmatprep.mubr.f32.mxu0 %v5373_v47  ;;  %v5394_v33 = vld [vmem:[#allocation2 + $0x140] sm:$0xff]  ;;  %7276 = vst [vmem:[#allocation37_spill] sm:$0xff] %v5401_v19  ;;  %v724_v47 = vrot.slane %v483_v2, 2 }
  0xf5   : > { %1355 = vmatprep.mubr.f32.mxu1 %v5362_v38  ;;  %1447 = vmatprep.subr.mxu0 %v5209_v34  ;;  %7275 = vst [vmem:[#allocation36_spill] sm:$0xff] %v5394_v33  ;;  %v614_v11 = vrot.slane %v5394_v33, 1  ;;  %v893_v2 = vld [vmem:[#allocation6 + $0x2b0] sm:$0xff] }
  0xf6   : > { %1669 = vmatpush2.msra.mxu1 %v929_v56  ;;  %1131 = vmatmul.mubr.f32.gmra.mxu0 %v5330_v32  ;;  %v5405_v56 = vsel %vm547_vm0, %v609_v20, %v611_v17  ;;  %v613_v32 = vrot.slane %v5391_v29, 1  ;;  %v5415_v20 = vsel %vm660_vm1, %v722_v1, %v724_v47  ;;  %v727_v17 = vrot.slane %v5394_v33, 2  ;;  %v926_v47 = vld [vmem:[#allocation6 + $0x3b8] sm:$0xff]  ;;  %v892_v1 = vld [vmem:[#allocation6 + $0x2a8] sm:$0xff] }
  0xf7   : > { %1670 = vmatprep.subr.mxu1 %v5209_v34  ;;  %1448 = vmatpush2.msra.mxu0 %v895_v52  ;;  %7277 = vst [vmem:[#allocation38_spill] sm:$0xff] %v5405_v56  ;;  %v486_v52 = vld [vmem:[#allocation2 + $0x148] sm:$0x3]  ;;  %7278 = vst [vmem:[#allocation39_spill] sm:$0xff] %v5415_v20 }
  0xf8   : > { %1356 = vmatmul.mubr.f32.gmra.mxu1 %v5383_v12  ;;  %1135 = vmatprep.mubr.f32.mxu0 %v5389_v41  ;;  %v927_v12 = vld [vmem:[#allocation6 + $0x3c0] sm:$0xff] }
  0xf9   : > { %1360 = vmatprep.mubr.f32.mxu1 %v5391_v29  ;;  %1449 = vmatprep.subr.mxu0 %v5209_v34 }
  0xfa   : > { %1671 = vmatpush2.msra.mxu1 %v928_v61  ;;  %1136 = vmatmul.mubr.f32.gmra.mxu0 %v5359_v14  ;;  %v5421_v61 = vsel %vm547_vm0, %v613_v32, %v614_v11  ;;  %v5423_v14 = vld [vmem:[#allocation2 + $0x150] sm:$0xff]  ;;  %v5433_v32 = vsel %vm660_vm1, %v726_v7, %v727_v17 }
  0xfb   : > { %1672 = vmatprep.subr.mxu1 %v5209_v34  ;;  %1450 = vmatpush2.msra.mxu0 %v894_v0  ;;  %7279 = vst [vmem:[#allocation40_spill] sm:$0xff] %v5421_v61  ;;  %7280 = vst [vmem:[#allocation41_spill] sm:$0xff] %v5423_v14  ;;  %v616_v0 = vrot.slane %v486_v52, 1  ;;  %v731_v7 = vrot.slane %v5423_v14, 2 }
  0xfc   : > { %1361 = vmatmul.mubr.f32.gmra.mxu1 %v5401_v19  ;;  %1140 = vmatprep.mubr.f32.mxu0 %v5405_v56  ;;  %v5426_v19 = vld [vmem:[#allocation2 + $0x158] sm:$0xff]  ;;  %7282 = vst [vmem:[#allocation43_spill] sm:$0xff] %v5433_v32  ;;  %v729_v56 = vrot.slane %v486_v52, 2  ;;  %v891_v52 = vld [vmem:[#allocation6 + $0x2a0] sm:$0xff] }
  0xfd   : > { %1365 = vmatprep.mubr.f32.mxu1 %v5394_v33  ;;  %1451 = vmatprep.subr.mxu0 %v5209_v34  ;;  %7281 = vst [vmem:[#allocation42_spill] sm:$0xff] %v5426_v19  ;;  %v619_v41 = vrot.slane %v5426_v19, 1 }
  0xfe   : > { %1673 = vmatpush2.msra.mxu1 %v927_v12  ;;  %1141 = vmatmul.mubr.f32.gmra.mxu0 %v5362_v38  ;;  %v5437_v12 = vsel %vm547_vm0, %v614_v11, %v616_v0  ;;  %v618_v38 = vrot.slane %v5423_v14, 1  ;;  %v5447_v11 = vsel %vm660_vm1, %v727_v17, %v729_v56  ;;  %v732_v0 = vrot.slane %v5426_v19, 2  ;;  %v924_v56 = vld [vmem:[#allocation6 + $0x3a8] sm:$0xff]  ;;  %v890_v17 = vld [vmem:[#allocation6 + $0x298] sm:$0xff] }
  0xff   : > { %1674 = vmatprep.subr.mxu1 %v5209_v34  ;;  %1452 = vmatpush2.msra.mxu0 %v893_v2  ;;  %7283 = vst [vmem:[#allocation44_spill] sm:$0xff] %v5437_v12  ;;  %v489_v2 = vld [vmem:[#allocation2 + $0x160] sm:$0x3]  ;;  %7284 = vst [vmem:[#allocation45_spill] sm:$0xff] %v5447_v11 }
 0x100   : > { %1366 = vmatmul.mubr.f32.gmra.mxu1 %v5415_v20  ;;  %1145 = vmatprep.mubr.f32.mxu0 %v5421_v61  ;;  %v925_v20 = vld [vmem:[#allocation6 + $0x3b0] sm:$0xff] }
 0x101   : > { %1370 = vmatprep.mubr.f32.mxu1 %v5423_v14  ;;  %1453 = vmatprep.subr.mxu0 %v5209_v34 }
 0x102   : > { %1675 = vmatpush2.msra.mxu1 %v926_v47  ;;  %1146 = vmatmul.mubr.f32.gmra.mxu0 %v5391_v29  ;;  %v5453_v47 = vsel %vm547_vm0, %v618_v38, %v619_v41  ;;  %v5455_v29 = vld [vmem:[#allocation2 + $0x168] sm:$0xff]  ;;  %v5465_v38 = vsel %vm660_vm1, %v731_v7, %v732_v0 }
 0x103   : > { %1676 = vmatprep.subr.mxu1 %v5209_v34  ;;  %1454 = vmatpush2.msra.mxu0 %v892_v1  ;;  %v621_v1 = vrot.slane %v489_v2, 1  ;;  %7285 = vst [vmem:[#allocation46_spill] sm:$0xff] %v5465_v38  ;;  %v736_v7 = vrot.slane %v5455_v29, 2 }
 0x104   : > { %1371 = vmatmul.mubr.f32.gmra.mxu1 %v5433_v32  ;;  %1150 = vmatprep.mubr.f32.mxu0 %v5437_v12  ;;  %v5458_v32 = vld [vmem:[#allocation2 + $0x170] sm:$0xff]  ;;  %v734_v12 = vrot.slane %v489_v2, 2  ;;  %v889_v2 = vld [vmem:[#allocation6 + $0x290] sm:$0xff] }
 0x105   : > { %1375 = vmatprep.mubr.f32.mxu1 %v5426_v19  ;;  %1455 = vmatprep.subr.mxu0 %v5209_v34  ;;  %v624_v61 = vrot.slane %v5458_v32, 1 }
 0x106   : > { %1677 = vmatpush2.msra.mxu1 %v925_v20  ;;  %1151 = vmatmul.mubr.f32.gmra.mxu0 %v5394_v33  ;;  %v5469_v20 = vsel %vm547_vm0, %v619_v41, %v621_v1  ;;  %v623_v33 = vrot.slane %v5455_v29, 1  ;;  %v5479_v41 = vsel %vm660_vm1, %v732_v0, %v734_v12  ;;  %v737_v1 = vrot.slane %v5458_v32, 2  ;;  %v922_v12 = vld [vmem:[#allocation6 + $0x398] sm:$0xff] }
 0x107   : > { %1678 = vmatprep.subr.mxu1 %v5209_v34  ;;  %1456 = vmatpush2.msra.mxu0 %v891_v52  ;;  %v923_v52 = vld [vmem:[#allocation6 + $0x3a0] sm:$0xff] }
 0x108   : > { %1376 = vmatmul.mubr.f32.gmra.mxu1 %v5447_v11  ;;  %1155 = vmatprep.mubr.f32.mxu0 %v5453_v47  ;;  %v492_v11 = vld [vmem:[#allocation2 + $0x178] sm:$0x3]  ;;  %v5495_v0 = vsel %vm660_vm1, %v736_v7, %v737_v1 }
 0x109   : > { %1380 = vmatprep.mubr.f32.mxu1 %v5455_v29  ;;  %1457 = vmatprep.subr.mxu0 %v5209_v34  ;;  %v920_v7 = vld [vmem:[#allocation6 + $0x388] sm:$0xff] }
 0x10a   : > { %1679 = vmatpush2.msra.mxu1 %v924_v56  ;;  %1156 = vmatmul.mubr.f32.gmra.mxu0 %v5423_v14  ;;  %v5485_v56 = vsel %vm547_vm0, %v623_v33, %v624_v61  ;;  %v5487_v14 = vld [vmem:[#allocation2 + $0x180] sm:$0xff]  ;;  %v888_v33 = vld [vmem:[#allocation6 + $0x288] sm:$0xff] }
 0x10b   : > { %1680 = vmatprep.subr.mxu1 %v5209_v34  ;;  %1458 = vmatpush2.msra.mxu0 %v890_v17  ;;  %v626_v17 = vrot.slane %v492_v11, 1 }
 0x10c   : > { %1381 = vmatmul.mubr.f32.gmra.mxu1 %v5465_v38  ;;  %1160 = vmatprep.mubr.f32.mxu0 %v5469_v20  ;;  %v739_v38 = vrot.slane %v492_v11, 2 }
 0x10d   : > { %1385 = vmatprep.mubr.f32.mxu1 %v5458_v32  ;;  %1459 = vmatprep.subr.mxu0 %v5209_v34 }
 0x10e   : > { %1681 = vmatpush2.msra.mxu1 %v923_v52  ;;  %1161 = vmatmul.mubr.f32.gmra.mxu0 %v5426_v19  ;;  %v5499_v52 = vsel %vm547_vm0, %v624_v61, %v626_v17  ;;  %v5501_v19 = vld [vmem:[#allocation2 + $0x188] sm:$0xff]  ;;  %v5509_v11 = vsel %vm660_vm1, %v737_v1, %v739_v38  ;;  %v887_v61 = vld [vmem:[#allocation6 + $0x280] sm:$0xff]  ;;  %v949_v38 = vld [vmem:[#allocation6 + $0x470] sm:$0xff] }
 0x10f   : > { %1682 = vmatprep.subr.mxu1 %v5209_v34  ;;  %1460 = vmatpush2.msra.mxu0 %v889_v2  ;;  %v921_v2 = vld [vmem:[#allocation6 + $0x390] sm:$0xff]  ;;  %v950_v17 = vld [vmem:[#allocation6 + $0x478] sm:$0xff]  ;;  %v948_v1 = vld [vmem:[#allocation6 + $0x468] sm:$0xff] }
 0x110   : > { %1386 = vmatmul.mubr.f32.gmra.mxu1 %v5479_v41  ;;  %1165 = vmatprep.mubr.f32.mxu0 %v5485_v56 }
 0x111   : > { %1390 = vmatprep.mubr.f32.mxu1 %v5487_v14  ;;  %1461 = vmatprep.subr.mxu0 %v5209_v34 }
 0x112   : > { %1683 = vmatpush2.msra.mxu1 %v922_v12  ;;  %1166 = vmatmul.mubr.f32.gmra.mxu0 %v5455_v29  ;;  %v919_v12 = vld [vmem:[#allocation6 + $0x380] sm:$0xff] }
 0x113   : > { %1684 = vmatprep.subr.mxu1 %v5209_v34  ;;  %1462 = vmatpush2.msra.mxu0 %v888_v33  ;;  %v943_v33 = vld [vmem:[#allocation6 + $0x440] sm:$0xff] }
 0x114   : > { %1391 = vmatmul.mubr.f32.gmra.mxu1 %v5495_v0  ;;  %1170 = vmatprep.mubr.f32.mxu0 %v5499_v52 }
 0x115   : > { %1395 = vmatprep.mubr.f32.mxu1 %v5501_v19  ;;  %1463 = vmatprep.subr.mxu0 %v5209_v34 }
 0x116   : > { %1685 = vmatpush2.msra.mxu1 %v921_v2  ;;  %1171 = vmatmul.mubr.f32.gmra.mxu0 %v5458_v32 }
 0x117   : > { %1686 = vmatprep.subr.mxu1 %v5209_v34  ;;  %1464 = vmatpush2.msra.mxu0 %v887_v61 }
 0x118   : > { %1396 = vmatmul.mubr.f32.gmra.mxu1 %v5509_v11  ;;  %1465 = vmatprep.mubr.f32.mxu0 %v5048_v55  ;;  %v4512_v55 = vld [vmem:[#allocation2 + $0x38] sm:$0xff] }
 0x119   : > { %1687 = vmatpush2.msra.mxu1 %v920_v7  ;;  %4279 = vmatprep.subr.mxu0 %v950_v17  ;;  %v7297_v7 = vld [vmem:[#allocation18_spill] sm:$0xff] }
 0x11a   : > { %1688 = vmatprep.subr.mxu1 %v5209_v34  ;;  %1466 = vmatmul.mubr.f32.vlgmr.msra.gmra.mxu0 %v5036_v49  ;;  %v947_v49 = vld [vmem:[#allocation6 + $0x460] sm:$0xff] }
 0x11b   : > { %1689 = vmatpush2.msra.mxu1 %v919_v12  ;;  %1690 = vmatprep.mubr.f32.mxu1 %v5067_v5  ;;  %v7298_v12 = vld [vmem:[#allocation28_spill] sm:$0xff] }
 0x11c   : > { %4280 = vmatpush3.msra.mxu0 %v950_v17  ;;  %1691 = vmatmul.mubr.f32.vlgmr.msra.gmra.mxu1 %v5038_v50  ;;  %v946_v50 = vld [vmem:[#allocation6 + $0x458] sm:$0xff] }
 0x11d   : > { %1470 = vmatprep.mubr.f32.mxu0 %v5061_v63  ;;  %1695 = vmatprep.mubr.f32.mxu1 %v5083_v13  ;;  %v944_v63 = vld [vmem:[#allocation6 + $0x448] sm:$0xff] }
 0x11e   : > { %4281 = vmatprep.subr.mxu0 %v949_v38  ;;  %1471 = vmatmul.mubr.f32.gmra.mxu0 %v5052_v58  ;;  %v945_v58 = vld [vmem:[#allocation6 + $0x450] sm:$0xff] }
 0x11f   : > { %2754 = vmatprep.subr.mxu1 %v5209_v34  ;;  %1475 = vmatprep.mubr.f32.mxu0 %v5079_v10 }
 0x120   : > { %4282 = vmatpush3.msra.mxu0 %v949_v38  ;;  %1696 = vmatmul.mubr.f32.gmra.mxu1 %v4512_v55 }
 0x121   : > { %4283 = vmatprep.subr.mxu0 %v948_v1  ;;  %1700 = vmatprep.mubr.f32.mxu1 %v5099_v22 }
 0x122   : > { %4284 = vmatpush3.msra.mxu0 %v948_v1 }
 0x123   : > { %1476 = vmatmul.mubr.f32.gmra.mxu0 %v5067_v5  ;;  %4285 = vmatprep.subr.mxu0 %v947_v49  ;;  %v942_v5 = vld [vmem:[#allocation6 + $0x438] sm:$0xff] }
 0x124   : > { %1480 = vmatprep.mubr.f32.mxu0 %v5093_v18  ;;  %4286 = vmatpush3.msra.mxu0 %v947_v49  ;;  %v7299_v49 = vld [vmem:[#allocation27_spill] sm:$0xff] }
 0x125   : > { %1701 = vmatmul.mubr.f32.gmra.mxu1 %v5069_v6  ;;  %4287 = vmatprep.subr.mxu0 %v946_v50  ;;  %v941_v6 = vld [vmem:[#allocation6 + $0x430] sm:$0xff] }
 0x126   : > { %1705 = vmatprep.mubr.f32.mxu1 %v5115_v30  ;;  %4288 = vmatpush3.msra.mxu0 %v946_v50 }
 0x127   : > { %1481 = vmatmul.mubr.f32.gmra.mxu0 %v5083_v13  ;;  %4289 = vmatprep.subr.mxu0 %v945_v58  ;;  %v940_v13 = vld [vmem:[#allocation6 + $0x428] sm:$0xff] }
 0x128   : > { %1485 = vmatprep.mubr.f32.mxu0 %v5111_v27  ;;  %4290 = vmatpush3.msra.mxu0 %v945_v58  ;;  %v7300_v58 = vld [vmem:[#allocation23_spill] sm:$0xff] }
 0x129   : > { %1706 = vmatmul.mubr.f32.gmra.mxu1 %v5072_v8  ;;  %4291 = vmatprep.subr.mxu0 %v944_v63  ;;  %v939_v8 = vld [vmem:[#allocation6 + $0x420] sm:$0xff] }
 0x12a   : > { %1710 = vmatprep.mubr.f32.mxu1 %v5131_v39  ;;  %4292 = vmatpush3.msra.mxu0 %v944_v63 }
 0x12b   : > { %1486 = vmatmul.mubr.f32.gmra.mxu0 %v5099_v22  ;;  %4293 = vmatprep.subr.mxu0 %v943_v33  ;;  %v938_v22 = vld [vmem:[#allocation6 + $0x418] sm:$0xff] }
 0x12c   : > { %1490 = vmatprep.mubr.f32.mxu0 %v5125_v35  ;;  %4294 = vmatpush3.msra.mxu0 %v943_v33  ;;  %v7301_v33 = vld [vmem:[#allocation32_spill] sm:$0xff] }
 0x12d   : > { %1711 = vmatmul.mubr.f32.gmra.mxu1 %v5101_v23  ;;  %4295 = vmatprep.subr.mxu0 %v942_v5  ;;  %v937_v23 = vld [vmem:[#allocation6 + $0x410] sm:$0xff] }
 0x12e   : > { %1715 = vmatprep.mubr.f32.mxu1 %v5147_v46  ;;  %4296 = vmatpush3.msra.mxu0 %v942_v5 }
 0x12f   : > { %1491 = vmatmul.mubr.f32.gmra.mxu0 %v5115_v30  ;;  %4297 = vmatprep.subr.mxu0 %v941_v6  ;;  %v936_v30 = vld [vmem:[#allocation6 + $0x408] sm:$0xff] }
 0x130   : > { %1495 = vmatprep.mubr.f32.mxu0 %v5143_v44  ;;  %4298 = vmatpush3.msra.mxu0 %v941_v6 }
 0x131   : > { %1716 = vmatmul.mubr.f32.gmra.mxu1 %v5104_v25  ;;  %4299 = vmatprep.subr.mxu0 %v940_v13  ;;  %v935_v25 = vld [vmem:[#allocation6 + $0x400] sm:$0xff] }
 0x132   : > { %1720 = vmatprep.mubr.f32.mxu1 %v5163_v59  ;;  %4300 = vmatpush3.msra.mxu0 %v940_v13  ;;  %v7302_v13 = vld [vmem:[#allocation31_spill] sm:$0xff] }
 0x133   : > { %1496 = vmatmul.mubr.f32.gmra.mxu0 %v5131_v39  ;;  %4301 = vmatprep.subr.mxu0 %v939_v8  ;;  %v7286_v39 = vld [vmem:[#allocation16_spill] sm:$0xff] }
 0x134   : > { %1500 = vmatprep.mubr.f32.mxu0 %v5157_v53  ;;  %4302 = vmatpush3.msra.mxu0 %v939_v8 }
 0x135   : > { %1721 = vmatmul.mubr.f32.gmra.mxu1 %v5133_v40  ;;  %4303 = vmatprep.subr.mxu0 %v938_v22  ;;  %v7287_v40 = vld [vmem:[#allocation15_spill] sm:$0xff] }
 0x136   : > { %1725 = vmatprep.mubr.f32.mxu1 %v5179_v9  ;;  %4304 = vmatpush3.msra.mxu0 %v938_v22 }
 0x137   : > { %1501 = vmatmul.mubr.f32.gmra.mxu0 %v5147_v46  ;;  %4305 = vmatprep.subr.mxu0 %v937_v23  ;;  %v7289_v46 = vld [vmem:[#allocation20_spill] sm:$0xff] }
 0x138   : > { %1505 = vmatprep.mubr.f32.mxu0 %v5175_v3  ;;  %4306 = vmatpush3.msra.mxu0 %v937_v23  ;;  %v7303_v23 = vld [vmem:[#allocation24_spill] sm:$0xff] }
 0x139   : > { %1726 = vmatmul.mubr.f32.gmra.mxu1 %v5136_v42  ;;  %4307 = vmatprep.subr.mxu0 %v936_v30  ;;  %v7288_v42 = vld [vmem:[#allocation13_spill] sm:$0xff] }
 0x13a   : > { %1730 = vmatprep.mubr.f32.mxu1 %v5195_v21  ;;  %4308 = vmatpush3.msra.mxu0 %v936_v30 }
 0x13b   : > { %1506 = vmatmul.mubr.f32.gmra.mxu0 %v5163_v59  ;;  %4309 = vmatprep.subr.mxu0 %v935_v25  ;;  %v7290_v59 = vld [vmem:[#allocation19_spill] sm:$0xff] }
 0x13c   : > { %1510 = vmatprep.mubr.f32.mxu0 %v5189_v16  ;;  %4310 = vmatpush3.msra.mxu0 %v935_v25  ;;  %v7304_v25 = vld [vmem:[#allocation34_spill] sm:$0xff] }
 0x13d   : > { %1731 = vmatmul.mubr.f32.gmra.mxu1 %v5165_v60  ;;  %2979 = vmatprep.subr.mxu0 %v5209_v34  ;;  %v7291_v60 = vld [vmem:[#allocation14_spill] sm:$0xff] }
 0x13e   : > { %1735 = vmatprep.mubr.f32.mxu1 %v5213_v36 }
 0x13f   : > { %1511 = vmatmul.mubr.f32.gmra.mxu0 %v5179_v9 }
 0x140   : > { %1515 = vmatprep.mubr.f32.mxu0 %v5207_v31 }
 0x141   : > { %1736 = vmatmul.mubr.f32.gmra.mxu1 %v5168_v62  ;;  %v7292_v62 = vld [vmem:[#allocation22_spill] sm:$0xff] }
 0x142   : > { %1740 = vmatprep.mubr.f32.mxu1 %v5229_v48 }
 0x143   : > { %1516 = vmatmul.mubr.f32.gmra.mxu0 %v5195_v21 }
 0x144   : > { %1520 = vmatprep.mubr.f32.mxu0 %v5223_v43 }
 0x145   : > { %1741 = vmatmul.mubr.f32.gmra.mxu1 %v5197_v24  ;;  %v7293_v24 = vld [vmem:[#allocation21_spill] sm:$0xff] }
 0x146   : > { %1745 = vmatprep.mubr.f32.mxu1 %v5245_v4 }
 0x147   : > { %1521 = vmatmul.mubr.f32.gmra.mxu0 %v5213_v36 }
 0x148   : > { %1525 = vmatprep.mubr.f32.mxu0 %v5241_v57 }
 0x149   : > { %1746 = vmatmul.mubr.f32.gmra.mxu1 %v5200_v28 }
 0x14a   : > { %1750 = vmatprep.mubr.f32.mxu1 %v5261_v26 }
 0x14b   : > { %1526 = vmatmul.mubr.f32.gmra.mxu0 %v5229_v48  ;;  %v7294_v48 = vld [vmem:[#allocation17_spill] sm:$0xff] }
 0x14c   : > { %1530 = vmatprep.mubr.f32.mxu0 %v5255_v15 }
 0x14d   : > { %1751 = vmatmul.mubr.f32.gmra.mxu1 %v5231_v51 }
 0x14e   : > { %1755 = vmatprep.mubr.f32.mxu1 %v5277_v45 }
 0x14f   : > { %1531 = vmatmul.mubr.f32.gmra.mxu0 %v5245_v4 }
 0x150   : > { %1535 = vmatprep.mubr.f32.mxu0 %v5273_v37 }
 0x151   : > { %1756 = vmatmul.mubr.f32.gmra.mxu1 %v5234_v54  ;;  %v7295_v54 = vld [vmem:[#allocation26_spill] sm:$0xff] }
 0x152   : > { %1760 = vmatprep.mubr.f32.mxu1 %v7286_v39 }
 0x153   : > { %1536 = vmatmul.mubr.f32.gmra.mxu0 %v5261_v26 }
 0x154   : > { %1540 = vmatprep.mubr.f32.mxu0 %v7287_v40 }
 0x155   : > { %1761 = vmatmul.mubr.f32.gmra.mxu1 %v7288_v42 }
 0x156   : > { %1765 = vmatprep.mubr.f32.mxu1 %v7289_v46 }
 0x157   : > { %1541 = vmatmul.mubr.f32.gmra.mxu0 %v5277_v45  ;;  %v7296_v45 = vld [vmem:[#allocation25_spill] sm:$0xff] }
 0x158   : > { %1545 = vmatprep.mubr.f32.mxu0 %v7290_v59 }
 0x159   : > { %1766 = vmatmul.mubr.f32.gmra.mxu1 %v7291_v60  ;;  %v2625_v60 = vld [vmem:[#allocation8 + $0x78] sm:$0xff] }
 0x15a   : > { %1770 = vmatprep.mubr.f32.mxu1 %v7292_v62  ;;  %v1017_v9 = vpop.f32.mrf.mxu0  ;;  %2755 = vmatpush1.msra.mxu1 %v2625_v60 }
 0x15b   : > { %1546 = vmatmul.mubr.f32.gmra.mxu0 %v7286_v39  ;;  %2756 = vmatprep.subr.mxu1 %v5209_v34 }
 0x15c   : > { %v1242_v21 = vpop.f32.mrf.mxu1  ;;  %1550 = vmatprep.mubr.f32.mxu0 %v7293_v24  ;;  %v1019_v36 = vpop.f32.mrf.mxu0 }
 0x15d   : > { %v5585_v28 = vadd.f32 %v1242_v21, %v1017_v9  ;;  %1771 = vmatmul.mubr.f32.gmra.mxu1 %v7294_v48  ;;  %v7306_v21 = vld [vmem:[#allocation29_spill] sm:$0xff]  ;;  %v7307_v48 = vld [vmem:[#allocation38_spill] sm:$0xff] }
 0x15e   : > { %v1244_v51 = vpop.f32.mrf.mxu1  ;;  %1775 = vmatprep.mubr.f32.mxu1 %v7295_v54  ;;  %v1022_v4 = vpop.f32.mrf.mxu0 }
 0x15f   : > { %1551 = vmatmul.mubr.f32.gmra.mxu0 %v7289_v46  ;;  %v7305_v46 = vld [vmem:[#allocation33_spill] sm:$0xff] }
 0x160   : > { %v1247_v26 = vpop.f32.mrf.mxu1  ;;  %1555 = vmatprep.mubr.f32.mxu0 %v7296_v45  ;;  %v1024_v61 = vpop.f32.mrf.mxu0 }
 0x161   : > { %v5591_v2 = vadd.f32 %v1247_v26, %v1022_v4  ;;  %1776 = vmatmul.mubr.f32.gmra.mxu1 %v7297_v7  ;;  %v7308_v4 = vld [vmem:[#allocation37_spill] sm:$0xff]  ;;  %v2624_v26 = vld [vmem:[#allocation8 + $0x70] sm:$0xff] }
 0x162   : > { %v1249_v17 = vpop.f32.mrf.mxu1  ;;  %1780 = vmatprep.mubr.f32.mxu1 %v7298_v12  ;;  %v1027_v38 = vpop.f32.mrf.mxu0  ;;  %2757 = vmatpush1.msra.mxu1 %v2624_v26  ;;  %v2621_v26 = vld [vmem:[#allocation8 + $0x58] sm:$0xff] }
 0x163   : > { %1556 = vmatmul.mubr.f32.gmra.mxu0 %v7292_v62  ;;  %v7309_v17 = vld [vmem:[#allocation30_spill] sm:$0xff]  ;;  %2758 = vmatprep.subr.mxu1 %v5209_v34 }
 0x164   : > { %v1252_v1 = vpop.f32.mrf.mxu1  ;;  %1560 = vmatprep.mubr.f32.mxu0 %v7299_v49  ;;  %v1029_v50 = vpop.f32.mrf.mxu0 }
 0x165   : > { %v5597_v55 = vadd.f32 %v1252_v1, %v1027_v38  ;;  %1781 = vmatmul.mubr.f32.gmra.mxu1 %v7300_v58  ;;  %v7310_v38 = vld [vmem:[#allocation40_spill] sm:$0xff]  ;;  %v7311_v58 = vld [vmem:[#allocation39_spill] sm:$0xff] }
 0x166   : > { %v1254_v63 = vpop.f32.mrf.mxu1  ;;  %1785 = vmatprep.mubr.f32.mxu1 %v7301_v33  ;;  %v1032_v5 = vpop.f32.mrf.mxu0 }
 0x167   : > { %1561 = vmatmul.mubr.f32.gmra.mxu0 %v7295_v54  ;;  %v2623_v63 = vld [vmem:[#allocation8 + $0x68] sm:$0xff] }
 0x168   : > { %v1257_v6 = vpop.f32.mrf.mxu1  ;;  %1565 = vmatprep.mubr.f32.mxu0 %v7302_v13  ;;  %v1034_v22 = vpop.f32.mrf.mxu0  ;;  %2759 = vmatpush1.msra.mxu1 %v2623_v63  ;;  %v7318_v63 = vld [vmem:[#allocation46_spill] sm:$0xff] }
 0x169   : > { %v5603_v8 = vadd.f32 %v1257_v6, %v1032_v5  ;;  %1786 = vmatmul.mubr.f32.gmra.mxu1 %v7303_v23  ;;  %v7312_v6 = vld [vmem:[#allocation35_spill] sm:$0xff]  ;;  %v7313_v23 = vld [vmem:[#allocation44_spill] sm:$0xff]  ;;  %2760 = vmatprep.subr.mxu1 %v5209_v34 }
 0x16a   : > { %v1259_v30 = vpop.f32.mrf.mxu1  ;;  %1790 = vmatprep.mubr.f32.mxu1 %v7304_v25  ;;  %v1037_v39 = vpop.f32.mrf.mxu0 }
 0x16b   : > { %1566 = vmatmul.mubr.f32.gmra.mxu0 %v7298_v12 }
 0x16c   : > { %v1262_v42 = vpop.f32.mrf.mxu1  ;;  %1570 = vmatprep.mubr.f32.mxu0 %v7305_v46  ;;  %v1039_v9 = vpop.f32.mrf.mxu0 }
 0x16d   : > { %v5609_v62 = vadd.f32 %v1262_v42, %v1037_v39  ;;  %1791 = vmatmul.mubr.f32.gmra.mxu1 %v7306_v21  ;;  %v7314_v39 = vld [vmem:[#allocation43_spill] sm:$0xff]  ;;  %v2622_v42 = vld [vmem:[#allocation8 + $0x60] sm:$0xff]  ;;  %v7315_v21 = vld [vmem:[#allocation36_spill] sm:$0xff] }
 0x16e   : > { %v1264_v36 = vpop.f32.mrf.mxu1  ;;  %1795 = vmatprep.mubr.f32.mxu1 %v7307_v48  ;;  %v1042_v51 = vpop.f32.mrf.mxu0  ;;  %2761 = vmatpush1.msra.mxu1 %v2622_v42 }
 0x16f   : > { %1571 = vmatmul.mubr.f32.gmra.mxu0 %v7301_v33 }
 0x170   : > { %v1267_v54 = vpop.f32.mrf.mxu1  ;;  %1575 = vmatprep.mubr.f32.mxu0 %v7308_v4  ;;  %v1044_v7 = vpop.f32.mrf.mxu0 }
 0x171   : > { %v5616_v61 = vadd.f32 %v1267_v54, %v1042_v51  ;;  %1796 = vmatmul.mubr.f32.gmra.mxu1 %v7309_v17  ;;  %v5635_v54 = vld [vmem:[#allocation2] sm:$0xff] }
 0x172   : > { %v1269_v12 = vpop.f32.mrf.mxu1  ;;  %1800 = vmatprep.mubr.f32.mxu1 %v7310_v38  ;;  %v1047_v1 = vpop.f32.mrf.mxu0  ;;  %2762 = vmatprep.subr.mxu1 %v5635_v54 }
 0x173   : > { %1576 = vmatmul.mubr.f32.gmra.mxu0 %v7304_v25  ;;  %v7317_v12 = vld [vmem:[#allocation41_spill] sm:$0xff]  ;;  %2763 = vmatpush1.msra.mxu1 %v2621_v26 }
 0x174   : > { %v1272_v50 = vpop.f32.mrf.mxu1  ;;  %1580 = vmatprep.mubr.f32.mxu0 %v7311_v58  ;;  %v1049_v5 = vpop.f32.mrf.mxu0  ;;  %2764 = vmatprep.subr.mxu1 %v5635_v54 }
 0x175   : > { %v5623_v33 = vadd.f32 %v1272_v50, %v1047_v1  ;;  %1801 = vmatmul.mubr.f32.gmra.mxu1 %v7312_v6  ;;  %v2620_v5 = vld [vmem:[#allocation8 + $0x50] sm:$0xff] }
 0x176   : > { %v1274_v22 = vpop.f32.mrf.mxu1  ;;  %1805 = vmatprep.mubr.f32.mxu1 %v7313_v23  ;;  %v1052_v30 = vpop.f32.mrf.mxu0  ;;  %2765 = vmatpush1.msra.mxu1 %v2620_v5 }
 0x177   : > { %1581 = vmatmul.mubr.f32.gmra.mxu0 %v7307_v48  ;;  %v7316_v48 = vld [vmem:[#allocation45_spill] sm:$0xff]  ;;  %2766 = vmatprep.subr.mxu1 %v5635_v54 }
 0x178   : > { %v1277_v25 = vpop.f32.mrf.mxu1  ;;  %1585 = vmatprep.mubr.f32.mxu0 %v7314_v39  ;;  %v1054_v9 = vpop.f32.mrf.mxu0 }
 0x179   : > { %v5630_v60 = vadd.f32 %v1277_v25, %v1052_v30  ;;  %1806 = vmatmul.mubr.f32.gmra.mxu1 %v7315_v21  ;;  %v7319_v30 = vld [vmem:[#allocation42_spill] sm:$0xff]  ;;  %v777_v9 = vrot.slane %v5501_v19, 1 }
 0x17a   : > { %v1279_v36 = vpop.f32.mrf.mxu1  ;;  %1810 = vmatprep.mubr.f32.mxu1 %v5453_v47  ;;  %v1057_v51 = vpop.f32.mrf.mxu0 }
 0x17b   : > { %1586 = vmatmul.mubr.f32.gmra.mxu0 %v7310_v38  ;;  %v495_v36 = vld [vmem:[#allocation2 + $0x190] sm:$0x3] }
 0x17c   : > { %v1282_v34 = vpop.f32.mrf.mxu1  ;;  %1590 = vmatprep.mubr.f32.mxu0 %v7316_v48  ;;  %v1059_v17 = vpop.f32.mrf.mxu0 }
 0x17d   : > { %v5639_v7 = vadd.f32 %v1282_v34, %v1057_v51  ;;  %1811 = vmatmul.mubr.f32.gmra.mxu1 %v7317_v12  ;;  %v2619_v51 = vld [vmem:[#allocation8 + $0x48] sm:$0xff] }
 0x17e   : > { %v1284_v1 = vpop.f32.mrf.mxu1  ;;  %1815 = vmatprep.mubr.f32.mxu1 %v5469_v20  ;;  %v1062_v50 = vpop.f32.mrf.mxu0  ;;  %2767 = vmatpush1.msra.mxu1 %v2619_v51  ;;  %v2617_v51 = vld [vmem:[#allocation8 + $0x38] sm:$0xff] }
 0x17f   : > { %1591 = vmatmul.mubr.f32.gmra.mxu0 %v7313_v23  ;;  %v776_v23 = vrot.slane %v5487_v14, 1  ;;  %v779_v1 = vrot.slane %v495_v36, 1  ;;  %2768 = vmatprep.subr.mxu1 %v5635_v54 }
 0x180   : > { %v1287_v38 = vpop.f32.mrf.mxu1  ;;  %1595 = vmatprep.mubr.f32.mxu0 %v7318_v63  ;;  %v1064_v22 = vpop.f32.mrf.mxu0 }
 0x181   : > { %v5646_v6 = vadd.f32 %v1287_v38, %v1062_v50  ;;  %1816 = vmatmul.mubr.f32.gmra.mxu1 %v7319_v30  ;;  %v778_v12 = vsel %vm547_vm0, %v776_v23, %v777_v9  ;;  %v2618_v38 = vld [vmem:[#allocation8 + $0x40] sm:$0xff]  ;;  %v784_v30 = vrot.slane %v5501_v19, 2  ;;  %v5671_v23 = vrot.slane %v5635_v54, 1 }
 0x182   : > { %v1289_v25 = vpop.f32.mrf.mxu1  ;;  %1820 = vmatprep.mubr.f32.mxu1 %v5485_v56  ;;  %v1067_v42 = vpop.f32.mrf.mxu0  ;;  %2769 = vmatpush1.msra.mxu1 %v2618_v38 }
 0x183   : > { %1596 = vmatmul.mubr.f32.gmra.mxu0 %v5453_v47  ;;  %2770 = vmatprep.subr.mxu1 %v5635_v54 }
 0x184   : > { %v1292_v21 = vpop.f32.mrf.mxu1  ;;  %1600 = vmatprep.mubr.f32.mxu0 %v5479_v41  ;;  %v1069_v26 = vpop.f32.mrf.mxu0  ;;  %2771 = vmatpush1.msra.mxu1 %v2617_v51  ;;  %v2615_v51 = vld [vmem:[#allocation8 + $0x28] sm:$0xff] }
 0x185   : > { %v5655_v34 = vadd.f32 %v1292_v21, %v1067_v42  ;;  %1821 = vmatmul.mubr.f32.gmra.mxu1 %v5455_v29  ;;  %v783_v29 = vrot.slane %v5487_v14, 2  ;;  %v780_v42 = vsel %vm547_vm0, %v777_v9, %v779_v1  ;;  %v786_v9 = vrot.slane %v495_v36, 2  ;;  %2772 = vmatprep.subr.mxu1 %v5635_v54 }
 0x186   : > { %v1294_v17 = vpop.f32.mrf.mxu1  ;;  %1825 = vmatprep.mubr.f32.mxu1 %v5499_v52  ;;  %v1072_v47 = vpop.f32.mrf.mxu0 }
 0x187   : > { %1601 = vmatmul.mubr.f32.gmra.mxu0 %v5469_v20  ;;  %v5691_v36 = vsel %vm660_vm1, %v784_v30, %v786_v9 }
 0x188   : > { %v1297_v50 = vpop.f32.mrf.mxu1  ;;  %1605 = vmatprep.mubr.f32.mxu0 %v5495_v0  ;;  %v1074_v22 = vpop.f32.mrf.mxu0 }
 0x189   : > { %v5663_v5 = vadd.f32 %v1297_v50, %v1072_v47  ;;  %1826 = vmatmul.mubr.f32.gmra.mxu1 %v5458_v32  ;;  %v5675_v32 = vld [vmem:[#allocation2 + $0x1a8] sm:$0x3]  ;;  %v2616_v22 = vld [vmem:[#allocation8 + $0x30] sm:$0xff] }
 0x18a   : > { %v1299_v25 = vpop.f32.mrf.mxu1  ;;  %1830 = vmatprep.mubr.f32.mxu1 %v778_v12  ;;  %v1077_v20 = vpop.f32.mrf.mxu0  ;;  %v796_v50 = vrot.slane %v5675_v32, 1  ;;  %2773 = vmatpush1.msra.mxu1 %v2616_v22 }
 0x18b   : > { %1606 = vmatmul.mubr.f32.gmra.mxu0 %v5485_v56  ;;  %v5681_v56 = vsel %vm660_vm1, %v783_v29, %v784_v30  ;;  %2774 = vmatprep.subr.mxu1 %v5635_v54 }
 0x18c   : > { %v1302_v21 = vpop.f32.mrf.mxu1  ;;  %1610 = vmatprep.mubr.f32.mxu0 %v5509_v11  ;;  %v1079_v17 = vpop.f32.mrf.mxu0  ;;  %2775 = vmatpush1.msra.mxu1 %v2615_v51 }
 0x18d   : > { %v5677_v26 = vadd.f32 %v1302_v21, %v1077_v20  ;;  %1831 = vmatmul.mubr.f32.gmra.mxu1 %v5487_v14  ;;  %v797_v20 = vsel %vm547_vm0, %v5671_v23, %v796_v50  ;;  %2776 = vmatprep.subr.mxu1 %v5635_v54 }
 0x18e   : > { %v1304_v47 = vpop.f32.mrf.mxu1  ;;  %1835 = vmatprep.mubr.f32.mxu1 %v780_v42  ;;  %v1082_v1 = vpop.f32.mrf.mxu0 }
 0x18f   : > { %1611 = vmatmul.mubr.f32.gmra.mxu0 %v5499_v52  ;;  %v2614_v47 = vld [vmem:[#allocation8 + $0x20] sm:$0xff] }
 0x190   : > { %v1307_v38 = vpop.f32.mrf.mxu1  ;;  %1615 = vmatprep.mubr.f32.mxu0 %v5681_v56  ;;  %v1084_v14 = vpop.f32.mrf.mxu0  ;;  %2777 = vmatpush1.msra.mxu1 %v2614_v47 }
 0x191   : > { %v5687_v25 = vadd.f32 %v1307_v38, %v1082_v1  ;;  %1836 = vmatmul.mubr.f32.gmra.mxu1 %v5501_v19  ;;  %2778 = vmatprep.subr.mxu1 %v5635_v54 }
 0x192   : > { %v1309_v29 = vpop.f32.mrf.mxu1  ;;  %1840 = vmatprep.mubr.f32.mxu1 %v5671_v23  ;;  %v1087_v52 = vpop.f32.mrf.mxu0 }
 0x193   : > { %1616 = vmatmul.mubr.f32.gmra.mxu0 %v778_v12 }
 0x194   : > { %v1312_v21 = vpop.f32.mrf.mxu1  ;;  %1620 = vmatprep.mubr.f32.mxu0 %v5691_v36  ;;  %v1089_v19 = vpop.f32.mrf.mxu0 }
 0x195   : > { %v5698_v17 = vadd.f32 %v1312_v21, %v1087_v52  ;;  %1841 = vmatmul.mubr.f32.gmra.mxu1 %v5635_v54 }
 0x196   : > { %v1314_v30 = vpop.f32.mrf.mxu1  ;;  %1845 = vmatprep.mubr.f32.mxu1 %v797_v20  ;;  %v1092_v9 = vpop.f32.mrf.mxu0 }
 0x197   : > { %1621 = vmatmul.mubr.f32.gmra.mxu0 %v780_v42  ;;  %v2613_v42 = vld [vmem:[#allocation8 + $0x18] sm:$0xff] }
 0x198   : > { %v1317_v12 = vpop.f32.mrf.mxu1  ;;  %4311 = vmatprep.mubr.f32.mxu0 %v5079_v10  ;;  %v1094_v50 = vpop.f32.mrf.mxu0  ;;  %2779 = vmatpush1.msra.mxu1 %v2613_v42 }
 0x199   : > { %v5703_v1 = vadd.f32 %v1317_v12, %v1092_v9  ;;  %1846 = vmatmul.mubr.f32.gmra.mxu1 %v5635_v54  ;;  %2780 = vmatprep.subr.mxu1 %v5635_v54  ;;  %v2611_v12 = vld [vmem:[#allocation8 + $0x8] sm:$0xff] }
 0x19a   : > { %v1319_v38 = vpop.f32.mrf.mxu1  ;;  %v1097_v22 = vpop.f32.mrf.mxu0  ;;  %2818 = vmatprep.mubr.f32.mxu1 %v5671_v23 }
 0x19b   : > { %4312 = vmatmul.mubr.f32.vlgmr.msra.gmra.mxu0 %v5093_v18  ;;  %v2612_v18 = vld [vmem:[#allocation8 + $0x10] sm:$0xff] }
 0x19c   : > { %v1322_v14 = vpop.f32.mrf.mxu1  ;;  %4314 = vmatprep.mubr.f32.mxu0 %v5111_v27  ;;  %v1099_v10 = vpop.f32.mrf.mxu0  ;;  %2781 = vmatpush1.msra.mxu1 %v2612_v18 }
 0x19d   : > { %v5709_v29 = vadd.f32 %v1322_v14, %v1097_v22  ;;  %2782 = vmatprep.subr.mxu1 %v5635_v54  ;;  %v2610_v22 = vld [vmem:[#allocation8] sm:$0xff] }
 0x19e   : > { %v1324_v52 = vpop.f32.mrf.mxu1  ;;  %v1102_v20 = vpop.f32.mrf.mxu0  ;;  %2783 = vmatpush1.msra.mxu1 %v2611_v12 }
 0x19f   : > { %4315 = vmatmul.mubr.f32.gmra.mxu0 %v5125_v35  ;;  %2784 = vmatprep.subr.mxu1 %v5635_v54  ;;  %v2641_v52 = vld [vmem:[#allocation8 + $0xf8] sm:$0xff] }
 0x1a0   : > { %v1327_v21 = vpop.f32.mrf.mxu1  ;;  %4317 = vmatprep.mubr.f32.mxu0 %v5143_v44  ;;  %v1104_v19 = vpop.f32.mrf.mxu0  ;;  %2785 = vmatpush1.msra.mxu1 %v2610_v22  ;;  %v2654_v22 = vld [vmem:[#allocation8 + $0x160] sm:$0xff] }
 0x1a1   : > { %v5714_v51 = vadd.f32 %v1327_v21, %v1102_v20  ;;  %2786 = vmatprep.subr.mxu1 %v5635_v54  ;;  %v2640_v19 = vld [vmem:[#allocation8 + $0xf0] sm:$0xff] }
 0x1a2   : > { %v1329_v27 = vpop.f32.mrf.mxu1  ;;  %v1107_v30 = vpop.f32.mrf.mxu0  ;;  %2787 = vmatpush2.msra.mxu1 %v2641_v52 }
 0x1a3   : > { %4318 = vmatmul.mubr.f32.gmra.mxu0 %v5157_v53  ;;  %2788 = vmatprep.subr.mxu1 %v5635_v54  ;;  %v2657_v27 = vld [vmem:[#allocation8 + $0x178] sm:$0xff] }
 0x1a4   : > { %v1332_v9 = vpop.f32.mrf.mxu1  ;;  %4320 = vmatprep.mubr.f32.mxu0 %v5175_v3  ;;  %v1109_v35 = vpop.f32.mrf.mxu0  ;;  %2789 = vmatpush2.msra.mxu1 %v2640_v19 }
 0x1a5   : > { %v5719_v47 = vadd.f32 %v1332_v9, %v1107_v30  ;;  %2980 = vmatpush1.msra.mxu0 %v2657_v27  ;;  %2790 = vmatprep.subr.mxu1 %v5635_v54  ;;  %v2656_v9 = vld [vmem:[#allocation8 + $0x170] sm:$0xff]  ;;  %v2655_v35 = vld [vmem:[#allocation8 + $0x168] sm:$0xff] }
 0x1a6   : > { %v1334_v44 = vpop.f32.mrf.mxu1  ;;  %v1112_v50 = vpop.f32.mrf.mxu0  ;;  %2981 = vmatprep.subr.mxu0 %v5635_v54 }
 0x1a7   : > { %4321 = vmatmul.mubr.f32.gmra.mxu0 %v5189_v16 }
 0x1a8   : > { %v1337_v38 = vpop.f32.mrf.mxu1  ;;  %4323 = vmatprep.mubr.f32.mxu0 %v5207_v31  ;;  %v1114_v53 = vpop.f32.mrf.mxu0  ;;  %2982 = vmatpush1.msra.mxu0 %v2656_v9  ;;  %v2649_v9 = vld [vmem:[#allocation8 + $0x138] sm:$0xff] }
 0x1a9   : > { %v5724_v14 = vadd.f32 %v1337_v38, %v1112_v50  ;;  %2983 = vmatprep.subr.mxu0 %v5635_v54 }
 0x1aa   : > { %v1339_v3 = vpop.f32.mrf.mxu1  ;;  %v1117_v42 = vpop.f32.mrf.mxu0  ;;  %2984 = vmatpush1.msra.mxu0 %v2655_v35  ;;  %v2648_v35 = vld [vmem:[#allocation8 + $0x130] sm:$0xff] }
 0x1ab   : > { %4324 = vmatmul.mubr.f32.gmra.mxu0 %v5223_v43  ;;  %2985 = vmatprep.subr.mxu0 %v5635_v54  ;;  %v2653_v3 = vld [vmem:[#allocation8 + $0x158] sm:$0xff] }
 0x1ac   : > { %v1342_v10 = vpop.f32.mrf.mxu1  ;;  %4326 = vmatprep.mubr.f32.mxu0 %v5241_v57  ;;  %v1119_v16 = vpop.f32.mrf.mxu0  ;;  %2986 = vmatpush1.msra.mxu0 %v2654_v22 }
 0x1ad   : > { %v5729_v20 = vadd.f32 %v1342_v10, %v1117_v42  ;;  %2987 = vmatprep.subr.mxu0 %v5635_v54  ;;  %v2652_v16 = vld [vmem:[#allocation8 + $0x150] sm:$0xff] }
 0x1ae   : > { %v1344_v31 = vpop.f32.mrf.mxu1  ;;  %v1122_v21 = vpop.f32.mrf.mxu0  ;;  %2988 = vmatpush1.msra.mxu0 %v2653_v3  ;;  %v2634_v3 = vld [vmem:[#allocation8 + $0xc0] sm:$0xff] }
 0x1af   : > { %4327 = vmatmul.mubr.f32.gmra.mxu0 %v5255_v15  ;;  %2989 = vmatprep.subr.mxu0 %v5635_v54  ;;  %v2637_v31 = vld [vmem:[#allocation8 + $0xd8] sm:$0xff] }
 0x1b0   : > { %v1347_v18 = vpop.f32.mrf.mxu1  ;;  %4329 = vmatprep.mubr.f32.mxu0 %v5273_v37  ;;  %v1124_v30 = vpop.f32.mrf.mxu0  ;;  %v2639_v37 = vld [vmem:[#allocation8 + $0xe8] sm:$0xff]  ;;  %2990 = vmatpush1.msra.mxu0 %v2652_v16 }
 0x1b1   : > { %v5734_v43 = vadd.f32 %v1347_v18, %v1122_v21  ;;  %2791 = vmatpush2.msra.mxu1 %v2639_v37  ;;  %v2651_v21 = vld [vmem:[#allocation8 + $0x148] sm:$0xff]  ;;  %2991 = vmatprep.subr.mxu0 %v5635_v54  ;;  %v2650_v30 = vld [vmem:[#allocation8 + $0x140] sm:$0xff] }
 0x1b2   : > { %v1349_v57 = vpop.f32.mrf.mxu1  ;;  %v1127_v12 = vpop.f32.mrf.mxu0  ;;  %2792 = vmatprep.subr.mxu1 %v5635_v54  ;;  %2992 = vmatpush1.msra.mxu0 %v2651_v21  ;;  %v2643_v21 = vld [vmem:[#allocation8 + $0x108] sm:$0xff] }
 0x1b3   : > { %4330 = vmatmul.mubr.f32.gmra.mxu0 %v7287_v40  ;;  %2993 = vmatprep.subr.mxu0 %v5635_v54  ;;  %v2636_v57 = vld [vmem:[#allocation8 + $0xd0] sm:$0xff] }
 0x1b4   : > { %v1352_v15 = vpop.f32.mrf.mxu1  ;;  %4332 = vmatprep.mubr.f32.mxu0 %v7290_v59  ;;  %v1129_v50 = vpop.f32.mrf.mxu0  ;;  %v2638_v59 = vld [vmem:[#allocation8 + $0xe0] sm:$0xff]  ;;  %2994 = vmatpush1.msra.mxu0 %v2650_v30  ;;  %v5785_v30 = vrot.slane %v5635_v54, 2 }
 0x1b5   : > { %v5740_v44 = vadd.f32 %v1352_v15, %v1127_v12  ;;  %2793 = vmatpush2.msra.mxu1 %v2638_v59  ;;  %2995 = vmatprep.subr.mxu0 %v5635_v54  ;;  %v2635_v50 = vld [vmem:[#allocation8 + $0xc8] sm:$0xff]  ;;  %v2646_v59 = vld [vmem:[#allocation8 + $0x120] sm:$0xff] }
 0x1b6   : > { %v1354_v38 = vpop.f32.mrf.mxu1  ;;  %v1132_v53 = vpop.f32.mrf.mxu0  ;;  %2794 = vmatprep.subr.mxu1 %v5635_v54  ;;  %2996 = vmatpush1.msra.mxu0 %v2649_v9  ;;  %v2632_v9 = vld [vmem:[#allocation8 + $0xb0] sm:$0xff] }
 0x1b7   : > { %4333 = vmatmul.mubr.f32.gmra.mxu0 %v7293_v24  ;;  %2795 = vmatpush2.msra.mxu1 %v2637_v31  ;;  %v2647_v38 = vld [vmem:[#allocation8 + $0x128] sm:$0xff]  ;;  %v2633_v31 = vld [vmem:[#allocation8 + $0xb8] sm:$0xff] }
 0x1b8   : > { %v1357_v40 = vpop.f32.mrf.mxu1  ;;  %4335 = vmatprep.mubr.f32.mxu0 %v7296_v45  ;;  %v1134_v10 = vpop.f32.mrf.mxu0  ;;  %2796 = vmatprep.subr.mxu1 %v5635_v54 }
 0x1b9   : > { %v5747_v42 = vadd.f32 %v1357_v40, %v1132_v53  ;;  %2797 = vmatpush2.msra.mxu1 %v2636_v57  ;;  %2997 = vmatprep.subr.mxu0 %v5635_v54  ;;  %v2645_v10 = vld [vmem:[#allocation8 + $0x118] sm:$0xff]  ;;  %v803_v57 = vrot.slane %v5675_v32, 2 }
 0x1ba   : > { %v1359_v52 = vpop.f32.mrf.mxu1  ;;  %v1137_v24 = vpop.f32.mrf.mxu0  ;;  %2798 = vmatprep.subr.mxu1 %v5635_v54  ;;  %2998 = vmatpush1.msra.mxu0 %v2648_v35 }
 0x1bb   : > { %4336 = vmatmul.mubr.f32.gmra.mxu0 %v7299_v49  ;;  %2799 = vmatpush2.msra.mxu1 %v2635_v50  ;;  %v2631_v50 = vld [vmem:[#allocation8 + $0xa8] sm:$0xff] }
 0x1bc   : > { %v1362_v45 = vpop.f32.mrf.mxu1  ;;  %4338 = vmatprep.mubr.f32.mxu0 %v7302_v13  ;;  %v1139_v19 = vpop.f32.mrf.mxu0  ;;  %2999 = vmatprep.subr.mxu0 %v5635_v54 }
 0x1bd   : > { %v5754_v18 = vadd.f32 %v1362_v45, %v1137_v24  ;;  %3000 = vmatpush1.msra.mxu0 %v2647_v38  ;;  %2800 = vmatprep.subr.mxu1 %v5635_v54  ;;  %v2644_v45 = vld [vmem:[#allocation8 + $0x110] sm:$0xff]  ;;  %v2671_v38 = vld [vmem:[#allocation8 + $0x1e8] sm:$0xff] }
 0x1be   : > { %v1364_v27 = vpop.f32.mrf.mxu1  ;;  %v1142_v49 = vpop.f32.mrf.mxu0  ;;  %3001 = vmatprep.subr.mxu0 %v5635_v54  ;;  %2801 = vmatpush2.msra.mxu1 %v2634_v3  ;;  %v2630_v3 = vld [vmem:[#allocation8 + $0xa0] sm:$0xff] }
 0x1bf   : > { %4339 = vmatmul.mubr.f32.gmra.mxu0 %v7305_v46  ;;  %2802 = vmatprep.subr.mxu1 %v5635_v54 }
 0x1c0   : > { %v1367_v13 = vpop.f32.mrf.mxu1  ;;  %4341 = vmatprep.mubr.f32.mxu0 %v7308_v4  ;;  %v1144_v15 = vpop.f32.mrf.mxu0  ;;  %3002 = vmatpush1.msra.mxu0 %v2646_v59 }
 0x1c1   : > { %v5761_v12 = vadd.f32 %v1367_v13, %v1142_v49  ;;  %3003 = vmatprep.subr.mxu0 %v5635_v54  ;;  %2803 = vmatpush2.msra.mxu1 %v2633_v31  ;;  %v2673_v15 = vld [vmem:[#allocation8 + $0x1f8] sm:$0xff] }
 0x1c2   : > { %v1369_v37 = vpop.f32.mrf.mxu1  ;;  %v1147_v46 = vpop.f32.mrf.mxu0  ;;  %3004 = vmatpush1.msra.mxu0 %v2645_v10  ;;  %2804 = vmatprep.subr.mxu1 %v5635_v54  ;;  %v2669_v10 = vld [vmem:[#allocation8 + $0x1d8] sm:$0xff] }
 0x1c3   : > { %4342 = vmatmul.mubr.f32.gmra.mxu0 %v7311_v58  ;;  %3005 = vmatprep.subr.mxu0 %v5635_v54 }
 0x1c4   : > { %v1372_v4 = vpop.f32.mrf.mxu1  ;;  %4344 = vmatprep.mubr.f32.mxu0 %v7314_v39  ;;  %v1149_v53 = vpop.f32.mrf.mxu0  ;;  %3006 = vmatpush1.msra.mxu0 %v2644_v45 }
 0x1c5   : > { %v5768_v22 = vadd.f32 %v1372_v4, %v1147_v46  ;;  %3007 = vmatprep.subr.mxu0 %v5635_v54  ;;  %2805 = vmatpush2.msra.mxu1 %v2632_v9 }
 0x1c6   : > { %v1374_v40 = vpop.f32.mrf.mxu1  ;;  %v1152_v58 = vpop.f32.mrf.mxu0  ;;  %3008 = vmatpush1.msra.mxu0 %v2643_v21  ;;  %2806 = vmatprep.subr.mxu1 %v5635_v54  ;;  %v2667_v21 = vld [vmem:[#allocation8 + $0x1c8] sm:$0xff] }
 0x1c7   : > { %4345 = vmatmul.mubr.f32.gmra.mxu0 %v7316_v48  ;;  %3009 = vmatprep.subr.mxu0 %v5635_v54 }
 0x1c8   : > { %v1377_v39 = vpop.f32.mrf.mxu1  ;;  %4347 = vmatprep.mubr.f32.mxu0 %v7318_v63  ;;  %v1154_v16 = vpop.f32.mrf.mxu0  ;;  %2807 = vmatpush2.msra.mxu1 %v2631_v50  ;;  %v2628_v50 = vld [vmem:[#allocation8 + $0x90] sm:$0xff] }
 0x1c9   : > { %v5775_v52 = vadd.f32 %v1377_v39, %v1152_v58  ;;  %2808 = vmatprep.subr.mxu1 %v5635_v54 }
 0x1ca   : > { %v1379_v24 = vpop.f32.mrf.mxu1  ;;  %v1157_v48 = vpop.f32.mrf.mxu0  ;;  %2809 = vmatpush2.msra.mxu1 %v2630_v3 }
 0x1cb   : > { %4348 = vmatmul.mubr.f32.gmra.mxu0 %v5479_v41  ;;  %v2642_v41 = vld [vmem:[#allocation8 + $0x100] sm:$0xff]  ;;  %2810 = vmatprep.subr.mxu1 %v5635_v54 }
 0x1cc   : > { %v1382_v63 = vpop.f32.mrf.mxu1  ;;  %4350 = vmatprep.mubr.f32.mxu0 %v5495_v0  ;;  %v1159_v27 = vpop.f32.mrf.mxu0  ;;  %3010 = vmatpush1.msra.mxu0 %v2642_v41 }
 0x1cd   : > { %v5782_v19 = vadd.f32 %v1382_v63, %v1157_v48  ;;  %3011 = vmatprep.subr.mxu0 %v5635_v54  ;;  %v2668_v48 = vld [vmem:[#allocation8 + $0x1d0] sm:$0xff] }
 0x1ce   : > { %v1384_v49 = vpop.f32.mrf.mxu1  ;;  %v1162_v13 = vpop.f32.mrf.mxu0  ;;  %3012 = vmatpush2.msra.mxu0 %v2673_v15  ;;  %v2665_v15 = vld [vmem:[#allocation8 + $0x1b8] sm:$0xff] }
 0x1cf   : > { %4351 = vmatmul.mubr.f32.gmra.mxu0 %v5509_v11  ;;  %v2672_v11 = vld [vmem:[#allocation8 + $0x1f0] sm:$0xff]  ;;  %3013 = vmatprep.subr.mxu0 %v5635_v54 }
 0x1d0   : > { %v1387_v0 = vpop.f32.mrf.mxu1  ;;  %4353 = vmatprep.mubr.f32.mxu0 %v5681_v56  ;;  %v1164_v35 = vpop.f32.mrf.mxu0  ;;  %v804_v56 = vsel %vm660_vm1, %v5785_v30, %v803_v57  ;;  %3014 = vmatpush2.msra.mxu0 %v2672_v11 }
 0x1d1   : > { %v5793_v37 = vadd.f32 %v1387_v0, %v1162_v13  ;;  %3015 = vmatprep.subr.mxu0 %v5635_v54  ;;  %v2666_v13 = vld [vmem:[#allocation8 + $0x1c0] sm:$0xff] }
 0x1d2   : > { %v1389_v46 = vpop.f32.mrf.mxu1  ;;  %v1167_v4 = vpop.f32.mrf.mxu0  ;;  %3016 = vmatpush2.msra.mxu0 %v2671_v38  ;;  %v2663_v38 = vld [vmem:[#allocation8 + $0x1a8] sm:$0xff] }
 0x1d3   : > { %4354 = vmatmul.mubr.f32.gmra.mxu0 %v5691_v36  ;;  %v2670_v36 = vld [vmem:[#allocation8 + $0x1e0] sm:$0xff]  ;;  %3017 = vmatprep.subr.mxu0 %v5635_v54  ;;  %v2629_v46 = vld [vmem:[#allocation8 + $0x98] sm:$0xff] }
 0x1d4   : > { %v1392_v32 = vpop.f32.mrf.mxu1  ;;  %4356 = vmatprep.mubr.f32.mxu0 %v5785_v30  ;;  %v1169_v40 = vpop.f32.mrf.mxu0  ;;  %3018 = vmatpush2.msra.mxu0 %v2670_v36  ;;  %v2627_v36 = vld [vmem:[#allocation8 + $0x88] sm:$0xff] }
 0x1d5   : > { %v5802_v53 = vadd.f32 %v1392_v32, %v1167_v4  ;;  %3019 = vmatprep.subr.mxu0 %v5635_v54  ;;  %2811 = vmatpush2.msra.mxu1 %v2629_v46  ;;  %v2664_v4 = vld [vmem:[#allocation8 + $0x1b0] sm:$0xff]  ;;  %v2658_v46 = vld [vmem:[#allocation8 + $0x180] sm:$0xff] }
 0x1d6   : > { %v1394_v59 = vpop.f32.mrf.mxu1  ;;  %v1172_v58 = vpop.f32.mrf.mxu0  ;;  %3020 = vmatpush2.msra.mxu0 %v2669_v10  ;;  %2812 = vmatprep.subr.mxu1 %v5635_v54 }
 0x1d7   : > { %4357 = vmatmul.mubr.f32.gmra.mxu0 %v804_v56  ;;  %3021 = vmatprep.subr.mxu0 %v5635_v54 }
 0x1d8   : > { %v1397_v39 = vpop.f32.mrf.mxu1  ;;  %v1174_v24 = vpop.f32.mrf.mxu0  ;;  %3022 = vmatpush2.msra.mxu0 %v2668_v48  ;;  %2813 = vmatpush2.msra.mxu1 %v2628_v50  ;;  %v5831_v48 = vld [vmem:[#allocation2 + $0x10] sm:$0x3] }
 0x1d9   : > { %v5807_v16 = vadd.f32 %v1397_v39, %v1172_v58  ;;  %3023 = vmatprep.subr.mxu0 %v5635_v54  ;;  %2814 = vmatprep.subr.mxu1 %v5635_v54  ;;  %v2662_v39 = vld [vmem:[#allocation8 + $0x1a0] sm:$0xff] }
 0x1da   : > { %v1399_v45 = vpop.f32.mrf.mxu1  ;;  %v1467_v63 = vpop.f32.mrf.mxu0  ;;  %3024 = vmatpush2.msra.mxu0 %v2667_v21  ;;  %2815 = vmatpush2.msra.mxu1 %v2627_v36  ;;  %v2355_v21 = vrot.slane %v5831_v48, 1 }
 0x1db   : > { %v1468_v31 = vadd.f32 %v1467_v63, %v5585_v28  ;;  %3025 = vmatprep.subr.mxu0 %v5635_v54  ;;  %2816 = vmatprep.subr.mxu1 %v5635_v54  ;;  %v2661_v45 = vld [vmem:[#allocation8 + $0x198] sm:$0xff] }
 0x1dc   : > { %v1469_v27 = vpop.f32.mrf.mxu0  ;;  %v1692_v49 = vpop.f32.mrf.mxu1  ;;  %3026 = vmatpush2.msra.mxu0 %v2666_v13 }
 0x1dd   : > { %v5814_v41 = vadd.f32 %v1692_v49, %v1468_v31  ;;  %3027 = vmatprep.subr.mxu0 %v5635_v54  ;;  %v2660_v49 = vld [vmem:[#allocation8 + $0x190] sm:$0xff] }
 0x1de   : > { %v1472_v0 = vpop.f32.mrf.mxu0  ;;  %v1694_v57 = vpop.f32.mrf.mxu1  ;;  %3028 = vmatpush2.msra.mxu0 %v2665_v15 }
 0x1df   : > { %v1473_v9 = vadd.f32 %v1472_v0, %v5591_v2  ;;  %3029 = vmatprep.subr.mxu0 %v5635_v54  ;;  %v2356_v0 = vsel %vm547_vm0, %v5671_v23, %v2355_v21 }
 0x1e0   : > { %v1474_v35 = vpop.f32.mrf.mxu0  ;;  %v1697_v28 = vpop.f32.mrf.mxu1  ;;  %3030 = vmatpush2.msra.mxu0 %v2664_v4 }
 0x1e1   : > { %v5819_v11 = vadd.f32 %v1697_v28, %v1473_v9  ;;  %3031 = vmatprep.subr.mxu0 %v5635_v54  ;;  %v2659_v9 = vld [vmem:[#allocation8 + $0x188] sm:$0xff] }
 0x1e2   : > { %v1699_v56 = vpop.f32.mrf.mxu1  ;;  %3032 = vmatpush2.msra.mxu0 %v2663_v38 }
 0x1e3   : > { %v1477_v32 = vpop.f32.mrf.mxu0  ;;  %3033 = vmatprep.subr.mxu0 %v5635_v54 }
 0x1e4   : > { %v1478_v2 = vadd.f32 %v1477_v32, %v5597_v55  ;;  %v2626_v55 = vld [vmem:[#allocation8 + $0x80] sm:$0xff]  ;;  %3034 = vmatpush2.msra.mxu0 %v2662_v39 }
 0x1e5   : > { %v1479_v40 = vpop.f32.mrf.mxu0  ;;  %v1702_v59 = vpop.f32.mrf.mxu1  ;;  %2817 = vmatpush2.msra.mxu1 %v2626_v55  ;;  %3035 = vmatprep.subr.mxu0 %v5635_v54 }
 0x1e6   : > { %v5826_v58 = vadd.f32 %v1702_v59, %v1478_v2  ;;  %3036 = vmatpush2.msra.mxu0 %v2661_v45  ;;  %2819 = vmatmul.mubr.f32.vlgmr.msra.gmra.mxu1 %v5635_v54  ;;  %v2689_v59 = vld [vmem:[#allocation8 + $0x278] sm:$0xff] }
 0x1e7   : > { %v1482_v3 = vpop.f32.mrf.mxu0  ;;  %v1704_v10 = vpop.f32.mrf.mxu1  ;;  %3037 = vmatprep.subr.mxu0 %v5635_v54  ;;  %3204 = vmatprep.subr.mxu1 %v5635_v54 }
 0x1e8   : > { %v1483_v24 = vadd.f32 %v1482_v3, %v5603_v8  ;;  %3038 = vmatpush2.msra.mxu0 %v2660_v49  ;;  %2823 = vmatprep.mubr.f32.mxu1 %v2356_v0 }
 0x1e9   : > { %v1484_v63 = vpop.f32.mrf.mxu0  ;;  %v1707_v31 = vpop.f32.mrf.mxu1  ;;  %3039 = vmatprep.subr.mxu0 %v5635_v54  ;;  %3205 = vmatpush1.msra.mxu1 %v2689_v59 }
 0x1ea   : > { %v5836_v27 = vadd.f32 %v1707_v31, %v1483_v24  ;;  %3040 = vmatpush2.msra.mxu0 %v2659_v9  ;;  %2824 = vmatmul.mubr.f32.gmra.mxu1 %v5635_v54  ;;  %v2688_v24 = vld [vmem:[#allocation8 + $0x270] sm:$0xff] }
 0x1eb   : > { %v1487_v8 = vpop.f32.mrf.mxu0  ;;  %v1709_v13 = vpop.f32.mrf.mxu1  ;;  %3041 = vmatprep.subr.mxu0 %v5635_v54  ;;  %3206 = vmatprep.subr.mxu1 %v5635_v54 }
 0x1ec   : > { %v1488_v57 = vadd.f32 %v1487_v8, %v5609_v62  ;;  %3042 = vmatpush2.msra.mxu0 %v2658_v46  ;;  %3207 = vmatpush1.msra.mxu1 %v2688_v24  ;;  %v2687_v8 = vld [vmem:[#allocation8 + $0x268] sm:$0xff] }
 0x1ed   : > { %v1489_v15 = vpop.f32.mrf.mxu0  ;;  %v1712_v35 = vpop.f32.mrf.mxu1  ;;  %3429 = vmatprep.subr.mxu0 %v5635_v54  ;;  %3208 = vmatprep.subr.mxu1 %v5635_v54 }
 0x1ee   : > { %v5845_v28 = vadd.f32 %v1712_v35, %v1488_v57  ;;  %3209 = vmatpush1.msra.mxu1 %v2687_v8  ;;  %v2686_v35 = vld [vmem:[#allocation8 + $0x260] sm:$0xff] }
 0x1ef   : > { %v1492_v4 = vpop.f32.mrf.mxu0  ;;  %v1714_v32 = vpop.f32.mrf.mxu1  ;;  %3210 = vmatprep.subr.mxu1 %v5635_v54 }
 0x1f0   : > { %v1493_v23 = vadd.f32 %v1492_v4, %v5616_v61  ;;  %3211 = vmatpush1.msra.mxu1 %v2686_v35 }
 0x1f1   : > { %v1494_v62 = vpop.f32.mrf.mxu0  ;;  %v1717_v56 = vpop.f32.mrf.mxu1  ;;  %3212 = vmatprep.subr.mxu1 %v5635_v54 }
 0x1f2   : > { %v5851_v50 = vadd.f32 %v1717_v56, %v1493_v23  ;;  %v2685_v56 = vld [vmem:[#allocation8 + $0x258] sm:$0xff] }
 0x1f3   : > { %v1497_v2 = vpop.f32.mrf.mxu0  ;;  %v1719_v38 = vpop.f32.mrf.mxu1  ;;  %3213 = vmatpush1.msra.mxu1 %v2685_v56 }
 0x1f4   : > { %v1498_v40 = vadd.f32 %v1497_v2, %v5623_v33  ;;  %3214 = vmatprep.subr.mxu1 %v5635_v54 }
 0x1f5   : > { %v1499_v36 = vpop.f32.mrf.mxu0  ;;  %v1722_v39 = vpop.f32.mrf.mxu1 }
 0x1f6   : > { %v5854_v3 = vadd.f32 %v1722_v39, %v1498_v40  ;;  %v2684_v39 = vld [vmem:[#allocation8 + $0x250] sm:$0xff] }
 0x1f7   : > { %v1502_v61 = vpop.f32.mrf.mxu0  ;;  %v1724_v10 = vpop.f32.mrf.mxu1  ;;  %3215 = vmatpush1.msra.mxu1 %v2684_v39  ;;  %v5892_v39 = vld [vmem:[#allocation2] sm:$0xff] }
 0x1f8   : > { %v1503_v55 = vadd.f32 %v1502_v61, %v5630_v60  ;;  %3216 = vmatprep.subr.mxu1 %v5635_v54 }
 0x1f9   : > { %v1504_v45 = vpop.f32.mrf.mxu0  ;;  %v1727_v63 = vpop.f32.mrf.mxu1 }
 0x1fa   : > { %v5858_v31 = vadd.f32 %v1727_v63, %v1503_v55  ;;  %v2683_v63 = vld [vmem:[#allocation8 + $0x248] sm:$0xff] }
 0x1fb   : > { %v1507_v33 = vpop.f32.mrf.mxu0  ;;  %v1729_v21 = vpop.f32.mrf.mxu1  ;;  %3217 = vmatpush1.msra.mxu1 %v2683_v63 }
 0x1fc   : > { %v1508_v49 = vadd.f32 %v1507_v33, %v5639_v7  ;;  %3218 = vmatprep.subr.mxu1 %v5635_v54 }
 0x1fd   : > { %v1509_v13 = vpop.f32.mrf.mxu0  ;;  %v1732_v0 = vpop.f32.mrf.mxu1 }
 0x1fe   : > { %v5862_v57 = vadd.f32 %v1732_v0, %v1508_v49  ;;  %v2682_v0 = vld [vmem:[#allocation8 + $0x240] sm:$0xff] }
 0x1ff   : > { %v1512_v60 = vpop.f32.mrf.mxu0  ;;  %v1734_v9 = vpop.f32.mrf.mxu1  ;;  %3219 = vmatpush1.msra.mxu1 %v2682_v0  ;;  %v2676_v0 = vld [vmem:[#allocation8 + $0x210] sm:$0xff] }
 0x200   : > { %v1513_v15 = vadd.f32 %v1512_v60, %v5646_v6  ;;  %3220 = vmatprep.subr.mxu1 %v5635_v54 }
 0x201   : > { %v1514_v46 = vpop.f32.mrf.mxu0  ;;  %v1737_v4 = vpop.f32.mrf.mxu1 }
 0x202   : > { %v5866_v32 = vadd.f32 %v1737_v4, %v1513_v15  ;;  %v2681_v4 = vld [vmem:[#allocation8 + $0x238] sm:$0xff] }
 0x203   : > { %v1517_v7 = vpop.f32.mrf.mxu0  ;;  %v1739_v23 = vpop.f32.mrf.mxu1  ;;  %3221 = vmatpush1.msra.mxu1 %v2681_v4 }
 0x204   : > { %v1518_v62 = vadd.f32 %v1517_v7, %v5655_v34  ;;  %3222 = vmatprep.subr.mxu1 %v5635_v54 }
 0x205   : > { %v1519_v2 = vpop.f32.mrf.mxu0  ;;  %v1742_v38 = vpop.f32.mrf.mxu1 }
 0x206   : > { %v5870_v40 = vadd.f32 %v1742_v38, %v1518_v62  ;;  %v2680_v38 = vld [vmem:[#allocation8 + $0x230] sm:$0xff] }
 0x207   : > { %v1522_v6 = vpop.f32.mrf.mxu0  ;;  %v1744_v59 = vpop.f32.mrf.mxu1  ;;  %3223 = vmatpush1.msra.mxu1 %v2680_v38 }
 0x208   : > { %v1523_v36 = vadd.f32 %v1522_v6, %v5663_v5  ;;  %3224 = vmatprep.subr.mxu1 %v5892_v39 }
 0x209   : > { %v1524_v61 = vpop.f32.mrf.mxu0  ;;  %v1747_v10 = vpop.f32.mrf.mxu1 }
 0x20a   : > { %v5874_v55 = vadd.f32 %v1747_v10, %v1523_v36 }
 0x20b   : > { %v1527_v34 = vpop.f32.mrf.mxu0  ;;  %v1749_v24 = vpop.f32.mrf.mxu1 }
 0x20c   : > { %v1528_v45 = vadd.f32 %v1527_v34, %v5677_v26  ;;  %v2679_v34 = vld [vmem:[#allocation8 + $0x228] sm:$0xff] }
 0x20d   : > { %v1529_v33 = vpop.f32.mrf.mxu0  ;;  %v1752_v21 = vpop.f32.mrf.mxu1  ;;  %3225 = vmatpush1.msra.mxu1 %v2679_v34 }
 0x20e   : > { %v5878_v49 = vadd.f32 %v1752_v21, %v1528_v45  ;;  %3226 = vmatprep.subr.mxu1 %v5892_v39  ;;  %v2678_v21 = vld [vmem:[#allocation8 + $0x220] sm:$0xff] }
 0x20f   : > { %v1532_v5 = vpop.f32.mrf.mxu0  ;;  %v1754_v8 = vpop.f32.mrf.mxu1  ;;  %3227 = vmatpush1.msra.mxu1 %v2678_v21 }
 0x210   : > { %v1533_v13 = vadd.f32 %v1532_v5, %v5687_v25  ;;  %3228 = vmatprep.subr.mxu1 %v5892_v39 }
 0x211   : > { %v1534_v60 = vpop.f32.mrf.mxu0  ;;  %v1757_v9 = vpop.f32.mrf.mxu1 }
 0x212   : > { %v5882_v15 = vadd.f32 %v1757_v9, %v1533_v13 }
 0x213   : > { %v1537_v26 = vpop.f32.mrf.mxu0  ;;  %v1759_v35 = vpop.f32.mrf.mxu1 }
 0x214   : > { %v1538_v46 = vadd.f32 %v1537_v26, %v5698_v17  ;;  %v2675_v35 = vld [vmem:[#allocation8 + $0x208] sm:$0xff] }
 0x215   : > { %v1539_v7 = vpop.f32.mrf.mxu0  ;;  %v1762_v23 = vpop.f32.mrf.mxu1 }
 0x216   : > { %v5886_v62 = vadd.f32 %v1762_v23, %v1538_v46 }
 0x217   : > { %v1542_v25 = vpop.f32.mrf.mxu0  ;;  %v1764_v56 = vpop.f32.mrf.mxu1 }
 0x218   : > { %v1543_v2 = vadd.f32 %v1542_v25, %v5703_v1  ;;  %v2674_v56 = vld [vmem:[#allocation8 + $0x200] sm:$0xff] }
 0x219   : > { %v1544_v6 = vpop.f32.mrf.mxu0  ;;  %v1767_v59 = vpop.f32.mrf.mxu1 }
 0x21a   : > { %v5890_v36 = vadd.f32 %v1767_v59, %v1543_v2 }
 0x21b   : > { %v1547_v17 = vpop.f32.mrf.mxu0  ;;  %v1769_v61 = vpop.f32.mrf.mxu1 }
 0x21c   : > { %v1548_v10 = vadd.f32 %v1547_v17, %v5709_v29  ;;  %v2677_v29 = vld [vmem:[#allocation8 + $0x218] sm:$0xff] }
 0x21d   : > { %v1549_v54 = vpop.f32.mrf.mxu0  ;;  %v1772_v24 = vpop.f32.mrf.mxu1  ;;  %3229 = vmatpush1.msra.mxu1 %v2677_v29  ;;  %v2705_v61 = vld [vmem:[#allocation8 + $0x2f8] sm:$0xff] }
 0x21e   : > { %v5896_v45 = vadd.f32 %v1772_v24, %v1548_v10  ;;  %3230 = vmatprep.subr.mxu1 %v5892_v39 }
 0x21f   : > { %v1552_v1 = vpop.f32.mrf.mxu0  ;;  %v1774_v63 = vpop.f32.mrf.mxu1  ;;  %3231 = vmatpush1.msra.mxu1 %v2676_v0  ;;  %v2703_v0 = vld [vmem:[#allocation8 + $0x2e8] sm:$0xff] }
 0x220   : > { %v1553_v33 = vadd.f32 %v1552_v1, %v5714_v51  ;;  %3232 = vmatprep.subr.mxu1 %v5892_v39  ;;  %v2704_v63 = vld [vmem:[#allocation8 + $0x2f0] sm:$0xff] }
 0x221   : > { %v1554_v5 = vpop.f32.mrf.mxu0  ;;  %v1777_v8 = vpop.f32.mrf.mxu1  ;;  %3233 = vmatpush1.msra.mxu1 %v2675_v35 }
 0x222   : > { %v5900_v13 = vadd.f32 %v1777_v8, %v1553_v33  ;;  %3234 = vmatprep.subr.mxu1 %v5892_v39 }
 0x223   : > { %v1557_v60 = vpop.f32.mrf.mxu0  ;;  %v1779_v9 = vpop.f32.mrf.mxu1  ;;  %3235 = vmatpush1.msra.mxu1 %v2674_v56 }
 0x224   : > { %v1558_v26 = vadd.f32 %v1557_v60, %v5719_v47  ;;  %3236 = vmatprep.subr.mxu1 %v5892_v39 }
 0x225   : > { %v1559_v46 = vpop.f32.mrf.mxu0  ;;  %v1782_v51 = vpop.f32.mrf.mxu1  ;;  %3237 = vmatpush2.msra.mxu1 %v2705_v61 }
 0x226   : > { %v5905_v4 = vadd.f32 %v1782_v51, %v1558_v26  ;;  %3238 = vmatprep.subr.mxu1 %v5892_v39  ;;  %v2702_v51 = vld [vmem:[#allocation8 + $0x2e0] sm:$0xff] }
 0x227   : > { %v1562_v7 = vpop.f32.mrf.mxu0  ;;  %v1784_v23 = vpop.f32.mrf.mxu1  ;;  %3239 = vmatpush2.msra.mxu1 %v2704_v63 }
 0x228   : > { %v1563_v25 = vadd.f32 %v1562_v7, %v5724_v14  ;;  %3240 = vmatprep.subr.mxu1 %v5892_v39 }
 0x229   : > { %v1564_v2 = vpop.f32.mrf.mxu0  ;;  %v1787_v47 = vpop.f32.mrf.mxu1  ;;  %3241 = vmatpush2.msra.mxu1 %v2703_v0 }
 0x22a   : > { %v5910_v38 = vadd.f32 %v1787_v47, %v1563_v25  ;;  %3242 = vmatprep.subr.mxu1 %v5892_v39  ;;  %v2701_v47 = vld [vmem:[#allocation8 + $0x2d8] sm:$0xff] }
 0x22b   : > { %v1567_v6 = vpop.f32.mrf.mxu0  ;;  %v1789_v59 = vpop.f32.mrf.mxu1  ;;  %3243 = vmatpush2.msra.mxu1 %v2702_v51 }
 0x22c   : > { %v1568_v17 = vadd.f32 %v1567_v6, %v5729_v20  ;;  %3244 = vmatprep.subr.mxu1 %v5892_v39 }
 0x22d   : > { %v1569_v10 = vpop.f32.mrf.mxu0  ;;  %v1792_v34 = vpop.f32.mrf.mxu1  ;;  %3245 = vmatpush2.msra.mxu1 %v2701_v47 }
 0x22e   : > { %v5914_v54 = vadd.f32 %v1792_v34, %v1568_v17  ;;  %3246 = vmatprep.subr.mxu1 %v5892_v39  ;;  %v2700_v34 = vld [vmem:[#allocation8 + $0x2d0] sm:$0xff] }
 0x22f   : > { %v1572_v14 = vpop.f32.mrf.mxu0  ;;  %v1794_v24 = vpop.f32.mrf.mxu1  ;;  %3247 = vmatpush2.msra.mxu1 %v2700_v34 }
 0x230   : > { %v1573_v1 = vadd.f32 %v1572_v14, %v5734_v43  ;;  %3248 = vmatprep.subr.mxu1 %v5892_v39 }
 0x231   : > { %v1574_v33 = vpop.f32.mrf.mxu0  ;;  %v1797_v21 = vpop.f32.mrf.mxu1 }
 0x232   : > { %v5918_v5 = vadd.f32 %v1797_v21, %v1573_v1  ;;  %v2699_v21 = vld [vmem:[#allocation8 + $0x2c8] sm:$0xff] }
 0x233   : > { %v1577_v20 = vpop.f32.mrf.mxu0  ;;  %v1799_v8 = vpop.f32.mrf.mxu1  ;;  %3249 = vmatpush2.msra.mxu1 %v2699_v21 }
 0x234   : > { %v1578_v29 = vadd.f32 %v1577_v20, %v5740_v44  ;;  %3250 = vmatprep.subr.mxu1 %v5892_v39 }
 0x235   : > { %v1579_v60 = vpop.f32.mrf.mxu0  ;;  %v1802_v9 = vpop.f32.mrf.mxu1 }
 0x236   : > { %v5922_v26 = vadd.f32 %v1802_v9, %v1578_v29  ;;  %v2698_v9 = vld [vmem:[#allocation8 + $0x2c0] sm:$0xff] }
 0x237   : > { %v1582_v43 = vpop.f32.mrf.mxu0  ;;  %v1804_v35 = vpop.f32.mrf.mxu1  ;;  %3251 = vmatpush2.msra.mxu1 %v2698_v9 }
 0x238   : > { %v1583_v46 = vadd.f32 %v1582_v43, %v5747_v42  ;;  %3252 = vmatprep.subr.mxu1 %v5892_v39 }
 0x239   : > { %v1584_v7 = vpop.f32.mrf.mxu0  ;;  %v1807_v23 = vpop.f32.mrf.mxu1 }
 0x23a   : > { %v5926_v25 = vadd.f32 %v1807_v23, %v1583_v46  ;;  %v2697_v23 = vld [vmem:[#allocation8 + $0x2b8] sm:$0xff] }
 0x23b   : > { %v1587_v44 = vpop.f32.mrf.mxu0  ;;  %v1809_v56 = vpop.f32.mrf.mxu1  ;;  %3253 = vmatpush2.msra.mxu1 %v2697_v23 }
 0x23c   : > { %v1588_v2 = vadd.f32 %v1587_v44, %v5754_v18  ;;  %3254 = vmatprep.subr.mxu1 %v5892_v39 }
 0x23d   : > { %v1589_v6 = vpop.f32.mrf.mxu0  ;;  %v1812_v59 = vpop.f32.mrf.mxu1 }
 0x23e   : > { %v5930_v17 = vadd.f32 %v1812_v59, %v1588_v2  ;;  %v2696_v59 = vld [vmem:[#allocation8 + $0x2b0] sm:$0xff] }
 0x23f   : > { %v1592_v42 = vpop.f32.mrf.mxu0  ;;  %v1814_v61 = vpop.f32.mrf.mxu1  ;;  %3255 = vmatpush2.msra.mxu1 %v2696_v59 }
 0x240   : > { %v1593_v10 = vadd.f32 %v1592_v42, %v5761_v12  ;;  %3256 = vmatprep.subr.mxu1 %v5892_v39 }
 0x241   : > { %v1594_v14 = vpop.f32.mrf.mxu0  ;;  %v1817_v24 = vpop.f32.mrf.mxu1 }
 0x242   : > { %v5934_v1 = vadd.f32 %v1817_v24, %v1593_v10  ;;  %v2695_v24 = vld [vmem:[#allocation8 + $0x2a8] sm:$0xff] }
 0x243   : > { %v1597_v18 = vpop.f32.mrf.mxu0  ;;  %v1819_v63 = vpop.f32.mrf.mxu1  ;;  %3257 = vmatpush2.msra.mxu1 %v2695_v24  ;;  %v2691_v24 = vld [vmem:[#allocation8 + $0x288] sm:$0xff] }
 0x244   : > { %v1598_v33 = vadd.f32 %v1597_v18, %v5768_v22  ;;  %3258 = vmatprep.subr.mxu1 %v5892_v39 }
 0x245   : > { %v1599_v20 = vpop.f32.mrf.mxu0  ;;  %v1822_v8 = vpop.f32.mrf.mxu1 }
 0x246   : > { %v5938_v29 = vadd.f32 %v1822_v8, %v1598_v33  ;;  %v2694_v20 = vld [vmem:[#allocation8 + $0x2a0] sm:$0xff] }
 0x247   : > { %v1602_v12 = vpop.f32.mrf.mxu0  ;;  %v1824_v0 = vpop.f32.mrf.mxu1  ;;  %3259 = vmatpush2.msra.mxu1 %v2694_v20 }
 0x248   : > { %v1603_v60 = vadd.f32 %v1602_v12, %v5775_v52  ;;  %3260 = vmatprep.subr.mxu1 %v5892_v39 }
 0x249   : > { %v1604_v43 = vpop.f32.mrf.mxu0  ;;  %v1827_v35 = vpop.f32.mrf.mxu1 }
 0x24a   : > { %v5942_v46 = vadd.f32 %v1827_v35, %v1603_v60  ;;  %v2693_v43 = vld [vmem:[#allocation8 + $0x298] sm:$0xff]  ;;  %v5971_v35 = vld [vmem:[%s7123_s3] ss:$0 sm:$0xff] }
 0x24b   : > { %v1607_v22 = vpop.f32.mrf.mxu0  ;;  %v1829_v51 = vpop.f32.mrf.mxu1  ;;  %3261 = vmatpush2.msra.mxu1 %v2693_v43 }
 0x24c   : > { %v1608_v7 = vadd.f32 %v1607_v22, %v5782_v19  ;;  %3262 = vmatprep.subr.mxu1 %v5892_v39 }
 0x24d   : > { %v1609_v44 = vpop.f32.mrf.mxu0  ;;  %v1832_v56 = vpop.f32.mrf.mxu1 }
 0x24e   : > { %v5946_v2 = vadd.f32 %v1832_v56, %v1608_v7 }
 0x24f   : > { %v1612_v52 = vpop.f32.mrf.mxu0  ;;  %v1834_v47 = vpop.f32.mrf.mxu1 }
 0x250   : > { %v1613_v6 = vadd.f32 %v1612_v52, %v5793_v37  ;;  %v2692_v52 = vld [vmem:[#allocation8 + $0x290] sm:$0xff] }
 0x251   : > { %v1614_v42 = vpop.f32.mrf.mxu0  ;;  %v1837_v61 = vpop.f32.mrf.mxu1  ;;  %3263 = vmatpush2.msra.mxu1 %v2692_v52 }
 0x252   : > { %v5950_v10 = vadd.f32 %v1837_v61, %v1613_v6  ;;  %3264 = vmatprep.subr.mxu1 %v5892_v39 }
 0x253   : > { %v1617_v19 = vpop.f32.mrf.mxu0  ;;  %v1839_v34 = vpop.f32.mrf.mxu1  ;;  %3265 = vmatpush2.msra.mxu1 %v2691_v24 }
 0x254   : > { %v1618_v14 = vadd.f32 %v1617_v19, %v5802_v53  ;;  %v5965_v53 = vld [vmem:[%s7122_s2] ss:$0 sm:$0xff]  ;;  %3266 = vmatprep.subr.mxu1 %v5892_v39 }
 0x255   : > { %v1619_v18 = vpop.f32.mrf.mxu0  ;;  %v1842_v63 = vpop.f32.mrf.mxu1 }
 0x256   : > { %v5954_v33 = vadd.f32 %v1842_v63, %v1618_v14 }
 0x257   : > { %v5957_v37 = vpop.f32.mrf.mxu0  ;;  %v1844_v21 = vpop.f32.mrf.mxu1 }
 0x259   : > { %v1624_v8 = vpop.f32.mrf.mxu0  ;;  %v5959_v12 = vpop.f32.mrf.mxu1 }
 0x25b   : > { %v4313_v0 = vpop.f32.mrf.mxu0  ;;  %v1849_v60 = vpop.f32.mrf.mxu1 }
 0x25c   : > { %v1923_v9 = vadd.f32 %v4313_v0, %v5819_v11  ;;  %v2690_v0 = vld [vmem:[#allocation8 + $0x280] sm:$0xff] }
 0x25d   : > { %v1917_v22 = vpop.f32.mrf.mxu0  ;;  %3267 = vmatpush2.msra.mxu1 %v2690_v0 }
 0x25e   : > { %v2084_v51 = vmul.f32 %v5965_v53, %v1923_v9  ;;  %v1918_v7 = vadd.f32 %v1917_v22, %v5814_v41 }
 0x25f   : > { %v4316_v23 = vpop.f32.mrf.mxu0 }
 0x260   : > { %v2123_v44 = vadd.f32 %v5971_v35, %v2084_v51  ;;  %v2083_v56 = vmul.f32 %v5965_v53, %v1918_v7  ;;  %v1933_v11 = vadd.f32 %v4316_v23, %v5836_v27 }
 0x261   : > { %v1927_v47 = vpop.f32.mrf.mxu0 }
 0x262   : > { %v2155_v6 = vmax.f32 %v2123_v44, 0.0  ;;  %v2122_v59 = vadd.f32 %v5971_v35, %v2083_v56  ;;  %v2086_v42 = vmul.f32 %v5965_v53, %v1933_v11  ;;  %v1928_v61 = vadd.f32 %v1927_v47, %v5826_v58  ;;  %v2753_v11 = vld [vmem:[#allocation8 + $0x478] sm:$0xff] }
 0x263   : > { %v4319_v41 = vpop.f32.mrf.mxu0  ;;  %v2467_v56 = vrot.slane %v5831_v48, 2  ;;  %4359 = vmatprep.subr.mxu1 %v2753_v11  ;;  %v2719_v11 = vld [vmem:[#allocation8 + $0x368] sm:$0xff] }
 0x264   : > { %2187 = vst [vmem:[#allocation2 + $0x21] sm:$0xff] %v2155_v6  ;;  %v2154_v19 = vmax.f32 %v2122_v59, 0.0  ;;  %v2125_v34 = vadd.f32 %v5971_v35, %v2086_v42  ;;  %v2085_v14 = vmul.f32 %v5965_v53, %v1928_v61  ;;  %v1943_v27 = vadd.f32 %v4319_v41, %v5851_v50  ;;  %v2721_v41 = vld [vmem:[#allocation8 + $0x378] sm:$0xff] }
 0x265   : > { %v1937_v18 = vpop.f32.mrf.mxu0 }
 0x266   : > { %2186 = vst [vmem:[#allocation2 + $0x19] sm:$0xff] %v2154_v19  ;;  %v2157_v63 = vmax.f32 %v2125_v34, 0.0  ;;  %v2124_v21 = vadd.f32 %v5971_v35, %v2085_v14  ;;  %v2088_v58 = vmul.f32 %v5965_v53, %v1943_v27  ;;  %v1938_v20 = vadd.f32 %v1937_v18, %v5845_v28 }
 0x267   : > { %v4322_v8 = vpop.f32.mrf.mxu0  ;;  %v2468_v18 = vsel %vm660_vm1, %v5785_v30, %v2467_v56 }
 0x268   : > { %2189 = vst [vmem:[#allocation2 + $0x39] sm:$0xff] %v2157_v63  ;;  %v2156_v60 = vmax.f32 %v2124_v21, 0.0  ;;  %v2127_v9 = vadd.f32 %v5971_v35, %v2088_v58  ;;  %v2087_v50 = vmul.f32 %v5965_v53, %v1938_v20  ;;  %v1953_v43 = vadd.f32 %v4322_v8, %v5858_v31  ;;  %v2720_v63 = vld [vmem:[#allocation8 + $0x370] sm:$0xff] }
 0x269   : > { %v1947_v22 = vpop.f32.mrf.mxu0 }
 0x26a   : > { %2188 = vst [vmem:[#allocation2 + $0x31] sm:$0xff] %v2156_v60  ;;  %v2159_v51 = vmax.f32 %v2127_v9, 0.0  ;;  %v2126_v7 = vadd.f32 %v5971_v35, %v2087_v50  ;;  %v2090_v28 = vmul.f32 %v5965_v53, %v1953_v43  ;;  %v1948_v23 = vadd.f32 %v1947_v22, %v5854_v3 }
 0x26b   : > { %v4325_v44 = vpop.f32.mrf.mxu0  ;;  %v6005_v14 = vld [vmem:[#allocation2 + $0x28] sm:$0x3] }
 0x26c   : > { %2191 = vst [vmem:[#allocation2 + $0x51] sm:$0xff] %v2159_v51  ;;  %v2158_v52 = vmax.f32 %v2126_v7, 0.0  ;;  %v2129_v47 = vadd.f32 %v5971_v35, %v2090_v28  ;;  %v2089_v31 = vmul.f32 %v5965_v53, %v1948_v23  ;;  %v1963_v6 = vadd.f32 %v4325_v44, %v5866_v32 }
 0x26d   : > { %v1957_v59 = vpop.f32.mrf.mxu0  ;;  %v2253_v42 = vld [vmem:[#allocation2 + $0x18] sm:$0xff]  ;;  %v6000_v61 = vld [vmem:[#allocation2 + $0x20] sm:$0xff] }
 0x26e   : > { %2190 = vst [vmem:[#allocation2 + $0x49] sm:$0xff] %v2158_v52  ;;  %v2161_v3 = vmax.f32 %v2129_v47, 0.0  ;;  %v2128_v19 = vadd.f32 %v5971_v35, %v2089_v31  ;;  %v2092_v48 = vmul.f32 %v5965_v53, %v1963_v6  ;;  %v1958_v34 = vadd.f32 %v1957_v59, %v5862_v57  ;;  %3043 = vmatprep.mubr.f32.mxu0 %v2253_v42 }
 0x26f   : > { %v4328_v27 = vpop.f32.mrf.mxu0  ;;  %3044 = vmatmul.mubr.f32.vlgmr.msra.gmra.mxu0 %v5785_v30  ;;  %v2357_v32 = vrot.slane %v2253_v42, 1  ;;  %v2358_v24 = vrot.slane %v6000_v61, 1  ;;  %v2469_v8 = vrot.slane %v2253_v42, 2  ;;  %v2470_v0 = vrot.slane %v6000_v61, 2 }
 0x270   : > { %2193 = vst [vmem:[#allocation2 + $0x69] sm:$0xff] %v2161_v3  ;;  %v2160_v21 = vmax.f32 %v2128_v19, 0.0  ;;  %v2131_v58 = vadd.f32 %v5971_v35, %v2092_v48  ;;  %v2091_v20 = vmul.f32 %v5965_v53, %v1958_v34  ;;  %v1973_v57 = vadd.f32 %v4328_v27, %v5874_v55  ;;  %3048 = vmatprep.mubr.f32.mxu0 %v6000_v61  ;;  %v6046_v48 = vld [vmem:[#allocation2 + $0x40] sm:$0x3] }
 0x271   : > { %3430 = vmatpush1.msra.mxu0 %v2721_v41  ;;  %v1967_v60 = vpop.f32.mrf.mxu0  ;;  %v6017_v9 = vsel %vm547_vm0, %v2357_v32, %v2358_v24  ;;  %v2360_v30 = vrot.slane %v6005_v14, 1  ;;  %v6020_v50 = vld [vmem:[#allocation2 + $0x30] sm:$0xff]  ;;  %v6022_v43 = vld [vmem:[#allocation2 + $0x38] sm:$0xff]  ;;  %v6040_v59 = vsel %vm660_vm1, %v2469_v8, %v2470_v0  ;;  %v2472_v27 = vrot.slane %v6005_v14, 2 }
 0x272   : > { %3431 = vmatprep.subr.mxu0 %v5892_v39  ;;  %2192 = vst [vmem:[#allocation2 + $0x61] sm:$0xff] %v2160_v21  ;;  %v2163_v55 = vmax.f32 %v2131_v58, 0.0  ;;  %v2130_v22 = vadd.f32 %v5971_v35, %v2091_v20  ;;  %v2094_v51 = vmul.f32 %v5965_v53, %v1973_v57  ;;  %v1968_v7 = vadd.f32 %v1967_v60, %v5870_v40  ;;  %v2718_v32 = vld [vmem:[#allocation8 + $0x360] sm:$0xff] }
 0x273   : > { %2828 = vmatprep.mubr.f32.mxu1 %v6017_v9  ;;  %3432 = vmatpush1.msra.mxu0 %v2720_v63  ;;  %v4331_v28 = vpop.f32.mrf.mxu0  ;;  %v6030_v23 = vsel %vm547_vm0, %v2358_v24, %v2360_v30  ;;  %v2362_v44 = vrot.slane %v6020_v50, 1  ;;  %v2363_v56 = vrot.slane %v6022_v43, 1  ;;  %v2365_v14 = vrot.slane %v6046_v48, 1 }
 0x274   : > { %2829 = vmatmul.mubr.f32.gmra.mxu1 %v2253_v42  ;;  %3049 = vmatmul.mubr.f32.gmra.mxu0 %v2468_v18  ;;  %2195 = vst [vmem:[#allocation2 + $0x81] sm:$0xff] %v2163_v55  ;;  %v2162_v52 = vmax.f32 %v2130_v22, 0.0  ;;  %v2133_v47 = vadd.f32 %v5971_v35, %v2094_v51  ;;  %v2093_v40 = vmul.f32 %v5965_v53, %v1968_v7  ;;  %v2474_v57 = vrot.slane %v6020_v50, 2 }
 0x275   : > { %v1983_v31 = vadd.f32 %v4331_v28, %v5882_v15  ;;  %2833 = vmatprep.mubr.f32.mxu1 %v6030_v23  ;;  %3053 = vmatprep.mubr.f32.mxu0 %v6020_v50  ;;  %v1977_v6 = vpop.f32.mrf.mxu0  ;;  %v6050_v34 = vsel %vm547_vm0, %v2362_v44, %v2363_v56  ;;  %v6061_v21 = vld [vmem:[#allocation2 + $0x50] sm:$0xff]  ;;  %v6065_v20 = vsel %vm660_vm1, %v2470_v0, %v2472_v27  ;;  %v2475_v8 = vrot.slane %v6022_v43, 2  ;;  %v2717_v28 = vld [vmem:[#allocation8 + $0x358] sm:$0xff] }
 0x276   : > { %3433 = vmatprep.subr.mxu0 %v5892_v39  ;;  %2194 = vst [vmem:[#allocation2 + $0x79] sm:$0xff] %v2162_v52  ;;  %v2165_v42 = vmax.f32 %v2133_v47, 0.0  ;;  %v2132_v41 = vadd.f32 %v5971_v35, %v2093_v40  ;;  %v1978_v19 = vadd.f32 %v1977_v6, %v5878_v49  ;;  %v6075_v0 = vsel %vm547_vm0, %v2363_v56, %v2365_v14 }
 0x277   : > { %v2096_v3 = vmul.f32 %v5965_v53, %v1983_v31  ;;  %3434 = vmatpush1.msra.mxu0 %v2719_v11  ;;  %v4334_v15 = vpop.f32.mrf.mxu0  ;;  %v2368_v7 = vrot.slane %v6061_v21, 1  ;;  %v6086_v56 = vsel %vm660_vm1, %v2474_v57, %v2475_v8 }
 0x278   : > { %2834 = vmatmul.mubr.f32.gmra.mxu1 %v6000_v61  ;;  %3054 = vmatmul.mubr.f32.gmra.mxu0 %v6040_v59  ;;  %2197 = vst [vmem:[#allocation2 + $0x99] sm:$0xff] %v2165_v42  ;;  %v2164_v24 = vmax.f32 %v2132_v41, 0.0  ;;  %v2095_v49 = vmul.f32 %v5965_v53, %v1978_v19  ;;  %v1993_v63 = vadd.f32 %v4334_v15, %v5890_v36  ;;  %v6059_v61 = vld [vmem:[#allocation2 + $0x48] sm:$0xff]  ;;  %v6092_v42 = vld [vmem:[#allocation2 + $0x58] sm:$0x3]  ;;  %v2716_v19 = vld [vmem:[#allocation8 + $0x350] sm:$0xff] }
 0x279   : > { %v2135_v18 = vadd.f32 %v5971_v35, %v2096_v3  ;;  %2838 = vmatprep.mubr.f32.mxu1 %v6050_v34  ;;  %3058 = vmatprep.mubr.f32.mxu0 %v6022_v43  ;;  %v1987_v58 = vpop.f32.mrf.mxu0  ;;  %v2367_v51 = vrot.slane %v6059_v61, 1  ;;  %v2477_v3 = vrot.slane %v6046_v48, 2  ;;  %v2370_v48 = vrot.slane %v6092_v42, 1 }
 0x27a   : > { %3435 = vmatprep.subr.mxu0 %v5892_v39  ;;  %2196 = vst [vmem:[#allocation2 + $0x91] sm:$0xff] %v2164_v24  ;;  %v2134_v60 = vadd.f32 %v5971_v35, %v2095_v49  ;;  %v2098_v30 = vmul.f32 %v5965_v53, %v1993_v63  ;;  %v1988_v55 = vadd.f32 %v1987_v58, %v5886_v62  ;;  %v6107_v24 = vld [vmem:[#allocation2 + $0x68] sm:$0xff]  ;;  %v2479_v63 = vrot.slane %v6059_v61, 2 }
 0x27b   : > { %v2167_v36 = vmax.f32 %v2135_v18, 0.0  ;;  %3436 = vmatpush1.msra.mxu0 %v2718_v32  ;;  %v4337_v22 = vpop.f32.mrf.mxu0  ;;  %v6096_v41 = vsel %vm547_vm0, %v2367_v51, %v2368_v7  ;;  %v6111_v49 = vsel %vm660_vm1, %v2475_v8, %v2477_v3  ;;  %v2480_v58 = vrot.slane %v6061_v21, 2 }
 0x27c   : > { %2839 = vmatmul.mubr.f32.gmra.mxu1 %v6020_v50  ;;  %3059 = vmatmul.mubr.f32.gmra.mxu0 %v6065_v20  ;;  %v2166_v44 = vmax.f32 %v2134_v60, 0.0  ;;  %v2137_v11 = vadd.f32 %v5971_v35, %v2098_v30  ;;  %v2097_v62 = vmul.f32 %v5965_v53, %v1988_v55  ;;  %v2003_v52 = vadd.f32 %v4337_v22, %v5900_v13  ;;  %v2715_v22 = vld [vmem:[#allocation8 + $0x348] sm:$0xff] }
 0x27d   : > { %2199 = vst [vmem:[#allocation2 + $0xb1] sm:$0xff] %v2167_v36  ;;  %2843 = vmatprep.mubr.f32.mxu1 %v6075_v0  ;;  %3063 = vmatprep.mubr.f32.mxu0 %v6059_v61  ;;  %v1997_v50 = vpop.f32.mrf.mxu0  ;;  %v6121_v8 = vsel %vm547_vm0, %v2368_v7, %v2370_v48  ;;  %v2373_v55 = vrot.slane %v6107_v24, 1  ;;  %v6132_v7 = vsel %vm660_vm1, %v2479_v63, %v2480_v58 }
 0x27e   : > { %3437 = vmatprep.subr.mxu0 %v5892_v39  ;;  %2198 = vst [vmem:[#allocation2 + $0xa9] sm:$0xff] %v2166_v44  ;;  %v2169_v47 = vmax.f32 %v2137_v11, 0.0  ;;  %v2136_v40 = vadd.f32 %v5971_v35, %v2097_v62  ;;  %v2100_v31 = vmul.f32 %v5965_v53, %v2003_v52  ;;  %v1998_v6 = vadd.f32 %v1997_v50, %v5896_v45 }
 0x27f   : > { %3438 = vmatpush1.msra.mxu0 %v2717_v28  ;;  %v4340_v13 = vpop.f32.mrf.mxu0 }
 0x280   : > { %2844 = vmatmul.mubr.f32.gmra.mxu1 %v6022_v43  ;;  %3064 = vmatmul.mubr.f32.gmra.mxu0 %v6086_v56  ;;  %2201 = vst [vmem:[#allocation2 + $0xc9] sm:$0xff] %v2169_v47  ;;  %v2168_v15 = vmax.f32 %v2136_v40, 0.0  ;;  %v2139_v27 = vadd.f32 %v5971_v35, %v2100_v31  ;;  %v2099_v45 = vmul.f32 %v5965_v53, %v1998_v6  ;;  %v6105_v43 = vld [vmem:[#allocation2 + $0x60] sm:$0xff]  ;;  %v6138_v47 = vld [vmem:[#allocation2 + $0x70] sm:$0x3]  ;;  %v2482_v31 = vrot.slane %v6092_v42, 2 }
 0x281   : > { %v2013_v32 = vadd.f32 %v4340_v13, %v5910_v38  ;;  %2848 = vmatprep.mubr.f32.mxu1 %v6096_v41  ;;  %3068 = vmatprep.mubr.f32.mxu0 %v6061_v21  ;;  %v2007_v18 = vpop.f32.mrf.mxu0  ;;  %v2372_v30 = vrot.slane %v6105_v43, 1  ;;  %v2714_v6 = vld [vmem:[#allocation8 + $0x340] sm:$0xff]  ;;  %v2375_v42 = vrot.slane %v6138_v47, 1 }
 0x282   : > { %3439 = vmatprep.subr.mxu0 %v5892_v39  ;;  %2200 = vst [vmem:[#allocation2 + $0xc1] sm:$0xff] %v2168_v15  ;;  %v2171_v38 = vmax.f32 %v2139_v27, 0.0  ;;  %v2138_v14 = vadd.f32 %v5971_v35, %v2099_v45  ;;  %v2008_v36 = vadd.f32 %v2007_v18, %v5905_v4  ;;  %v6153_v15 = vld [vmem:[#allocation2 + $0x80] sm:$0xff]  ;;  %v6157_v45 = vsel %vm660_vm1, %v2480_v58, %v2482_v31 }
 0x283   : > { %v2102_v57 = vmul.f32 %v5965_v53, %v2013_v32  ;;  %3440 = vmatpush1.msra.mxu0 %v2716_v19  ;;  %v4343_v60 = vpop.f32.mrf.mxu0  ;;  %v6142_v40 = vsel %vm547_vm0, %v2372_v30, %v2373_v55  ;;  %v2484_v32 = vrot.slane %v6105_v43, 2  ;;  %v2485_v18 = vrot.slane %v6107_v24, 2  ;;  %v2712_v31 = vld [vmem:[#allocation8 + $0x330] sm:$0xff] }
 0x284   : > { %2849 = vmatmul.mubr.f32.gmra.mxu1 %v6059_v61  ;;  %3069 = vmatmul.mubr.f32.gmra.mxu0 %v6111_v49  ;;  %2203 = vst [vmem:[#allocation2 + $0xe1] sm:$0xff] %v2171_v38  ;;  %v2170_v51 = vmax.f32 %v2138_v14, 0.0  ;;  %v2101_v4 = vmul.f32 %v5965_v53, %v2008_v36  ;;  %v2023_v44 = vadd.f32 %v4343_v60, %v5918_v5  ;;  %v2378_v36 = vrot.slane %v6153_v15, 1  ;;  %v2713_v60 = vld [vmem:[#allocation8 + $0x338] sm:$0xff] }
 0x285   : > { %v2141_v28 = vadd.f32 %v5971_v35, %v2102_v57  ;;  %2853 = vmatprep.mubr.f32.mxu1 %v6121_v8  ;;  %3073 = vmatprep.mubr.f32.mxu0 %v6105_v43  ;;  %v2017_v61 = vpop.f32.mrf.mxu0  ;;  %v6167_v58 = vsel %vm547_vm0, %v2373_v55, %v2375_v42  ;;  %v2490_v42 = vrot.slane %v6153_v15, 2 }
 0x286   : > { %3441 = vmatprep.subr.mxu0 %v5892_v39  ;;  %2202 = vst [vmem:[#allocation2 + $0xd9] sm:$0xff] %v2170_v51  ;;  %v2140_v62 = vadd.f32 %v5971_v35, %v2101_v4  ;;  %v2104_v52 = vmul.f32 %v5965_v53, %v2023_v44  ;;  %v2018_v50 = vadd.f32 %v2017_v61, %v5914_v54 }
 0x287   : > { %v2173_v11 = vmax.f32 %v2141_v28, 0.0  ;;  %3442 = vmatpush1.msra.mxu0 %v2715_v22  ;;  %v4346_v5 = vpop.f32.mrf.mxu0  ;;  %v6178_v28 = vsel %vm660_vm1, %v2484_v32, %v2485_v18 }
 0x288   : > { %2854 = vmatmul.mubr.f32.gmra.mxu1 %v6061_v21  ;;  %3074 = vmatmul.mubr.f32.gmra.mxu0 %v6132_v7  ;;  %v2172_v13 = vmax.f32 %v2140_v62, 0.0  ;;  %v2143_v3 = vadd.f32 %v5971_v35, %v2104_v52  ;;  %v2103_v54 = vmul.f32 %v5965_v53, %v2018_v50  ;;  %v2033_v19 = vadd.f32 %v4346_v5, %v5926_v25  ;;  %v6151_v21 = vld [vmem:[#allocation2 + $0x78] sm:$0xff]  ;;  %v6184_v62 = vld [vmem:[#allocation2 + $0x88] sm:$0x3] }
 0x289   : > { %2205 = vst [vmem:[#allocation2 + $0xf9] sm:$0xff] %v2173_v11  ;;  %2858 = vmatprep.mubr.f32.mxu1 %v6142_v40  ;;  %3078 = vmatprep.mubr.f32.mxu0 %v6107_v24  ;;  %v2027_v27 = vpop.f32.mrf.mxu0  ;;  %v2377_v57 = vrot.slane %v6151_v21, 1  ;;  %v2487_v5 = vrot.slane %v6138_v47, 2  ;;  %v2380_v47 = vrot.slane %v6184_v62, 1 }
 0x28a   : > { %3443 = vmatprep.subr.mxu0 %v5892_v39  ;;  %2204 = vst [vmem:[#allocation2 + $0xf1] sm:$0xff] %v2172_v13  ;;  %v2175_v25 = vmax.f32 %v2143_v3, 0.0  ;;  %v2142_v48 = vadd.f32 %v5971_v35, %v2103_v54  ;;  %v2106_v63 = vmul.f32 %v5965_v53, %v2033_v19  ;;  %v2028_v38 = vadd.f32 %v2027_v27, %v5922_v26 }
 0x28b   : > { %3444 = vmatpush1.msra.mxu0 %v2714_v6  ;;  %v4349_v14 = vpop.f32.mrf.mxu0  ;;  %v6190_v50 = vsel %vm547_vm0, %v2377_v57, %v2378_v36  ;;  %v6205_v19 = vsel %vm660_vm1, %v2485_v18, %v2487_v5  ;;  %v2489_v27 = vrot.slane %v6151_v21, 2  ;;  %v6215_v18 = vsel %vm547_vm0, %v2378_v36, %v2380_v47  ;;  %v2711_v57 = vld [vmem:[#allocation8 + $0x328] sm:$0xff] }
 0x28c   : > { %2859 = vmatmul.mubr.f32.gmra.mxu1 %v6105_v43  ;;  %3079 = vmatmul.mubr.f32.gmra.mxu0 %v6157_v45  ;;  %2207 = vst [vmem:[#allocation2 + $0x111] sm:$0xff] %v2175_v25  ;;  %v2174_v30 = vmax.f32 %v2142_v48, 0.0  ;;  %v2145_v22 = vadd.f32 %v5971_v35, %v2106_v63  ;;  %v2105_v26 = vmul.f32 %v5965_v53, %v2028_v38 }
 0x28d   : > { %v2043_v51 = vadd.f32 %v4349_v14, %v5934_v1  ;;  %2863 = vmatprep.mubr.f32.mxu1 %v6167_v58  ;;  %3083 = vmatprep.mubr.f32.mxu0 %v6151_v21  ;;  %v2037_v55 = vpop.f32.mrf.mxu0  ;;  %v1623_v1 = vadd.f32 %v5957_v37, %v5807_v16  ;;  %v6199_v16 = vld [vmem:[#allocation2 + $0x90] sm:$0xff]  ;;  %v6201_v37 = vld [vmem:[#allocation2 + $0x98] sm:$0xff] }
 0x28e   : > { %3445 = vmatprep.subr.mxu0 %v5892_v39  ;;  %2206 = vst [vmem:[#allocation2 + $0x109] sm:$0xff] %v2174_v30  ;;  %v2177_v4 = vmax.f32 %v2145_v22, 0.0  ;;  %v2144_v44 = vadd.f32 %v5971_v35, %v2105_v26  ;;  %v2038_v11 = vadd.f32 %v2037_v55, %v5930_v17  ;;  %v2382_v38 = vrot.slane %v6199_v16, 1 }
 0x28f   : > { %v2108_v61 = vmul.f32 %v5965_v53, %v2043_v51  ;;  %3446 = vmatpush1.msra.mxu0 %v2713_v60  ;;  %v4352_v52 = vpop.f32.mrf.mxu0  ;;  %v2383_v14 = vrot.slane %v6201_v37, 1  ;;  %v1848_v36 = vadd.f32 %v5959_v12, %v1623_v1  ;;  %v6227_v51 = vsel %vm660_vm1, %v2489_v27, %v2490_v42 }
 0x290   : > { %2864 = vmatmul.mubr.f32.gmra.mxu1 %v6107_v24  ;;  %3084 = vmatmul.mubr.f32.gmra.mxu0 %v6178_v28  ;;  %2209 = vst [vmem:[#allocation2 + $0x129] sm:$0xff] %v2177_v4  ;;  %v2176_v6 = vmax.f32 %v2144_v44, 0.0  ;;  %v2107_v13 = vmul.f32 %v5965_v53, %v2038_v11  ;;  %v2053_v3 = vadd.f32 %v4352_v52, %v5942_v46  ;;  %v2492_v1 = vrot.slane %v6184_v62, 2  ;;  %v2710_v52 = vld [vmem:[#allocation8 + $0x320] sm:$0xff] }
 0x291   : > { %v2147_v17 = vadd.f32 %v5971_v35, %v2108_v61  ;;  %2868 = vmatprep.mubr.f32.mxu1 %v6190_v50  ;;  %3088 = vmatprep.mubr.f32.mxu0 %v6153_v15  ;;  %v2047_v54 = vpop.f32.mrf.mxu0  ;;  %v6233_v61 = vld [vmem:[#allocation2 + $0xa0] sm:$0x3]  ;;  %v6237_v11 = vsel %vm547_vm0, %v2382_v38, %v2383_v14  ;;  %v2494_v47 = vrot.slane %v6199_v16, 2  ;;  %v2495_v27 = vrot.slane %v6201_v37, 2  ;;  %v2709_v38 = vld [vmem:[#allocation8 + $0x318] sm:$0xff] }
 0x292   : > { %3447 = vmatprep.subr.mxu0 %v5892_v39  ;;  %2208 = vst [vmem:[#allocation2 + $0x121] sm:$0xff] %v2176_v6  ;;  %v2146_v32 = vadd.f32 %v5971_v35, %v2107_v13  ;;  %v2110_v25 = vmul.f32 %v5965_v53, %v2053_v3  ;;  %v2048_v48 = vadd.f32 %v2047_v54, %v5938_v29  ;;  %v6247_v13 = vld [vmem:[#allocation2 + $0xb0] sm:$0xff]  ;;  %v2385_v54 = vrot.slane %v6233_v61, 1 }
 0x293   : > { %v2179_v46 = vmax.f32 %v2147_v17, 0.0  ;;  %3448 = vmatpush1.msra.mxu0 %v2712_v31  ;;  %v4355_v63 = vpop.f32.mrf.mxu0  ;;  %v6245_v17 = vld [vmem:[#allocation2 + $0xa8] sm:$0xff]  ;;  %v6251_v62 = vsel %vm660_vm1, %v2490_v42, %v2492_v1 }
 0x294   : > { %2869 = vmatmul.mubr.f32.gmra.mxu1 %v6151_v21  ;;  %3089 = vmatmul.mubr.f32.gmra.mxu0 %v6205_v19  ;;  %v2178_v60 = vmax.f32 %v2146_v32, 0.0  ;;  %v2149_v30 = vadd.f32 %v5971_v35, %v2110_v25  ;;  %v2109_v29 = vmul.f32 %v5965_v53, %v2048_v48  ;;  %v2063_v22 = vadd.f32 %v4355_v63, %v5950_v10 }
 0x295   : > { %2211 = vst [vmem:[#allocation2 + $0x141] sm:$0xff] %v2179_v46  ;;  %2873 = vmatprep.mubr.f32.mxu1 %v6215_v18  ;;  %3093 = vmatprep.mubr.f32.mxu0 %v6199_v16  ;;  %v2057_v26 = vpop.f32.mrf.mxu0  ;;  %v6261_v42 = vsel %vm547_vm0, %v2383_v14, %v2385_v54  ;;  %v2387_v63 = vrot.slane %v6245_v17, 1  ;;  %v2499_v1 = vrot.slane %v6245_v17, 2 }
 0x296   : > { %3449 = vmatprep.subr.mxu0 %v5892_v39  ;;  %2210 = vst [vmem:[#allocation2 + $0x139] sm:$0xff] %v2178_v60  ;;  %v2181_v55 = vmax.f32 %v2149_v30, 0.0  ;;  %v2148_v4 = vadd.f32 %v5971_v35, %v2109_v29  ;;  %v2112_v44 = vmul.f32 %v5965_v53, %v2063_v22  ;;  %v2058_v10 = vadd.f32 %v2057_v26, %v5946_v2  ;;  %v2708_v26 = vld [vmem:[#allocation8 + $0x310] sm:$0xff] }
 0x297   : > { %3450 = vmatpush1.msra.mxu0 %v2711_v57  ;;  %v4358_v12 = vpop.f32.mrf.mxu0  ;;  %v6275_v22 = vsel %vm660_vm1, %v2494_v47, %v2495_v27  ;;  %v2706_v47 = vld [vmem:[#allocation8 + $0x300] sm:$0xff] }
 0x298   : > { %2874 = vmatmul.mubr.f32.gmra.mxu1 %v6153_v15  ;;  %3094 = vmatmul.mubr.f32.gmra.mxu0 %v6227_v51  ;;  %2213 = vst [vmem:[#allocation2 + $0x159] sm:$0xff] %v2181_v55  ;;  %v2180_v5 = vmax.f32 %v2148_v4, 0.0  ;;  %v2151_v31 = vadd.f32 %v5971_v35, %v2112_v44  ;;  %v2111_v2 = vmul.f32 %v5965_v53, %v2058_v10  ;;  %v6285_v4 = vld [vmem:[#allocation2 + $0xc0] sm:$0xff]  ;;  %v6287_v44 = vld [vmem:[#allocation2 + $0xc8] sm:$0xff] }
 0x299   : > { %v2073_v6 = vadd.f32 %v4358_v12, %v1848_v36  ;;  %2878 = vmatprep.mubr.f32.mxu1 %v6237_v11  ;;  %3098 = vmatprep.mubr.f32.mxu0 %v6201_v37  ;;  %v2067_v3 = vpop.f32.mrf.mxu0  ;;  %v2273_v36 = vld [vmem:[#allocation2 + $0xb8] sm:$0x3] }
 0x29a   : > { %3451 = vmatprep.subr.mxu0 %v5892_v39  ;;  %2212 = vst [vmem:[#allocation2 + $0x151] sm:$0xff] %v2180_v5  ;;  %v2183_v46 = vmax.f32 %v2151_v31, 0.0  ;;  %v2150_v32 = vadd.f32 %v5971_v35, %v2111_v2  ;;  %v2068_v48 = vadd.f32 %v2067_v3, %v5954_v33  ;;  %v2388_v39 = vrot.slane %v6247_v13, 1  ;;  %v6270_v33 = vld [vmem:[#allocation2] sm:$0xff]  ;;  %v2707_v2 = vld [vmem:[#allocation8 + $0x308] sm:$0xff] }
 0x29b   : > { %v2114_v25 = vmul.f32 %v5965_v53, %v2073_v6  ;;  %3452 = vmatpush1.msra.mxu0 %v2710_v52  ;;  %v2390_v10 = vrot.slane %v2273_v36, 1  ;;  %v2500_v52 = vrot.slane %v6247_v13, 2  ;;  %v2392_v5 = vrot.slane %v6285_v4, 1  ;;  %v2276_v3 = vld [vmem:[#allocation2 + $0xd0] sm:$0x3] }
 0x29c   : > { %2879 = vmatmul.mubr.f32.gmra.mxu1 %v6199_v16  ;;  %3099 = vmatmul.mubr.f32.gmra.mxu0 %v6251_v62  ;;  %2215 = vst [vmem:[#allocation2 + $0x171] sm:$0xff] %v2183_v46  ;;  %v2182_v57 = vmax.f32 %v2150_v32, 0.0  ;;  %v2113_v30 = vmul.f32 %v5965_v53, %v2068_v48  ;;  %v6279_v53 = vsel %vm547_vm0, %v2387_v63, %v2388_v39  ;;  %v2393_v31 = vrot.slane %v6287_v44, 1  ;;  %v6315_v46 = vld [vmem:[#allocation2 + $0xd8] sm:$0xff]  ;;  %v6317_v32 = vld [vmem:[#allocation2 + $0xe0] sm:$0xff] }
 0x29d   : > { %v2153_v60 = vadd.f32 %v5971_v35, %v2114_v25  ;;  %2883 = vmatprep.mubr.f32.mxu1 %v6261_v42  ;;  %3103 = vmatprep.mubr.f32.mxu0 %v6245_v17  ;;  %v6306_v6 = vsel %vm660_vm1, %v2499_v1, %v2500_v52  ;;  %7320 = vst [vmem:[#allocation16_spill] sm:$0xff] %v6317_v32  ;;  %v2395_v25 = vrot.slane %v2276_v3, 1  ;;  %v2504_v63 = vrot.slane %v6285_v4, 2 }
 0x29e   : > { %3453 = vmatprep.subr.mxu0 %v6270_v33  ;;  %2214 = vst [vmem:[#allocation2 + $0x169] sm:$0xff] %v2182_v57  ;;  %v2152_v29 = vadd.f32 %v5971_v35, %v2113_v30  ;;  %v2497_v35 = vrot.slane %v6233_v61, 2  ;;  %v6297_v61 = vsel %vm547_vm0, %v2388_v39, %v2390_v10  ;;  %v6310_v54 = vsel %vm547_vm0, %v2392_v5, %v2393_v31  ;;  %v2736_v10 = vld [vmem:[#allocation8 + $0x3f0] sm:$0xff]  ;;  %v6351_v5 = vld [vmem:[#allocation2 + $0xf8] sm:$0xff] }
 0x29f   : > { %v2185_v14 = vmax.f32 %v2153_v60, 0.0  ;;  %3454 = vmatpush1.msra.mxu0 %v2709_v38  ;;  %v2505_v39 = vrot.slane %v6287_v44, 2  ;;  %v6329_v57 = vsel %vm547_vm0, %v2393_v31, %v2395_v25  ;;  %v2397_v60 = vrot.slane %v6315_v46, 1  ;;  %7324 = vst [vmem:[#allocation19_spill] sm:$0xff] %v6351_v5 }
 0x2a0   : > { %2884 = vmatmul.mubr.f32.gmra.mxu1 %v6201_v37  ;;  %3104 = vmatmul.mubr.f32.gmra.mxu0 %v6275_v22  ;;  %v2184_v55 = vmax.f32 %v2152_v29, 0.0  ;;  %v6291_v12 = vsel %vm660_vm1, %v2495_v27, %v2497_v35  ;;  %v2502_v27 = vrot.slane %v2273_v36, 2  ;;  %v2398_v30 = vrot.slane %v6317_v32, 1 }
 0x2a1   : > { %2217 = vst [vmem:[#allocation2 + $0x189] sm:$0xff] %v2185_v14  ;;  %2888 = vmatprep.mubr.f32.mxu1 %v6279_v53  ;;  %3108 = vmatprep.mubr.f32.mxu0 %v6247_v13  ;;  %v2737_v14 = vld [vmem:[#allocation8 + $0x3f8] sm:$0xff]  ;;  %v6338_v36 = vsel %vm660_vm1, %v2504_v63, %v2505_v39  ;;  %v2507_v1 = vrot.slane %v2276_v3, 2  ;;  %v2510_v25 = vrot.slane %v6317_v32, 2 }
 0x2a2   : > { %3455 = vmatprep.subr.mxu0 %v6270_v33  ;;  %2216 = vst [vmem:[#allocation2 + $0x181] sm:$0xff] %v2184_v55  ;;  %v6321_v48 = vsel %vm660_vm1, %v2500_v52, %v2502_v27  ;;  %v6344_v35 = vsel %vm547_vm0, %v2397_v60, %v2398_v30  ;;  %v6349_v52 = vld [vmem:[#allocation2 + $0xf0] sm:$0xff]  ;;  %v2509_v27 = vrot.slane %v6315_v46, 2  ;;  %v2403_v60 = vrot.slane %v6351_v5, 1 }
 0x2a3   : > { %3456 = vmatpush1.msra.mxu0 %v2708_v26  ;;  %v2279_v26 = vld [vmem:[#allocation2 + $0xe8] sm:$0x3]  ;;  %7323 = vst [vmem:[#allocation20_spill] sm:$0xff] %v6349_v52  ;;  %v2402_v63 = vrot.slane %v6349_v52, 1 }
 0x2a4   : > { %2889 = vmatmul.mubr.f32.gmra.mxu1 %v6245_v17  ;;  %3109 = vmatmul.mubr.f32.gmra.mxu0 %v6291_v12 }
 0x2a5   : > { %2893 = vmatprep.mubr.f32.mxu1 %v6297_v61  ;;  %3113 = vmatprep.mubr.f32.mxu0 %v6285_v4 }
 0x2a6   : > { %3457 = vmatprep.subr.mxu0 %v6270_v33  ;;  %v6325_v38 = vpop.f32.mrf.mxu1 }
 0x2a7   : > { %3458 = vmatpush1.msra.mxu0 %v2707_v2  ;;  %7321 = vst [vmem:[#allocation15_spill] sm:$0xff] %v6325_v38  ;;  %v2400_v2 = vrot.slane %v2279_v26, 1 }
 0x2a8   : > { %2894 = vmatmul.mubr.f32.gmra.mxu1 %v6247_v13  ;;  %3114 = vmatmul.mubr.f32.gmra.mxu0 %v6306_v6  ;;  %v2822_v29 = vpop.f32.mrf.mxu1 }
 0x2a9   : > { %2898 = vmatprep.mubr.f32.mxu1 %v6310_v54  ;;  %3118 = vmatprep.mubr.f32.mxu0 %v6287_v44  ;;  %v6361_v3 = vsel %vm547_vm0, %v2398_v30, %v2400_v2  ;;  %v2282_v29 = vld [vmem:[#allocation2 + $0x100] sm:$0x3]  ;;  %v6374_v30 = vsel %vm547_vm0, %v2402_v63, %v2403_v60  ;;  %v6381_v2 = vld [vmem:[#allocation2 + $0x110] sm:$0xff]  ;;  %v2514_v63 = vrot.slane %v6349_v52, 2 }
 0x2aa   : > { %3459 = vmatprep.subr.mxu0 %v6270_v33  ;;  %v6340_v55 = vpop.f32.mrf.mxu1  ;;  %7325 = vst [vmem:[#allocation14_spill] sm:$0xff] %v6374_v30  ;;  %7327 = vst [vmem:[#allocation21_spill] sm:$0xff] %v6381_v2 }
 0x2ab   : > { %3460 = vmatpush1.msra.mxu0 %v2706_v47  ;;  %7322 = vst [vmem:[#allocation13_spill] sm:$0xff] %v6340_v55  ;;  %v6355_v47 = vsel %vm660_vm1, %v2505_v39, %v2507_v1  ;;  %v6370_v39 = vsel %vm660_vm1, %v2509_v27, %v2510_v25  ;;  %v2512_v1 = vrot.slane %v2279_v26, 2  ;;  %v2405_v27 = vrot.slane %v2282_v29, 1 }
 0x2ac   : > { %2899 = vmatmul.mubr.f32.gmra.mxu1 %v6285_v4  ;;  %3119 = vmatmul.mubr.f32.gmra.mxu0 %v6321_v48  ;;  %v2827_v31 = vpop.f32.mrf.mxu1  ;;  %v2515_v55 = vrot.slane %v6351_v5, 2 }
 0x2ad   : > { %2903 = vmatprep.mubr.f32.mxu1 %v6329_v57  ;;  %3123 = vmatprep.mubr.f32.mxu0 %v6315_v46  ;;  %v6379_v31 = vld [vmem:[#allocation2 + $0x108] sm:$0xff]  ;;  %v6391_v38 = vsel %vm547_vm0, %v2403_v60, %v2405_v27  ;;  %v2517_v27 = vrot.slane %v2282_v29, 2 }
 0x2ae   : > { %3461 = vmatprep.subr.mxu0 %v6270_v33  ;;  %7326 = vst [vmem:[#allocation22_spill] sm:$0xff] %v6379_v31  ;;  %7329 = vst [vmem:[#allocation26_spill] sm:$0xff] %v6391_v38  ;;  %v2407_v26 = vrot.slane %v6379_v31, 1 }
 0x2af   : > { %3462 = vmatpush2.msra.mxu0 %v2737_v14  ;;  %v2735_v14 = vld [vmem:[#allocation8 + $0x3e8] sm:$0xff] }
 0x2b0   : > { %2904 = vmatmul.mubr.f32.gmra.mxu1 %v6287_v44  ;;  %3124 = vmatmul.mubr.f32.gmra.mxu0 %v6338_v36 }
 0x2b1   : > { %2908 = vmatprep.mubr.f32.mxu1 %v6344_v35  ;;  %3128 = vmatprep.mubr.f32.mxu0 %v6317_v32 }
 0x2b2   : > { %3463 = vmatprep.subr.mxu0 %v6270_v33 }
 0x2b3   : > { %3464 = vmatpush2.msra.mxu0 %v2736_v10  ;;  %v2734_v10 = vld [vmem:[#allocation8 + $0x3e0] sm:$0xff] }
 0x2b4   : > { %2909 = vmatmul.mubr.f32.gmra.mxu1 %v6315_v46  ;;  %3129 = vmatmul.mubr.f32.gmra.mxu0 %v6355_v47 }
 0x2b5   : > { %2913 = vmatprep.mubr.f32.mxu1 %v6361_v3  ;;  %3133 = vmatprep.mubr.f32.mxu0 %v6349_v52 }
 0x2b6   : > { %3465 = vmatprep.subr.mxu0 %v6270_v33 }
 0x2b7   : > { %3466 = vmatpush2.msra.mxu0 %v2735_v14  ;;  %v6385_v14 = vsel %vm660_vm1, %v2510_v25, %v2512_v1  ;;  %v6400_v25 = vsel %vm660_vm1, %v2514_v63, %v2515_v55  ;;  %v2732_v1 = vld [vmem:[#allocation8 + $0x3d0] sm:$0xff] }
 0x2b8   : > { %2914 = vmatmul.mubr.f32.gmra.mxu1 %v6317_v32  ;;  %3134 = vmatmul.mubr.f32.gmra.mxu0 %v6370_v39  ;;  %7328 = vst [vmem:[#allocation17_spill] sm:$0xff] %v6385_v14  ;;  %v2733_v32 = vld [vmem:[#allocation8 + $0x3d8] sm:$0xff]  ;;  %7330 = vst [vmem:[#allocation25_spill] sm:$0xff] %v6400_v25 }
 0x2b9   : > { %2918 = vmatprep.mubr.f32.mxu1 %v6374_v30  ;;  %3138 = vmatprep.mubr.f32.mxu0 %v6351_v5  ;;  %v2408_v30 = vrot.slane %v6381_v2, 1 }
 0x2ba   : > { %3467 = vmatprep.subr.mxu0 %v6270_v33 }
 0x2bb   : > { %3468 = vmatpush2.msra.mxu0 %v2734_v10  ;;  %v2285_v10 = vld [vmem:[#allocation2 + $0x118] sm:$0x3]  ;;  %v6404_v60 = vsel %vm547_vm0, %v2407_v26, %v2408_v30  ;;  %v2519_v26 = vrot.slane %v6379_v31, 2 }
 0x2bc   : > { %2919 = vmatmul.mubr.f32.gmra.mxu1 %v6349_v52  ;;  %3139 = vmatmul.mubr.f32.gmra.mxu0 %v6385_v14  ;;  %7331 = vst [vmem:[#allocation18_spill] sm:$0xff] %v6404_v60  ;;  %v6411_v52 = vld [vmem:[#allocation2 + $0x128] sm:$0xff]  ;;  %v2410_v63 = vrot.slane %v2285_v10, 1  ;;  %v2731_v14 = vld [vmem:[#allocation8 + $0x3c8] sm:$0xff] }
 0x2bd   : > { %2923 = vmatprep.mubr.f32.mxu1 %v6391_v38  ;;  %3143 = vmatprep.mubr.f32.mxu0 %v6379_v31  ;;  %v6409_v38 = vld [vmem:[#allocation2 + $0x120] sm:$0xff]  ;;  %7333 = vst [vmem:[#allocation27_spill] sm:$0xff] %v6411_v52 }
 0x2be   : > { %3469 = vmatprep.subr.mxu0 %v6270_v33  ;;  %7332 = vst [vmem:[#allocation28_spill] sm:$0xff] %v6409_v38  ;;  %v2412_v29 = vrot.slane %v6409_v38, 1 }
 0x2bf   : > { %3470 = vmatpush2.msra.mxu0 %v2733_v32  ;;  %v6415_v32 = vsel %vm660_vm1, %v2515_v55, %v2517_v27  ;;  %v2730_v27 = vld [vmem:[#allocation8 + $0x3c0] sm:$0xff] }
 0x2c0   : > { %2924 = vmatmul.mubr.f32.gmra.mxu1 %v6351_v5  ;;  %3144 = vmatmul.mubr.f32.gmra.mxu0 %v6400_v25  ;;  %7334 = vst [vmem:[#allocation23_spill] sm:$0xff] %v6415_v32  ;;  %v2520_v5 = vrot.slane %v6381_v2, 2  ;;  %v2413_v25 = vrot.slane %v6411_v52, 1 }
 0x2c1   : > { %2928 = vmatprep.mubr.f32.mxu1 %v6404_v60  ;;  %3148 = vmatprep.mubr.f32.mxu0 %v6381_v2  ;;  %v6421_v60 = vsel %vm547_vm0, %v2408_v30, %v2410_v63  ;;  %v2522_v63 = vrot.slane %v2285_v10, 2 }
 0x2c2   : > { %3471 = vmatprep.subr.mxu0 %v6270_v33  ;;  %7335 = vst [vmem:[#allocation32_spill] sm:$0xff] %v6421_v60  ;;  %v6430_v55 = vsel %vm660_vm1, %v2519_v26, %v2520_v5  ;;  %v6434_v30 = vsel %vm547_vm0, %v2412_v29, %v2413_v25  ;;  %v2524_v29 = vrot.slane %v6409_v38, 2 }
 0x2c3   : > { %3472 = vmatpush2.msra.mxu0 %v2732_v1  ;;  %7336 = vst [vmem:[#allocation31_spill] sm:$0xff] %v6430_v55  ;;  %v2288_v1 = vld [vmem:[#allocation2 + $0x130] sm:$0x3]  ;;  %7337 = vst [vmem:[#allocation24_spill] sm:$0xff] %v6434_v30 }
 0x2c4   : > { %2929 = vmatmul.mubr.f32.gmra.mxu1 %v6379_v31  ;;  %3149 = vmatmul.mubr.f32.gmra.mxu0 %v6415_v32  ;;  %v6441_v31 = vld [vmem:[#allocation2 + $0x140] sm:$0xff]  ;;  %v2415_v26 = vrot.slane %v2288_v1, 1  ;;  %v2729_v32 = vld [vmem:[#allocation8 + $0x3b8] sm:$0xff] }
 0x2c5   : > { %2933 = vmatprep.mubr.f32.mxu1 %v6421_v60  ;;  %3153 = vmatprep.mubr.f32.mxu0 %v6409_v38  ;;  %v6439_v60 = vld [vmem:[#allocation2 + $0x138] sm:$0xff]  ;;  %7339 = vst [vmem:[#allocation33_spill] sm:$0xff] %v6441_v31 }
 0x2c6   : > { %3473 = vmatprep.subr.mxu0 %v6270_v33  ;;  %7338 = vst [vmem:[#allocation34_spill] sm:$0xff] %v6439_v60  ;;  %v2417_v10 = vrot.slane %v6439_v60, 1 }
 0x2c7   : > { %3474 = vmatpush2.msra.mxu0 %v2731_v14  ;;  %v6445_v14 = vsel %vm660_vm1, %v2520_v5, %v2522_v63  ;;  %v2728_v63 = vld [vmem:[#allocation8 + $0x3b0] sm:$0xff] }
 0x2c8   : > { %2934 = vmatmul.mubr.f32.gmra.mxu1 %v6381_v2  ;;  %3154 = vmatmul.mubr.f32.gmra.mxu0 %v6430_v55  ;;  %7340 = vst [vmem:[#allocation29_spill] sm:$0xff] %v6445_v14  ;;  %v2525_v2 = vrot.slane %v6411_v52, 2  ;;  %v2418_v55 = vrot.slane %v6441_v31, 1 }
 0x2c9   : > { %2938 = vmatprep.mubr.f32.mxu1 %v6434_v30  ;;  %3158 = vmatprep.mubr.f32.mxu0 %v6411_v52  ;;  %v6451_v30 = vsel %vm547_vm0, %v2413_v25, %v2415_v26  ;;  %v2527_v26 = vrot.slane %v2288_v1, 2 }
 0x2ca   : > { %3475 = vmatprep.subr.mxu0 %v6270_v33  ;;  %7341 = vst [vmem:[#allocation38_spill] sm:$0xff] %v6451_v30  ;;  %v6460_v5 = vsel %vm660_vm1, %v2524_v29, %v2525_v2  ;;  %v6464_v25 = vsel %vm547_vm0, %v2417_v10, %v2418_v55  ;;  %v2529_v10 = vrot.slane %v6439_v60, 2 }
 0x2cb   : > { %3476 = vmatpush2.msra.mxu0 %v2730_v27  ;;  %7342 = vst [vmem:[#allocation37_spill] sm:$0xff] %v6460_v5  ;;  %v2291_v27 = vld [vmem:[#allocation2 + $0x148] sm:$0x3]  ;;  %7343 = vst [vmem:[#allocation30_spill] sm:$0xff] %v6464_v25 }
 0x2cc   : > { %2939 = vmatmul.mubr.f32.gmra.mxu1 %v6409_v38  ;;  %3159 = vmatmul.mubr.f32.gmra.mxu0 %v6445_v14  ;;  %v6471_v38 = vld [vmem:[#allocation2 + $0x158] sm:$0xff]  ;;  %v2420_v29 = vrot.slane %v2291_v27, 1 }
 0x2cd   : > { %2943 = vmatprep.mubr.f32.mxu1 %v6451_v30  ;;  %3163 = vmatprep.mubr.f32.mxu0 %v6439_v60  ;;  %v6469_v30 = vld [vmem:[#allocation2 + $0x150] sm:$0xff]  ;;  %7344 = vst [vmem:[#allocation40_spill] sm:$0xff] %v6471_v38  ;;  %v2727_v14 = vld [vmem:[#allocation8 + $0x3a8] sm:$0xff] }
 0x2ce   : > { %3477 = vmatprep.subr.mxu0 %v6270_v33  ;;  %v2422_v1 = vrot.slane %v6469_v30, 1 }
 0x2cf   : > { %3478 = vmatpush2.msra.mxu0 %v2729_v32  ;;  %v6475_v32 = vsel %vm660_vm1, %v2525_v2, %v2527_v26  ;;  %v2726_v26 = vld [vmem:[#allocation8 + $0x3a0] sm:$0xff] }
 0x2d0   : > { %2944 = vmatmul.mubr.f32.gmra.mxu1 %v6411_v52  ;;  %3164 = vmatmul.mubr.f32.gmra.mxu0 %v6460_v5  ;;  %7345 = vst [vmem:[#allocation39_spill] sm:$0xff] %v6475_v32  ;;  %v2530_v52 = vrot.slane %v6441_v31, 2  ;;  %v2423_v5 = vrot.slane %v6471_v38, 1 }
 0x2d1   : > { %2948 = vmatprep.mubr.f32.mxu1 %v6464_v25  ;;  %3168 = vmatprep.mubr.f32.mxu0 %v6441_v31  ;;  %v6481_v25 = vsel %vm547_vm0, %v2418_v55, %v2420_v29  ;;  %v2532_v29 = vrot.slane %v2291_v27, 2 }
 0x2d2   : > { %3479 = vmatprep.subr.mxu0 %v6270_v33  ;;  %7346 = vst [vmem:[#allocation35_spill] sm:$0xff] %v6481_v25  ;;  %v6490_v2 = vsel %vm660_vm1, %v2529_v10, %v2530_v52  ;;  %v6494_v55 = vsel %vm547_vm0, %v2422_v1, %v2423_v5  ;;  %v2534_v1 = vrot.slane %v6469_v30, 2 }
 0x2d3   : > { %3480 = vmatpush2.msra.mxu0 %v2728_v63  ;;  %7347 = vst [vmem:[#allocation44_spill] sm:$0xff] %v6490_v2  ;;  %v2294_v63 = vld [vmem:[#allocation2 + $0x160] sm:$0x3]  ;;  %7348 = vst [vmem:[#allocation43_spill] sm:$0xff] %v6494_v55 }
 0x2d4   : > { %2949 = vmatmul.mubr.f32.gmra.mxu1 %v6439_v60  ;;  %3169 = vmatmul.mubr.f32.gmra.mxu0 %v6475_v32  ;;  %v6501_v60 = vld [vmem:[#allocation2 + $0x170] sm:$0xff]  ;;  %v2425_v10 = vrot.slane %v2294_v63, 1  ;;  %v2725_v32 = vld [vmem:[#allocation8 + $0x398] sm:$0xff] }
 0x2d5   : > { %2953 = vmatprep.mubr.f32.mxu1 %v6481_v25  ;;  %3173 = vmatprep.mubr.f32.mxu0 %v6469_v30  ;;  %v6499_v25 = vld [vmem:[#allocation2 + $0x168] sm:$0xff] }
 0x2d6   : > { %3481 = vmatprep.subr.mxu0 %v6270_v33  ;;  %v2427_v27 = vrot.slane %v6499_v25, 1 }
 0x2d7   : > { %3482 = vmatpush2.msra.mxu0 %v2727_v14  ;;  %v6505_v14 = vsel %vm660_vm1, %v2530_v52, %v2532_v29  ;;  %v2724_v29 = vld [vmem:[#allocation8 + $0x390] sm:$0xff] }
 0x2d8   : > { %2954 = vmatmul.mubr.f32.gmra.mxu1 %v6441_v31  ;;  %3174 = vmatmul.mubr.f32.gmra.mxu0 %v6490_v2  ;;  %v2535_v31 = vrot.slane %v6471_v38, 2  ;;  %v2428_v2 = vrot.slane %v6501_v60, 1 }
 0x2d9   : > { %2958 = vmatprep.mubr.f32.mxu1 %v6494_v55  ;;  %3178 = vmatprep.mubr.f32.mxu0 %v6471_v38  ;;  %v6511_v55 = vsel %vm547_vm0, %v2423_v5, %v2425_v10  ;;  %v2537_v10 = vrot.slane %v2294_v63, 2  ;;  %v2723_v63 = vld [vmem:[#allocation8 + $0x388] sm:$0xff] }
 0x2da   : > { %3483 = vmatprep.subr.mxu0 %v6270_v33  ;;  %7349 = vst [vmem:[#allocation36_spill] sm:$0xff] %v6511_v55  ;;  %v6520_v52 = vsel %vm660_vm1, %v2534_v1, %v2535_v31  ;;  %v6524_v5 = vsel %vm547_vm0, %v2427_v27, %v2428_v2 }
 0x2db   : > { %3484 = vmatpush2.msra.mxu0 %v2726_v26  ;;  %v2297_v26 = vld [vmem:[#allocation2 + $0x178] sm:$0x3]  ;;  %7350 = vst [vmem:[#allocation45_spill] sm:$0xff] %v6524_v5  ;;  %v6531_v1 = vsel %vm660_vm1, %v2535_v31, %v2537_v10 }
 0x2dc   : > { %2959 = vmatmul.mubr.f32.gmra.mxu1 %v6469_v30  ;;  %3179 = vmatmul.mubr.f32.gmra.mxu0 %v6505_v14 }
 0x2dd   : > { %2963 = vmatprep.mubr.f32.mxu1 %v6511_v55  ;;  %3183 = vmatprep.mubr.f32.mxu0 %v6499_v25  ;;  %v2430_v55 = vrot.slane %v2297_v26, 1 }
 0x2de   : > { %3485 = vmatprep.subr.mxu0 %v6270_v33 }
 0x2df   : > { %3486 = vmatpush2.msra.mxu0 %v2725_v32  ;;  %v2539_v32 = vrot.slane %v6499_v25, 2  ;;  %v6537_v27 = vsel %vm547_vm0, %v2428_v2, %v2430_v55  ;;  %v6550_v2 = vld [vmem:[#allocation2 + $0x188] sm:$0xff]  ;;  %v2722_v55 = vld [vmem:[#allocation8 + $0x380] sm:$0xff] }
 0x2e0   : > { %2964 = vmatmul.mubr.f32.gmra.mxu1 %v6471_v38  ;;  %3184 = vmatmul.mubr.f32.gmra.mxu0 %v6520_v52  ;;  %v2540_v38 = vrot.slane %v6501_v60, 2 }
 0x2e1   : > { %2968 = vmatprep.mubr.f32.mxu1 %v6524_v5  ;;  %3188 = vmatprep.mubr.f32.mxu0 %v6501_v60  ;;  %v6540_v5 = vld [vmem:[#allocation2 + $0x180] sm:$0xff] }
 0x2e2   : > { %3487 = vmatprep.subr.mxu0 %v6270_v33  ;;  %v6546_v31 = vsel %vm660_vm1, %v2539_v32, %v2540_v38  ;;  %v2752_v32 = vld [vmem:[#allocation8 + $0x470] sm:$0xff] }
 0x2e3   : > { %3488 = vmatpush2.msra.mxu0 %v2724_v29  ;;  %v2542_v29 = vrot.slane %v2297_v26, 2  ;;  %v4517_v26 = vld [vmem:[#allocation2 + $0x30] sm:$0xff] }
 0x2e4   : > { %2969 = vmatmul.mubr.f32.gmra.mxu1 %v6499_v25  ;;  %3189 = vmatmul.mubr.f32.gmra.mxu0 %v6531_v1 }
 0x2e5   : > { %2973 = vmatprep.mubr.f32.mxu1 %v6537_v27  ;;  %3193 = vmatprep.mubr.f32.mxu0 %v6540_v5  ;;  %v6556_v10 = vsel %vm660_vm1, %v2540_v38, %v2542_v29  ;;  %v4519_v38 = vld [vmem:[#allocation2 + $0x48] sm:$0xff] }
 0x2e6   : > { %3489 = vmatprep.subr.mxu0 %v6270_v33 }
 0x2e7   : > { %3490 = vmatpush2.msra.mxu0 %v2723_v63  ;;  %v4516_v63 = vld [vmem:[#allocation8 + $0x478] sm:$0xff] }
 0x2e8   : > { %2974 = vmatmul.mubr.f32.gmra.mxu1 %v6501_v60  ;;  %3194 = vmatmul.mubr.f32.gmra.mxu0 %v6546_v31 }
 0x2e9   : > { %3268 = vmatprep.mubr.f32.mxu1 %v6040_v59  ;;  %3198 = vmatprep.mubr.f32.mxu0 %v6550_v2  ;;  %v2751_v59 = vld [vmem:[#allocation8 + $0x468] sm:$0xff] }
 0x2ea   : > { %3491 = vmatprep.subr.mxu0 %v6270_v33 }
 0x2eb   : > { %3492 = vmatpush2.msra.mxu0 %v2722_v55  ;;  %v4520_v55 = vld [vmem:[#allocation2 + $0x50] sm:$0xff] }
 0x2ec   : > { %3269 = vmatmul.mubr.f32.vlgmr.msra.gmra.mxu1 %v6017_v9  ;;  %3199 = vmatmul.mubr.f32.gmra.mxu0 %v6556_v10  ;;  %v2750_v9 = vld [vmem:[#allocation8 + $0x460] sm:$0xff] }
 0x2ed   : > { %3273 = vmatprep.mubr.f32.mxu1 %v6065_v20  ;;  %4360 = vmatpush3.msra.mxu1 %v4516_v63  ;;  %v4518_v20 = vld [vmem:[#allocation2 + $0x38] sm:$0xff] }
 0x2ee   : > { %3493 = vmatprep.mubr.f32.mxu0 %v6050_v34  ;;  %4361 = vmatprep.subr.mxu1 %v2752_v32 }
 0x2ef   : > { %4362 = vmatpush3.msra.mxu1 %v2752_v32  ;;  %v7360_v32 = vld [vmem:[#allocation22_spill] sm:$0xff] }
 0x2f0   : > { %3274 = vmatmul.mubr.f32.gmra.mxu1 %v6030_v23  ;;  %3494 = vmatmul.mubr.f32.vlgmr.msra.gmra.mxu0 %v4517_v26  ;;  %v2749_v23 = vld [vmem:[#allocation8 + $0x458] sm:$0xff] }
 0x2f1   : > { %3278 = vmatprep.mubr.f32.mxu1 %v6086_v56  ;;  %3498 = vmatprep.mubr.f32.mxu0 %v6075_v0  ;;  %v7362_v26 = vld [vmem:[#allocation32_spill] sm:$0xff] }
 0x2f2   : > { %4363 = vmatprep.subr.mxu1 %v2751_v59 }
 0x2f3   : > { %4364 = vmatpush3.msra.mxu1 %v2751_v59  ;;  %v7361_v59 = vld [vmem:[#allocation31_spill] sm:$0xff] }
 0x2f4   : > { %3279 = vmatmul.mubr.f32.gmra.mxu1 %v6050_v34  ;;  %3499 = vmatmul.mubr.f32.gmra.mxu0 %v4518_v20  ;;  %v2748_v34 = vld [vmem:[#allocation8 + $0x450] sm:$0xff] }
 0x2f5   : > { %3283 = vmatprep.mubr.f32.mxu1 %v6111_v49  ;;  %3503 = vmatprep.mubr.f32.mxu0 %v6096_v41 }
 0x2f6   : > { %4365 = vmatprep.subr.mxu1 %v2750_v9 }
 0x2f7   : > { %4366 = vmatpush3.msra.mxu1 %v2750_v9 }
 0x2f8   : > { %3284 = vmatmul.mubr.f32.gmra.mxu1 %v6075_v0  ;;  %3504 = vmatmul.mubr.f32.gmra.mxu0 %v4519_v38  ;;  %v2747_v0 = vld [vmem:[#allocation8 + $0x448] sm:$0xff] }
 0x2f9   : > { %3288 = vmatprep.mubr.f32.mxu1 %v6132_v7  ;;  %3508 = vmatprep.mubr.f32.mxu0 %v6121_v8 }
 0x2fa   : > { %4367 = vmatprep.subr.mxu1 %v2749_v23 }
 0x2fb   : > { %4368 = vmatpush3.msra.mxu1 %v2749_v23 }
 0x2fc   : > { %3289 = vmatmul.mubr.f32.gmra.mxu1 %v6096_v41  ;;  %3509 = vmatmul.mubr.f32.gmra.mxu0 %v4520_v55  ;;  %v2746_v41 = vld [vmem:[#allocation8 + $0x440] sm:$0xff] }
 0x2fd   : > { %3293 = vmatprep.mubr.f32.mxu1 %v6157_v45  ;;  %3513 = vmatprep.mubr.f32.mxu0 %v6142_v40 }
 0x2fe   : > { %4369 = vmatprep.subr.mxu1 %v2748_v34 }
 0x2ff   : > { %4370 = vmatpush3.msra.mxu1 %v2748_v34  ;;  %v7363_v34 = vld [vmem:[#allocation21_spill] sm:$0xff] }
 0x300   : > { %3294 = vmatmul.mubr.f32.gmra.mxu1 %v6121_v8  ;;  %3514 = vmatmul.mubr.f32.gmra.mxu0 %v6105_v43  ;;  %v2745_v8 = vld [vmem:[#allocation8 + $0x438] sm:$0xff]  ;;  %v2744_v43 = vld [vmem:[#allocation8 + $0x430] sm:$0xff] }
 0x301   : > { %3298 = vmatprep.mubr.f32.mxu1 %v6178_v28  ;;  %3518 = vmatprep.mubr.f32.mxu0 %v6167_v58 }
 0x302   : > { %4371 = vmatprep.subr.mxu1 %v2747_v0 }
 0x303   : > { %4372 = vmatpush3.msra.mxu1 %v2747_v0  ;;  %v7364_v0 = vld [vmem:[#allocation29_spill] sm:$0xff] }
 0x304   : > { %3299 = vmatmul.mubr.f32.gmra.mxu1 %v6142_v40  ;;  %3519 = vmatmul.mubr.f32.gmra.mxu0 %v6107_v24  ;;  %v2743_v24 = vld [vmem:[#allocation8 + $0x428] sm:$0xff]  ;;  %v2742_v40 = vld [vmem:[#allocation8 + $0x420] sm:$0xff] }
 0x305   : > { %3303 = vmatprep.mubr.f32.mxu1 %v6205_v19  ;;  %3523 = vmatprep.mubr.f32.mxu0 %v6190_v50 }
 0x306   : > { %4373 = vmatprep.subr.mxu1 %v2746_v41 }
 0x307   : > { %4374 = vmatpush3.msra.mxu1 %v2746_v41  ;;  %v7365_v41 = vld [vmem:[#allocation24_spill] sm:$0xff] }
 0x308   : > { %3304 = vmatmul.mubr.f32.gmra.mxu1 %v6167_v58  ;;  %3524 = vmatmul.mubr.f32.gmra.mxu0 %v6151_v21  ;;  %v2741_v21 = vld [vmem:[#allocation8 + $0x418] sm:$0xff]  ;;  %v2739_v58 = vld [vmem:[#allocation8 + $0x408] sm:$0xff] }
 0x309   : > { %3308 = vmatprep.mubr.f32.mxu1 %v6227_v51  ;;  %3528 = vmatprep.mubr.f32.mxu0 %v6215_v18 }
 0x30a   : > { %4375 = vmatprep.subr.mxu1 %v2745_v8 }
 0x30b   : > { %4376 = vmatpush3.msra.mxu1 %v2745_v8 }
 0x30c   : > { %3309 = vmatmul.mubr.f32.gmra.mxu1 %v6190_v50  ;;  %3529 = vmatmul.mubr.f32.gmra.mxu0 %v6153_v15  ;;  %v2740_v15 = vld [vmem:[#allocation8 + $0x410] sm:$0xff]  ;;  %v2738_v50 = vld [vmem:[#allocation8 + $0x400] sm:$0xff] }
 0x30d   : > { %3313 = vmatprep.mubr.f32.mxu1 %v6251_v62  ;;  %3533 = vmatprep.mubr.f32.mxu0 %v6237_v11 }
 0x30e   : > { %4377 = vmatprep.subr.mxu1 %v2744_v43 }
 0x30f   : > { %4378 = vmatpush3.msra.mxu1 %v2744_v43 }
 0x310   : > { %3314 = vmatmul.mubr.f32.gmra.mxu1 %v6215_v18  ;;  %3534 = vmatmul.mubr.f32.gmra.mxu0 %v6199_v16  ;;  %v7351_v16 = vld [vmem:[#allocation16_spill] sm:$0xff]  ;;  %v7353_v18 = vld [vmem:[#allocation14_spill] sm:$0xff] }
 0x311   : > { %3318 = vmatprep.mubr.f32.mxu1 %v6275_v22  ;;  %3538 = vmatprep.mubr.f32.mxu0 %v6261_v42 }
 0x312   : > { %4379 = vmatprep.subr.mxu1 %v2743_v24 }
 0x313   : > { %4380 = vmatpush3.msra.mxu1 %v2743_v24 }
 0x314   : > { %3319 = vmatmul.mubr.f32.gmra.mxu1 %v6237_v11  ;;  %3539 = vmatmul.mubr.f32.gmra.mxu0 %v6201_v37  ;;  %v7352_v37 = vld [vmem:[#allocation17_spill] sm:$0xff] }
 0x315   : > { %3323 = vmatprep.mubr.f32.mxu1 %v6291_v12  ;;  %3543 = vmatprep.mubr.f32.mxu0 %v6279_v53 }
 0x316   : > { %4381 = vmatprep.subr.mxu1 %v2742_v40 }
 0x317   : > { %4382 = vmatpush3.msra.mxu1 %v2742_v40 }
 0x318   : > { %3324 = vmatmul.mubr.f32.gmra.mxu1 %v6261_v42  ;;  %3544 = vmatmul.mubr.f32.gmra.mxu0 %v6245_v17  ;;  %v7354_v17 = vld [vmem:[#allocation20_spill] sm:$0xff]  ;;  %v7356_v42 = vld [vmem:[#allocation26_spill] sm:$0xff] }
 0x319   : > { %3328 = vmatprep.mubr.f32.mxu1 %v6306_v6  ;;  %3548 = vmatprep.mubr.f32.mxu0 %v6297_v61 }
 0x31a   : > { %4383 = vmatprep.subr.mxu1 %v2741_v21 }
 0x31b   : > { %4384 = vmatpush3.msra.mxu1 %v2741_v21  ;;  %v7366_v21 = vld [vmem:[#allocation28_spill] sm:$0xff] }
 0x31c   : > { %3329 = vmatmul.mubr.f32.gmra.mxu1 %v6279_v53  ;;  %3549 = vmatmul.mubr.f32.gmra.mxu0 %v6247_v13  ;;  %v7355_v13 = vld [vmem:[#allocation25_spill] sm:$0xff] }
 0x31d   : > { %3333 = vmatprep.mubr.f32.mxu1 %v6321_v48  ;;  %3553 = vmatprep.mubr.f32.mxu0 %v6310_v54 }
 0x31e   : > { %4385 = vmatprep.subr.mxu1 %v2740_v15 }
 0x31f   : > { %4386 = vmatpush3.msra.mxu1 %v2740_v15 }
 0x320   : > { %3334 = vmatmul.mubr.f32.gmra.mxu1 %v6297_v61  ;;  %3554 = vmatmul.mubr.f32.gmra.mxu0 %v6285_v4  ;;  %v7357_v61 = vld [vmem:[#allocation19_spill] sm:$0xff] }
 0x321   : > { %3338 = vmatprep.mubr.f32.mxu1 %v6338_v36  ;;  %3558 = vmatprep.mubr.f32.mxu0 %v6329_v57 }
 0x322   : > { %4387 = vmatprep.subr.mxu1 %v2739_v58 }
 0x323   : > { %4388 = vmatpush3.msra.mxu1 %v2739_v58  ;;  %v7367_v58 = vld [vmem:[#allocation37_spill] sm:$0xff] }
 0x324   : > { %3339 = vmatmul.mubr.f32.gmra.mxu1 %v6310_v54  ;;  %3559 = vmatmul.mubr.f32.gmra.mxu0 %v6287_v44  ;;  %v7358_v54 = vld [vmem:[#allocation23_spill] sm:$0xff] }
 0x325   : > { %3343 = vmatprep.mubr.f32.mxu1 %v6355_v47  ;;  %3563 = vmatprep.mubr.f32.mxu0 %v6344_v35 }
 0x326   : > { %4389 = vmatprep.subr.mxu1 %v2738_v50 }
 0x327   : > { %4390 = vmatpush3.msra.mxu1 %v2738_v50  ;;  %v7368_v50 = vld [vmem:[#allocation38_spill] sm:$0xff] }
 0x328   : > { %3344 = vmatmul.mubr.f32.gmra.mxu1 %v6329_v57  ;;  %3564 = vmatmul.mubr.f32.gmra.mxu0 %v6315_v46  ;;  %v7359_v46 = vld [vmem:[#allocation18_spill] sm:$0xff] }
 0x329   : > { %3348 = vmatprep.mubr.f32.mxu1 %v6370_v39  ;;  %3568 = vmatprep.mubr.f32.mxu0 %v6361_v3 }
 0x32c   : > { %3349 = vmatmul.mubr.f32.gmra.mxu1 %v6344_v35  ;;  %3569 = vmatmul.mubr.f32.gmra.mxu0 %v7351_v16 }
 0x32d   : > { %3353 = vmatprep.mubr.f32.mxu1 %v7352_v37  ;;  %3573 = vmatprep.mubr.f32.mxu0 %v7353_v18 }
 0x32f   : > { %v6623_v11 = vpop.f32.mrf.mxu0 }
 0x330   : > { %3354 = vmatmul.mubr.f32.gmra.mxu1 %v6361_v3  ;;  %3574 = vmatmul.mubr.f32.gmra.mxu0 %v7354_v17 }
 0x331   : > { %3358 = vmatprep.mubr.f32.mxu1 %v7355_v13  ;;  %3578 = vmatprep.mubr.f32.mxu0 %v7356_v42  ;;  %v3047_v53 = vpop.f32.mrf.mxu0 }
 0x332   : > { %v7369_v53 = vld [vmem:[#allocation27_spill] sm:$0xff] }
 0x334   : > { %v2830_v4 = vpop.f32.mrf.mxu1  ;;  %3359 = vmatmul.mubr.f32.gmra.mxu1 %v7353_v18  ;;  %v6629_v44 = vpop.f32.mrf.mxu0  ;;  %3579 = vmatmul.mubr.f32.gmra.mxu0 %v7357_v61  ;;  %v7370_v61 = vld [vmem:[#allocation39_spill] sm:$0xff] }
 0x335   : > { %3363 = vmatprep.mubr.f32.mxu1 %v7358_v54  ;;  %3583 = vmatprep.mubr.f32.mxu0 %v7359_v46 }
 0x336   : > { %v2832_v57 = vpop.f32.mrf.mxu1  ;;  %v3052_v35 = vpop.f32.mrf.mxu0 }
 0x338   : > { %v2835_v3 = vpop.f32.mrf.mxu1  ;;  %3364 = vmatmul.mubr.f32.gmra.mxu1 %v7356_v42  ;;  %v3055_v29 = vpop.f32.mrf.mxu0  ;;  %3584 = vmatmul.mubr.f32.gmra.mxu0 %v7360_v32  ;;  %v7372_v32 = vld [vmem:[#allocation34_spill] sm:$0xff] }
 0x339   : > { %v6636_v63 = vadd.f32 %v3055_v29, %v2830_v4  ;;  %3368 = vmatprep.mubr.f32.mxu1 %v7361_v59  ;;  %3588 = vmatprep.mubr.f32.mxu0 %v7362_v26 }
 0x33a   : > { %v2837_v9 = vpop.f32.mrf.mxu1  ;;  %v3057_v20 = vpop.f32.mrf.mxu0 }
 0x33b   : > { %v7373_v9 = vld [vmem:[#allocation44_spill] sm:$0xff]  ;;  %v7374_v20 = vld [vmem:[#allocation35_spill] sm:$0xff] }
 0x33c   : > { %v2840_v23 = vpop.f32.mrf.mxu1  ;;  %3369 = vmatmul.mubr.f32.gmra.mxu1 %v7359_v46  ;;  %v3060_v38 = vpop.f32.mrf.mxu0  ;;  %3589 = vmatmul.mubr.f32.gmra.mxu0 %v7363_v34  ;;  %v7371_v46 = vld [vmem:[#allocation30_spill] sm:$0xff] }
 0x33d   : > { %v6642_v55 = vadd.f32 %v3060_v38, %v2835_v3  ;;  %3373 = vmatprep.mubr.f32.mxu1 %v7364_v0  ;;  %3593 = vmatprep.mubr.f32.mxu0 %v7365_v41 }
 0x33e   : > { %v2842_v8 = vpop.f32.mrf.mxu1  ;;  %v3062_v43 = vpop.f32.mrf.mxu0 }
 0x33f   : > { %v7375_v8 = vld [vmem:[#allocation33_spill] sm:$0xff] }
 0x340   : > { %v2845_v24 = vpop.f32.mrf.mxu1  ;;  %3374 = vmatmul.mubr.f32.gmra.mxu1 %v7362_v26  ;;  %v3065_v40 = vpop.f32.mrf.mxu0  ;;  %3594 = vmatmul.mubr.f32.gmra.mxu0 %v7366_v21 }
 0x341   : > { %v6648_v15 = vadd.f32 %v3065_v40, %v2840_v23  ;;  %3378 = vmatprep.mubr.f32.mxu1 %v7367_v58  ;;  %3598 = vmatprep.mubr.f32.mxu0 %v7368_v50 }
 0x342   : > { %v2847_v16 = vpop.f32.mrf.mxu1  ;;  %v3067_v18 = vpop.f32.mrf.mxu0 }
 0x344   : > { %v2850_v17 = vpop.f32.mrf.mxu1  ;;  %3379 = vmatmul.mubr.f32.gmra.mxu1 %v7365_v41  ;;  %v3070_v42 = vpop.f32.mrf.mxu0  ;;  %3599 = vmatmul.mubr.f32.gmra.mxu0 %v7369_v53 }
 0x345   : > { %v6654_v4 = vadd.f32 %v3070_v42, %v2845_v24  ;;  %3383 = vmatprep.mubr.f32.mxu1 %v7370_v61  ;;  %3603 = vmatprep.mubr.f32.mxu0 %v7371_v46  ;;  %v7376_v24 = vld [vmem:[#allocation43_spill] sm:$0xff] }
 0x346   : > { %v2852_v57 = vpop.f32.mrf.mxu1  ;;  %v3072_v35 = vpop.f32.mrf.mxu0 }
 0x347   : > { %v7378_v35 = vld [vmem:[#allocation40_spill] sm:$0xff] }
 0x348   : > { %v2855_v3 = vpop.f32.mrf.mxu1  ;;  %3384 = vmatmul.mubr.f32.gmra.mxu1 %v7368_v50  ;;  %v3075_v29 = vpop.f32.mrf.mxu0  ;;  %3604 = vmatmul.mubr.f32.gmra.mxu0 %v7372_v32 }
 0x349   : > { %v6660_v26 = vadd.f32 %v3075_v29, %v2850_v17  ;;  %3388 = vmatprep.mubr.f32.mxu1 %v7373_v9  ;;  %3608 = vmatprep.mubr.f32.mxu0 %v7374_v20  ;;  %v7377_v17 = vld [vmem:[#allocation36_spill] sm:$0xff]  ;;  %v7379_v29 = vld [vmem:[#allocation45_spill] sm:$0xff] }
 0x34a   : > { %v2857_v23 = vpop.f32.mrf.mxu1  ;;  %v3077_v38 = vpop.f32.mrf.mxu0 }
 0x34b   : > { %v2579_v38 = vrot.slane %v6540_v5, 1 }
 0x34c   : > { %v2860_v34 = vpop.f32.mrf.mxu1  ;;  %3389 = vmatmul.mubr.f32.gmra.mxu1 %v7371_v46  ;;  %v3080_v41 = vpop.f32.mrf.mxu0  ;;  %3609 = vmatmul.mubr.f32.gmra.mxu0 %v7375_v8 }
 0x34d   : > { %v6666_v43 = vadd.f32 %v3080_v41, %v2855_v3  ;;  %3393 = vmatprep.mubr.f32.mxu1 %v6505_v14  ;;  %3613 = vmatprep.mubr.f32.mxu0 %v7376_v24 }
 0x34e   : > { %v2862_v40 = vpop.f32.mrf.mxu1  ;;  %v3082_v21 = vpop.f32.mrf.mxu0 }
 0x34f   : > { %v2300_v40 = vld [vmem:[#allocation2 + $0x190] sm:$0x3] }
 0x350   : > { %v2865_v50 = vpop.f32.mrf.mxu1  ;;  %3394 = vmatmul.mubr.f32.gmra.mxu1 %v7374_v20  ;;  %v3085_v16 = vpop.f32.mrf.mxu0  ;;  %3614 = vmatmul.mubr.f32.gmra.mxu0 %v6469_v30 }
 0x351   : > { %v6672_v18 = vadd.f32 %v3085_v16, %v2860_v34  ;;  %3398 = vmatprep.mubr.f32.mxu1 %v6520_v52  ;;  %3618 = vmatprep.mubr.f32.mxu0 %v7377_v17  ;;  %v2580_v34 = vrot.slane %v6550_v2, 1  ;;  %v2586_v16 = vrot.slane %v6540_v5, 2 }
 0x352   : > { %v2867_v42 = vpop.f32.mrf.mxu1  ;;  %v3087_v53 = vpop.f32.mrf.mxu0 }
 0x354   : > { %v2870_v46 = vpop.f32.mrf.mxu1  ;;  %3399 = vmatmul.mubr.f32.gmra.mxu1 %v7376_v24  ;;  %v3090_v57 = vpop.f32.mrf.mxu0  ;;  %3619 = vmatmul.mubr.f32.gmra.mxu0 %v7378_v35  ;;  %v2596_v35 = vrot.slane %v6270_v33, 1 }
 0x355   : > { %v6678_v3 = vadd.f32 %v3090_v57, %v2865_v50  ;;  %3403 = vmatprep.mubr.f32.mxu1 %v6531_v1  ;;  %3623 = vmatprep.mubr.f32.mxu0 %v7379_v29  ;;  %v2582_v57 = vrot.slane %v2300_v40, 1 }
 0x356   : > { %v2872_v30 = vpop.f32.mrf.mxu1  ;;  %v3092_v32 = vpop.f32.mrf.mxu0 }
 0x358   : > { %v2875_v20 = vpop.f32.mrf.mxu1  ;;  %3404 = vmatmul.mubr.f32.gmra.mxu1 %v7377_v17  ;;  %v3095_v23 = vpop.f32.mrf.mxu0  ;;  %3624 = vmatmul.mubr.f32.gmra.mxu0 %v6499_v25  ;;  %v2581_v25 = vsel %vm547_vm0, %v2579_v38, %v2580_v34  ;;  %v2587_v17 = vrot.slane %v6550_v2, 2 }
 0x359   : > { %v6686_v41 = vadd.f32 %v3095_v23, %v2870_v46  ;;  %3408 = vmatprep.mubr.f32.mxu1 %v6546_v31  ;;  %3628 = vmatprep.mubr.f32.mxu0 %v6537_v27 }
 0x35a   : > { %v2877_v8 = vpop.f32.mrf.mxu1  ;;  %v3097_v24 = vpop.f32.mrf.mxu0  ;;  %v6703_v32 = vsel %vm660_vm1, %v2586_v16, %v2587_v17 }
 0x35b   : > { %v2589_v8 = vrot.slane %v2300_v40, 2 }
 0x35c   : > { %v2880_v21 = vpop.f32.mrf.mxu1  ;;  %3409 = vmatmul.mubr.f32.gmra.mxu1 %v7379_v29  ;;  %v3100_v50 = vpop.f32.mrf.mxu0  ;;  %3629 = vmatmul.mubr.f32.gmra.mxu0 %v6501_v60  ;;  %v6699_v29 = vld [vmem:[#allocation2 + $0x1a8] sm:$0x3] }
 0x35d   : > { %v6695_v42 = vadd.f32 %v3100_v50, %v2875_v20  ;;  %3413 = vmatprep.mubr.f32.mxu1 %v6556_v10  ;;  %3633 = vmatprep.mubr.f32.mxu0 %v2581_v25  ;;  %v2583_v20 = vsel %vm547_vm0, %v2580_v34, %v2582_v57  ;;  %v2599_v24 = vrot.slane %v6699_v29, 1  ;;  %v6712_v16 = vsel %vm660_vm1, %v2587_v17, %v2589_v8  ;;  %v6719_v57 = vld [vmem:[#allocation2] sm:$0xff] }
 0x35e   : > { %v2882_v53 = vpop.f32.mrf.mxu1  ;;  %v3102_v46 = vpop.f32.mrf.mxu0 }
 0x35f   : > { %v2600_v53 = vsel %vm547_vm0, %v2596_v35, %v2599_v24 }
 0x360   : > { %v2885_v30 = vpop.f32.mrf.mxu1  ;;  %3414 = vmatmul.mubr.f32.gmra.mxu1 %v6537_v27  ;;  %v3105_v60 = vpop.f32.mrf.mxu0  ;;  %3634 = vmatmul.mubr.f32.gmra.mxu0 %v6540_v5 }
 0x361   : > { %v6707_v23 = vadd.f32 %v3105_v60, %v2880_v21  ;;  %3418 = vmatprep.mubr.f32.mxu1 %v6703_v32  ;;  %3638 = vmatprep.mubr.f32.mxu0 %v2583_v20 }
 0x362   : > { %v2887_v38 = vpop.f32.mrf.mxu1  ;;  %v3107_v33 = vpop.f32.mrf.mxu0 }
 0x364   : > { %v2890_v50 = vpop.f32.mrf.mxu1  ;;  %3419 = vmatmul.mubr.f32.gmra.mxu1 %v2581_v25  ;;  %v3110_v27 = vpop.f32.mrf.mxu0  ;;  %3639 = vmatmul.mubr.f32.gmra.mxu0 %v6550_v2 }
 0x365   : > { %v6715_v5 = vadd.f32 %v3110_v27, %v2885_v30  ;;  %3423 = vmatprep.mubr.f32.mxu1 %v6712_v16  ;;  %3643 = vmatprep.mubr.f32.mxu0 %v2596_v35 }
 0x366   : > { %v2892_v34 = vpop.f32.mrf.mxu1  ;;  %v3112_v21 = vpop.f32.mrf.mxu0 }
 0x368   : > { %v2895_v40 = vpop.f32.mrf.mxu1  ;;  %3424 = vmatmul.mubr.f32.gmra.mxu1 %v2583_v20  ;;  %v3115_v46 = vpop.f32.mrf.mxu0  ;;  %3644 = vmatmul.mubr.f32.gmra.mxu0 %v6719_v57 }
 0x369   : > { %v6722_v25 = vadd.f32 %v3115_v46, %v2890_v50  ;;  %4391 = vmatprep.mubr.f32.mxu1 %v6086_v56  ;;  %3648 = vmatprep.mubr.f32.mxu0 %v2600_v53 }
 0x36a   : > { %v2897_v2 = vpop.f32.mrf.mxu1  ;;  %v3117_v17 = vpop.f32.mrf.mxu0 }
 0x36c   : > { %v2900_v30 = vpop.f32.mrf.mxu1  ;;  %4392 = vmatmul.mubr.f32.vlgmr.msra.gmra.mxu1 %v6111_v49  ;;  %v3120_v60 = vpop.f32.mrf.mxu0  ;;  %3649 = vmatmul.mubr.f32.gmra.mxu0 %v6719_v57 }
 0x36d   : > { %v6727_v35 = vadd.f32 %v3120_v60, %v2895_v40  ;;  %4394 = vmatprep.mubr.f32.mxu1 %v6132_v7 }
 0x36e   : > { %v2902_v20 = vpop.f32.mrf.mxu1  ;;  %v3122_v38 = vpop.f32.mrf.mxu0 }
 0x370   : > { %v2905_v33 = vpop.f32.mrf.mxu1  ;;  %4395 = vmatmul.mubr.f32.gmra.mxu1 %v6157_v45  ;;  %v3125_v8 = vpop.f32.mrf.mxu0 }
 0x371   : > { %v6731_v56 = vadd.f32 %v3125_v8, %v2900_v30  ;;  %4397 = vmatprep.mubr.f32.mxu1 %v6178_v28 }
 0x372   : > { %v2907_v24 = vpop.f32.mrf.mxu1  ;;  %v3127_v50 = vpop.f32.mrf.mxu0 }
 0x374   : > { %v2910_v49 = vpop.f32.mrf.mxu1  ;;  %4398 = vmatmul.mubr.f32.gmra.mxu1 %v6205_v19  ;;  %v3130_v27 = vpop.f32.mrf.mxu0 }
 0x375   : > { %v6735_v34 = vadd.f32 %v3130_v27, %v2905_v33  ;;  %4400 = vmatprep.mubr.f32.mxu1 %v6227_v51 }
 0x376   : > { %v2912_v7 = vpop.f32.mrf.mxu1  ;;  %v3132_v21 = vpop.f32.mrf.mxu0 }
 0x378   : > { %v2915_v53 = vpop.f32.mrf.mxu1  ;;  %4401 = vmatmul.mubr.f32.gmra.mxu1 %v6251_v62  ;;  %v3135_v45 = vpop.f32.mrf.mxu0 }
 0x379   : > { %v6739_v40 = vadd.f32 %v3135_v45, %v2910_v49  ;;  %4403 = vmatprep.mubr.f32.mxu1 %v6275_v22 }
 0x37a   : > { %v2917_v28 = vpop.f32.mrf.mxu1  ;;  %v3137_v46 = vpop.f32.mrf.mxu0 }
 0x37c   : > { %v2920_v2 = vpop.f32.mrf.mxu1  ;;  %4404 = vmatmul.mubr.f32.gmra.mxu1 %v6291_v12  ;;  %v3140_v19 = vpop.f32.mrf.mxu0 }
 0x37d   : > { %v6743_v17 = vadd.f32 %v3140_v19, %v2915_v53  ;;  %4406 = vmatprep.mubr.f32.mxu1 %v6306_v6 }
 0x37e   : > { %v2922_v51 = vpop.f32.mrf.mxu1  ;;  %v3142_v30 = vpop.f32.mrf.mxu0 }
 0x380   : > { %v2925_v60 = vpop.f32.mrf.mxu1  ;;  %4407 = vmatmul.mubr.f32.gmra.mxu1 %v6321_v48  ;;  %v3145_v62 = vpop.f32.mrf.mxu0 }
 0x381   : > { %v6747_v20 = vadd.f32 %v3145_v62, %v2920_v2  ;;  %4409 = vmatprep.mubr.f32.mxu1 %v6338_v36 }
 0x382   : > { %v2927_v22 = vpop.f32.mrf.mxu1  ;;  %v3147_v38 = vpop.f32.mrf.mxu0 }
 0x384   : > { %v2930_v33 = vpop.f32.mrf.mxu1  ;;  %4410 = vmatmul.mubr.f32.gmra.mxu1 %v6355_v47  ;;  %v3150_v12 = vpop.f32.mrf.mxu0 }
 0x385   : > { %v6751_v8 = vadd.f32 %v3150_v12, %v2925_v60  ;;  %4412 = vmatprep.mubr.f32.mxu1 %v6370_v39  ;;  %v2603_v12 = vrot.slane %v6719_v57, 2 }
 0x386   : > { %v2932_v6 = vpop.f32.mrf.mxu1  ;;  %v3152_v24 = vpop.f32.mrf.mxu0 }
 0x388   : > { %v2935_v50 = vpop.f32.mrf.mxu1  ;;  %4413 = vmatmul.mubr.f32.gmra.mxu1 %v7352_v37  ;;  %v3155_v48 = vpop.f32.mrf.mxu0 }
 0x389   : > { %v6755_v49 = vadd.f32 %v3155_v48, %v2930_v33  ;;  %4415 = vmatprep.mubr.f32.mxu1 %v7355_v13 }
 0x38a   : > { %v2937_v36 = vpop.f32.mrf.mxu1  ;;  %v3157_v27 = vpop.f32.mrf.mxu0 }
 0x38c   : > { %v2940_v7 = vpop.f32.mrf.mxu1  ;;  %4416 = vmatmul.mubr.f32.gmra.mxu1 %v7358_v54  ;;  %v3160_v47 = vpop.f32.mrf.mxu0 }
 0x38d   : > { %v6759_v21 = vadd.f32 %v3160_v47, %v2935_v50  ;;  %4418 = vmatprep.mubr.f32.mxu1 %v7361_v59 }
 0x38e   : > { %v2942_v39 = vpop.f32.mrf.mxu1  ;;  %v3162_v53 = vpop.f32.mrf.mxu0 }
 0x38f   : > { %v7380_v53 = vld [vmem:[#allocation15_spill] sm:$0xff] }
 0x390   : > { %v2945_v45 = vpop.f32.mrf.mxu1  ;;  %4419 = vmatmul.mubr.f32.gmra.mxu1 %v7364_v0  ;;  %v3165_v37 = vpop.f32.mrf.mxu0 }
 0x391   : > { %v6763_v28 = vadd.f32 %v3165_v37, %v2940_v7  ;;  %4421 = vmatprep.mubr.f32.mxu1 %v7367_v58 }
 0x392   : > { %v2947_v13 = vpop.f32.mrf.mxu1  ;;  %v3167_v46 = vpop.f32.mrf.mxu0 }
 0x394   : > { %v2950_v2 = vpop.f32.mrf.mxu1  ;;  %4422 = vmatmul.mubr.f32.gmra.mxu1 %v7370_v61  ;;  %v3170_v54 = vpop.f32.mrf.mxu0 }
 0x395   : > { %v6767_v19 = vadd.f32 %v3170_v54, %v2945_v45  ;;  %4424 = vmatprep.mubr.f32.mxu1 %v7373_v9  ;;  %v3046_v45 = vadd.f32 %v6623_v11, %v7380_v53 }
 0x396   : > { %v2952_v59 = vpop.f32.mrf.mxu1  ;;  %v3172_v51 = vpop.f32.mrf.mxu0 }
 0x397   : > { %v7381_v59 = vld [vmem:[#allocation13_spill] sm:$0xff] }
 0x398   : > { %v2955_v30 = vpop.f32.mrf.mxu1  ;;  %4425 = vmatmul.mubr.f32.gmra.mxu1 %v6505_v14  ;;  %v3175_v0 = vpop.f32.mrf.mxu0  ;;  %v3051_v51 = vadd.f32 %v6629_v44, %v7381_v59 }
 0x399   : > { %v6771_v60 = vadd.f32 %v3175_v0, %v2950_v2  ;;  %4427 = vmatprep.mubr.f32.mxu1 %v6520_v52  ;;  %v2606_v52 = vrot.slane %v6699_v29, 2 }
 0x39a   : > { %v2957_v58 = vpop.f32.mrf.mxu1  ;;  %v3177_v62 = vpop.f32.mrf.mxu0 }
 0x39b   : > { %v2607_v57 = vsel %vm660_vm1, %v2603_v12, %v2606_v52 }
 0x39c   : > { %v2960_v22 = vpop.f32.mrf.mxu1  ;;  %4428 = vmatmul.mubr.f32.gmra.mxu1 %v6531_v1  ;;  %v3180_v61 = vpop.f32.mrf.mxu0 }
 0x39d   : > { %v6775_v38 = vadd.f32 %v3180_v61, %v2955_v30  ;;  %4430 = vmatprep.mubr.f32.mxu1 %v6546_v31 }
 0x39e   : > { %v2962_v9 = vpop.f32.mrf.mxu1  ;;  %v3182_v33 = vpop.f32.mrf.mxu0 }
 0x3a0   : > { %v2965_v14 = vpop.f32.mrf.mxu1  ;;  %4431 = vmatmul.mubr.f32.gmra.mxu1 %v6556_v10  ;;  %v3185_v6 = vpop.f32.mrf.mxu0 }
 0x3a1   : > { %v6780_v24 = vadd.f32 %v3185_v6, %v2960_v22  ;;  %4433 = vmatprep.mubr.f32.mxu1 %v6703_v32 }
 0x3a2   : > { %v2967_v1 = vpop.f32.mrf.mxu1  ;;  %v3187_v50 = vpop.f32.mrf.mxu0 }
 0x3a4   : > { %v2970_v48 = vpop.f32.mrf.mxu1  ;;  %4434 = vmatmul.mubr.f32.gmra.mxu1 %v6712_v16  ;;  %v3190_v31 = vpop.f32.mrf.mxu0 }
 0x3a5   : > { %v6785_v36 = vadd.f32 %v3190_v31, %v2965_v14  ;;  %4436 = vmatprep.mubr.f32.mxu1 %v2603_v12 }
 0x3a6   : > { %v2972_v27 = vpop.f32.mrf.mxu1  ;;  %v3192_v10 = vpop.f32.mrf.mxu0 }
 0x3a8   : > { %v2975_v7 = vpop.f32.mrf.mxu1  ;;  %4437 = vmatmul.mubr.f32.gmra.mxu1 %v2607_v57  ;;  %v3195_v47 = vpop.f32.mrf.mxu0 }
 0x3a9   : > { %v6788_v39 = vadd.f32 %v3195_v47, %v2970_v48 }
 0x3aa   : > { %v2977_v32 = vpop.f32.mrf.mxu1  ;;  %v3197_v29 = vpop.f32.mrf.mxu0 }
 0x3ac   : > { %v3270_v37 = vpop.f32.mrf.mxu1  ;;  %v3200_v16 = vpop.f32.mrf.mxu0 }
 0x3ad   : > { %v3271_v13 = vadd.f32 %v3270_v37, %v3046_v45  ;;  %v6792_v46 = vadd.f32 %v3200_v16, %v2975_v7 }
 0x3ae   : > { %v3272_v2 = vpop.f32.mrf.mxu1  ;;  %v3202_v54 = vpop.f32.mrf.mxu0 }
 0x3b0   : > { %v3275_v30 = vpop.f32.mrf.mxu1  ;;  %v3495_v0 = vpop.f32.mrf.mxu0 }
 0x3b1   : > { %v3276_v58 = vadd.f32 %v3275_v30, %v3051_v51  ;;  %v6796_v62 = vadd.f32 %v3495_v0, %v3271_v13 }
 0x3b2   : > { %v3277_v22 = vpop.f32.mrf.mxu1  ;;  %v3497_v61 = vpop.f32.mrf.mxu0 }
 0x3b4   : > { %v3280_v9 = vpop.f32.mrf.mxu1  ;;  %v3500_v33 = vpop.f32.mrf.mxu0 }
 0x3b5   : > { %v3281_v11 = vadd.f32 %v3280_v9, %v6636_v63  ;;  %v6799_v12 = vadd.f32 %v3500_v33, %v3276_v58 }
 0x3b6   : > { %v3282_v14 = vpop.f32.mrf.mxu1  ;;  %v3502_v6 = vpop.f32.mrf.mxu0 }
 0x3b8   : > { %v3285_v52 = vpop.f32.mrf.mxu1  ;;  %v3505_v1 = vpop.f32.mrf.mxu0 }
 0x3b9   : > { %v3286_v50 = vadd.f32 %v3285_v52, %v6642_v55  ;;  %v6802_v44 = vadd.f32 %v3505_v1, %v3281_v11 }
 0x3ba   : > { %v3287_v48 = vpop.f32.mrf.mxu1  ;;  %v3507_v31 = vpop.f32.mrf.mxu0 }
 0x3bc   : > { %v3290_v57 = vpop.f32.mrf.mxu1  ;;  %v3510_v27 = vpop.f32.mrf.mxu0 }
 0x3bd   : > { %v3291_v10 = vadd.f32 %v3290_v57, %v6648_v15  ;;  %v6805_v7 = vadd.f32 %v3510_v27, %v3286_v50 }
 0x3be   : > { %v3292_v47 = vpop.f32.mrf.mxu1  ;;  %v3512_v63 = vpop.f32.mrf.mxu0 }
 0x3c0   : > { %v3295_v32 = vpop.f32.mrf.mxu1  ;;  %v3515_v29 = vpop.f32.mrf.mxu0 }
 0x3c1   : > { %v3296_v53 = vadd.f32 %v3295_v32, %v6654_v4  ;;  %v6808_v45 = vadd.f32 %v3515_v29, %v3291_v10 }
 0x3c2   : > { %v3297_v37 = vpop.f32.mrf.mxu1  ;;  %v3517_v55 = vpop.f32.mrf.mxu0 }
 0x3c4   : > { %v3300_v16 = vpop.f32.mrf.mxu1  ;;  %v3520_v13 = vpop.f32.mrf.mxu0 }
 0x3c5   : > { %v3301_v2 = vadd.f32 %v3300_v16, %v6660_v26  ;;  %v6811_v54 = vadd.f32 %v3520_v13, %v3296_v53 }
 0x3c6   : > { %v3302_v59 = vpop.f32.mrf.mxu1  ;;  %v3522_v15 = vpop.f32.mrf.mxu0 }
 0x3c8   : > { %v3305_v51 = vpop.f32.mrf.mxu1  ;;  %v3525_v30 = vpop.f32.mrf.mxu0 }
 0x3c9   : > { %v3306_v0 = vadd.f32 %v3305_v51, %v6666_v43  ;;  %v6814_v58 = vadd.f32 %v3525_v30, %v3301_v2 }
 0x3ca   : > { %v3307_v22 = vpop.f32.mrf.mxu1  ;;  %v3527_v4 = vpop.f32.mrf.mxu0 }
 0x3cc   : > { %v3310_v61 = vpop.f32.mrf.mxu1  ;;  %v3530_v9 = vpop.f32.mrf.mxu0 }
 0x3cd   : > { %v3311_v33 = vadd.f32 %v3310_v61, %v6672_v18  ;;  %v6817_v11 = vadd.f32 %v3530_v9, %v3306_v0 }
 0x3ce   : > { %v3312_v14 = vpop.f32.mrf.mxu1  ;;  %v3532_v26 = vpop.f32.mrf.mxu0 }
 0x3d0   : > { %v3315_v6 = vpop.f32.mrf.mxu1  ;;  %v3535_v52 = vpop.f32.mrf.mxu0 }
 0x3d1   : > { %v3316_v1 = vadd.f32 %v3315_v6, %v6678_v3  ;;  %v6820_v50 = vadd.f32 %v3535_v52, %v3311_v33 }
 0x3d2   : > { %v3317_v48 = vpop.f32.mrf.mxu1  ;;  %v3537_v43 = vpop.f32.mrf.mxu0 }
 0x3d4   : > { %v3320_v31 = vpop.f32.mrf.mxu1  ;;  %v3540_v57 = vpop.f32.mrf.mxu0 }
 0x3d5   : > { %v3321_v27 = vadd.f32 %v3320_v31, %v6686_v41  ;;  %v6823_v10 = vadd.f32 %v3540_v57, %v3316_v1 }
 0x3d6   : > { %v3322_v47 = vpop.f32.mrf.mxu1  ;;  %v3542_v18 = vpop.f32.mrf.mxu0 }
 0x3d8   : > { %v3325_v63 = vpop.f32.mrf.mxu1  ;;  %v3545_v32 = vpop.f32.mrf.mxu0 }
 0x3d9   : > { %v3326_v29 = vadd.f32 %v3325_v63, %v6695_v42  ;;  %v6826_v53 = vadd.f32 %v3545_v32, %v3321_v27 }
 0x3da   : > { %v3327_v37 = vpop.f32.mrf.mxu1  ;;  %v3547_v3 = vpop.f32.mrf.mxu0 }
 0x3dc   : > { %v3330_v55 = vpop.f32.mrf.mxu1  ;;  %v3550_v16 = vpop.f32.mrf.mxu0 }
 0x3dd   : > { %v3331_v13 = vadd.f32 %v3330_v55, %v6707_v23  ;;  %v6829_v2 = vadd.f32 %v3550_v16, %v3326_v29 }
 0x3de   : > { %v3332_v59 = vpop.f32.mrf.mxu1  ;;  %v3552_v41 = vpop.f32.mrf.mxu0 }
 0x3e0   : > { %v3335_v15 = vpop.f32.mrf.mxu1  ;;  %v3555_v51 = vpop.f32.mrf.mxu0 }
 0x3e1   : > { %v3336_v30 = vadd.f32 %v3335_v15, %v6715_v5  ;;  %v6832_v0 = vadd.f32 %v3555_v51, %v3331_v13 }
 0x3e2   : > { %v3337_v22 = vpop.f32.mrf.mxu1  ;;  %v3557_v42 = vpop.f32.mrf.mxu0 }
 0x3e4   : > { %v3340_v4 = vpop.f32.mrf.mxu1  ;;  %v3560_v61 = vpop.f32.mrf.mxu0 }
 0x3e5   : > { %v3341_v9 = vadd.f32 %v3340_v4, %v6722_v25  ;;  %v6835_v33 = vadd.f32 %v3560_v61, %v3336_v30 }
 0x3e6   : > { %v3342_v14 = vpop.f32.mrf.mxu1  ;;  %v3562_v23 = vpop.f32.mrf.mxu0 }
 0x3e8   : > { %v3345_v26 = vpop.f32.mrf.mxu1  ;;  %v3565_v6 = vpop.f32.mrf.mxu0 }
 0x3e9   : > { %v3346_v52 = vadd.f32 %v3345_v26, %v6727_v35  ;;  %v6838_v1 = vadd.f32 %v3565_v6, %v3341_v9 }
 0x3ea   : > { %v3347_v48 = vpop.f32.mrf.mxu1  ;;  %v3567_v5 = vpop.f32.mrf.mxu0 }
 0x3ec   : > { %v3350_v43 = vpop.f32.mrf.mxu1  ;;  %v3570_v31 = vpop.f32.mrf.mxu0 }
 0x3ed   : > { %v3351_v57 = vadd.f32 %v3350_v43, %v6731_v56  ;;  %v6841_v27 = vadd.f32 %v3570_v31, %v3346_v52 }
 0x3ee   : > { %v3352_v47 = vpop.f32.mrf.mxu1  ;;  %v3572_v25 = vpop.f32.mrf.mxu0 }
 0x3f0   : > { %v3355_v18 = vpop.f32.mrf.mxu1  ;;  %v3575_v63 = vpop.f32.mrf.mxu0 }
 0x3f1   : > { %v3356_v32 = vadd.f32 %v3355_v18, %v6735_v34  ;;  %v6844_v29 = vadd.f32 %v3575_v63, %v3351_v57 }
 0x3f2   : > { %v3357_v37 = vpop.f32.mrf.mxu1  ;;  %v3577_v35 = vpop.f32.mrf.mxu0 }
 0x3f4   : > { %v3360_v3 = vpop.f32.mrf.mxu1  ;;  %v3580_v55 = vpop.f32.mrf.mxu0 }
 0x3f5   : > { %v3361_v16 = vadd.f32 %v3360_v3, %v6739_v40  ;;  %v6847_v13 = vadd.f32 %v3580_v55, %v3356_v32 }
 0x3f6   : > { %v3362_v59 = vpop.f32.mrf.mxu1  ;;  %v3582_v56 = vpop.f32.mrf.mxu0 }
 0x3f8   : > { %v3365_v41 = vpop.f32.mrf.mxu1  ;;  %v3585_v15 = vpop.f32.mrf.mxu0 }
 0x3f9   : > { %v3366_v51 = vadd.f32 %v3365_v41, %v6743_v17  ;;  %v6850_v30 = vadd.f32 %v3585_v15, %v3361_v16 }
 0x3fa   : > { %v3367_v22 = vpop.f32.mrf.mxu1  ;;  %v3587_v34 = vpop.f32.mrf.mxu0 }
 0x3fc   : > { %v3370_v42 = vpop.f32.mrf.mxu1  ;;  %v3590_v4 = vpop.f32.mrf.mxu0 }
 0x3fd   : > { %v3371_v61 = vadd.f32 %v3370_v42, %v6747_v20  ;;  %v6853_v9 = vadd.f32 %v3590_v4, %v3366_v51 }
 0x3fe   : > { %v3372_v14 = vpop.f32.mrf.mxu1  ;;  %v3592_v40 = vpop.f32.mrf.mxu0 }
 0x400   : > { %v3375_v23 = vpop.f32.mrf.mxu1  ;;  %v3595_v26 = vpop.f32.mrf.mxu0 }
 0x401   : > { %v3376_v6 = vadd.f32 %v3375_v23, %v6751_v8  ;;  %v6856_v52 = vadd.f32 %v3595_v26, %v3371_v61 }
 0x402   : > { %v3377_v48 = vpop.f32.mrf.mxu1  ;;  %v3597_v17 = vpop.f32.mrf.mxu0 }
 0x404   : > { %v3380_v5 = vpop.f32.mrf.mxu1  ;;  %v3600_v43 = vpop.f32.mrf.mxu0 }
 0x405   : > { %v3381_v31 = vadd.f32 %v3380_v5, %v6755_v49  ;;  %v6859_v57 = vadd.f32 %v3600_v43, %v3376_v6 }
 0x406   : > { %v3382_v47 = vpop.f32.mrf.mxu1  ;;  %v3602_v20 = vpop.f32.mrf.mxu0 }
 0x408   : > { %v3385_v25 = vpop.f32.mrf.mxu1  ;;  %v3605_v18 = vpop.f32.mrf.mxu0 }
 0x409   : > { %v3386_v63 = vadd.f32 %v3385_v25, %v6759_v21  ;;  %v6862_v32 = vadd.f32 %v3605_v18, %v3381_v31 }
 0x40a   : > { %v3387_v37 = vpop.f32.mrf.mxu1  ;;  %v3607_v8 = vpop.f32.mrf.mxu0 }
 0x40c   : > { %v3390_v35 = vpop.f32.mrf.mxu1  ;;  %v3610_v3 = vpop.f32.mrf.mxu0 }
 0x40d   : > { %v3391_v55 = vadd.f32 %v3390_v35, %v6763_v28  ;;  %v6865_v16 = vadd.f32 %v3610_v3, %v3386_v63 }
 0x40e   : > { %v3392_v59 = vpop.f32.mrf.mxu1  ;;  %v3612_v49 = vpop.f32.mrf.mxu0 }
 0x410   : > { %v3395_v56 = vpop.f32.mrf.mxu1  ;;  %v3615_v41 = vpop.f32.mrf.mxu0 }
 0x411   : > { %v3396_v15 = vadd.f32 %v3395_v56, %v6767_v19  ;;  %v6868_v51 = vadd.f32 %v3615_v41, %v3391_v55 }
 0x412   : > { %v3397_v22 = vpop.f32.mrf.mxu1  ;;  %v3617_v21 = vpop.f32.mrf.mxu0 }
 0x413   : > { %v6894_v22 = vld [vmem:[%s7125_s5] ss:$0 sm:$0xff] }
 0x414   : > { %v3400_v34 = vpop.f32.mrf.mxu1  ;;  %v3620_v42 = vpop.f32.mrf.mxu0 }
 0x415   : > { %v3401_v4 = vadd.f32 %v3400_v34, %v6771_v60  ;;  %v6871_v61 = vadd.f32 %v3620_v42, %v3396_v15  ;;  %v6902_v34 = vld [vmem:[%s7126_s6] ss:$0 sm:$0xff] }
 0x416   : > { %v3402_v14 = vpop.f32.mrf.mxu1  ;;  %v3622_v28 = vpop.f32.mrf.mxu0 }
 0x418   : > { %v3405_v40 = vpop.f32.mrf.mxu1  ;;  %v3625_v23 = vpop.f32.mrf.mxu0 }
 0x419   : > { %v3406_v26 = vadd.f32 %v3405_v40, %v6775_v38  ;;  %v6874_v6 = vadd.f32 %v3625_v23, %v3401_v4  ;;  %v2219_v40 = vld [vmem:[%s4863_s10 + $0x8] sm:$0xff] }
 0x41a   : > { %v3407_v48 = vpop.f32.mrf.mxu1  ;;  %v3627_v19 = vpop.f32.mrf.mxu0 }
 0x41b   : > { %v2218_v19 = vld [vmem:[%s4863_s10] sm:$0xff] }
 0x41c   : > { %v3410_v17 = vpop.f32.mrf.mxu1  ;;  %v3630_v5 = vpop.f32.mrf.mxu0 }
 0x41d   : > { %v3411_v43 = vadd.f32 %v3410_v17, %v6780_v24  ;;  %v6877_v31 = vadd.f32 %v3630_v5, %v3406_v26 }
 0x41e   : > { %v3412_v47 = vpop.f32.mrf.mxu1  ;;  %v3632_v60 = vpop.f32.mrf.mxu0 }
 0x420   : > { %v3415_v20 = vpop.f32.mrf.mxu1  ;;  %v3635_v25 = vpop.f32.mrf.mxu0 }
 0x421   : > { %v6880_v18 = vadd.f32 %v3415_v20, %v6785_v36  ;;  %v6882_v63 = vadd.f32 %v3635_v25, %v3411_v43 }
 0x422   : > { %v3417_v38 = vpop.f32.mrf.mxu1  ;;  %v3637_v37 = vpop.f32.mrf.mxu0 }
 0x424   : > { %v3420_v8 = vpop.f32.mrf.mxu1  ;;  %v6884_v35 = vpop.f32.mrf.mxu0 }
 0x425   : > { %v3421_v3 = vadd.f32 %v3420_v8, %v6788_v39 }
 0x426   : > { %v3422_v55 = vpop.f32.mrf.mxu1  ;;  %v3642_v24 = vpop.f32.mrf.mxu0 }
 0x428   : > { %v6887_v59 = vpop.f32.mrf.mxu1  ;;  %v3645_v49 = vpop.f32.mrf.mxu0 }
 0x429   : > { %v6889_v56 = vadd.f32 %v3645_v49, %v3421_v3 }
 0x42a   : > { %v3427_v41 = vpop.f32.mrf.mxu1  ;;  %v3647_v36 = vpop.f32.mrf.mxu0 }
 0x42c   : > { %v4393_v15 = vpop.f32.mrf.mxu1  ;;  %v6896_v21 = vpop.f32.mrf.mxu0 }
 0x42d   : > { %v3726_v39 = vadd.f32 %v4393_v15, %v6799_v12 }
 0x42e   : > { %v3720_v42 = vpop.f32.mrf.mxu1  ;;  %v3652_v4 = vpop.f32.mrf.mxu0 }
 0x42f   : > { %v3887_v14 = vmul.f32 %v6894_v22, %v3726_v39  ;;  %v3721_v28 = vadd.f32 %v3720_v42, %v6796_v62  ;;  %v2221_v62 = vld [vmem:[%s4863_s10 + $0x18] sm:$0xff]  ;;  %v2223_v42 = vld [vmem:[%s4863_s10 + $0x28] sm:$0xff] }
 0x430   : > { %v4396_v23 = vpop.f32.mrf.mxu1 }
 0x431   : > { %v3926_v26 = vadd.f32 %v6902_v34, %v3887_v14  ;;  %v3886_v48 = vmul.f32 %v6894_v22, %v3721_v28  ;;  %v3736_v12 = vadd.f32 %v4396_v23, %v6805_v7  ;;  %v2220_v7 = vld [vmem:[%s4863_s10 + $0x10] sm:$0xff] }
 0x432   : > { %v3730_v17 = vpop.f32.mrf.mxu1 }
 0x433   : > { %v3958_v5 = vadd.f32 %v3926_v26, %v2219_v40  ;;  %v3925_v43 = vadd.f32 %v6902_v34, %v3886_v48  ;;  %v3889_v47 = vmul.f32 %v6894_v22, %v3736_v12  ;;  %v3731_v60 = vadd.f32 %v3730_v17, %v6802_v44  ;;  %v2222_v40 = vld [vmem:[%s4863_s10 + $0x20] sm:$0xff]  ;;  %v2225_v17 = vld [vmem:[%s4863_s10 + $0x38] sm:$0xff] }
 0x434   : > { %v4399_v20 = vpop.f32.mrf.mxu1 }
 0x435   : > { %v3990_v25 = vmax.f32 %v3958_v5, 0.0  ;;  %v3957_v38 = vadd.f32 %v3925_v43, %v2218_v19  ;;  %v3928_v37 = vadd.f32 %v6902_v34, %v3889_v47  ;;  %v3888_v8 = vmul.f32 %v6894_v22, %v3731_v60 }
 0x436   : > { %v3746_v3 = vadd.f32 %v4399_v20, %v6811_v54  ;;  %v3740_v55 = vpop.f32.mrf.mxu1  ;;  %v2224_v20 = vld [vmem:[%s4863_s10 + $0x30] sm:$0xff] }
 0x437   : > { %4022 = vst [vmem:[%s6921_s14 + $0x8] sm:$0xff] %v3990_v25  ;;  %v3989_v44 = vmax.f32 %v3957_v38, 0.0  ;;  %v3960_v24 = vadd.f32 %v3928_v37, %v2221_v62  ;;  %v3927_v49 = vadd.f32 %v6902_v34, %v3888_v8  ;;  %v3741_v41 = vadd.f32 %v3740_v55, %v6808_v45 }
 0x438   : > { %v3891_v36 = vmul.f32 %v6894_v22, %v3746_v3  ;;  %v4402_v15 = vpop.f32.mrf.mxu1 }
 0x439   : > { %4021 = vst [vmem:[%s6921_s14] sm:$0xff] %v3989_v44  ;;  %v3992_v54 = vmax.f32 %v3960_v24, 0.0  ;;  %v3959_v39 = vadd.f32 %v3927_v49, %v2220_v7  ;;  %v3890_v4 = vmul.f32 %v6894_v22, %v3741_v41  ;;  %v3756_v14 = vadd.f32 %v4402_v15, %v6817_v11  ;;  %v2227_v7 = vld [vmem:[%s4863_s10 + $0x48] sm:$0xff] }
 0x43a   : > { %v3930_v28 = vadd.f32 %v6902_v34, %v3891_v36  ;;  %v3750_v23 = vpop.f32.mrf.mxu1 }
 0x43b   : > { %4024 = vst [vmem:[%s6921_s14 + $0x18] sm:$0xff] %v3992_v54  ;;  %v3991_v45 = vmax.f32 %v3959_v39, 0.0  ;;  %v3929_v26 = vadd.f32 %v6902_v34, %v3890_v4  ;;  %v3893_v48 = vmul.f32 %v6894_v22, %v3756_v14  ;;  %v3751_v12 = vadd.f32 %v3750_v23, %v6814_v58  ;;  %v2226_v39 = vld [vmem:[%s4863_s10 + $0x40] sm:$0xff]  ;;  %v2229_v14 = vld [vmem:[%s4863_s10 + $0x58] sm:$0xff] }
 0x43c   : > { %v3962_v19 = vadd.f32 %v3930_v28, %v2223_v42  ;;  %v4405_v5 = vpop.f32.mrf.mxu1 }
 0x43d   : > { %4023 = vst [vmem:[%s6921_s14 + $0x10] sm:$0xff] %v3991_v45  ;;  %v3961_v11 = vadd.f32 %v3929_v26, %v2222_v40  ;;  %v3932_v43 = vadd.f32 %v6902_v34, %v3893_v48  ;;  %v3892_v47 = vmul.f32 %v6894_v22, %v3751_v12  ;;  %v3766_v60 = vadd.f32 %v4405_v5, %v6823_v10  ;;  %v2228_v48 = vld [vmem:[%s4863_s10 + $0x50] sm:$0xff] }
 0x43e   : > { %v3994_v62 = vmax.f32 %v3962_v19, 0.0  ;;  %v3760_v25 = vpop.f32.mrf.mxu1 }
 0x43f   : > { %v3993_v38 = vmax.f32 %v3961_v11, 0.0  ;;  %v3964_v58 = vadd.f32 %v3932_v43, %v2225_v17  ;;  %v3931_v37 = vadd.f32 %v6902_v34, %v3892_v47  ;;  %v3895_v8 = vmul.f32 %v6894_v22, %v3766_v60  ;;  %v2231_v43 = vld [vmem:[%s4863_s10 + $0x68] sm:$0xff] }
 0x440   : > { %4026 = vst [vmem:[%s6921_s14 + $0x28] sm:$0xff] %v3994_v62  ;;  %v3761_v3 = vadd.f32 %v3760_v25, %v6820_v50  ;;  %v4408_v55 = vpop.f32.mrf.mxu1  ;;  %v2230_v25 = vld [vmem:[%s4863_s10 + $0x60] sm:$0xff] }
 0x441   : > { %4025 = vst [vmem:[%s6921_s14 + $0x20] sm:$0xff] %v3993_v38  ;;  %v3996_v10 = vmax.f32 %v3964_v58, 0.0  ;;  %v3963_v44 = vadd.f32 %v3931_v37, %v2224_v20  ;;  %v3934_v24 = vadd.f32 %v6902_v34, %v3895_v8  ;;  %v3776_v49 = vadd.f32 %v4408_v55, %v6829_v2 }
 0x442   : > { %v3894_v41 = vmul.f32 %v6894_v22, %v3761_v3  ;;  %v3770_v36 = vpop.f32.mrf.mxu1 }
 0x443   : > { %4028 = vst [vmem:[%s6921_s14 + $0x38] sm:$0xff] %v3996_v10  ;;  %v3995_v15 = vmax.f32 %v3963_v44, 0.0  ;;  %v3966_v54 = vadd.f32 %v3934_v24, %v2227_v7  ;;  %v3897_v50 = vmul.f32 %v6894_v22, %v3776_v49  ;;  %v3771_v42 = vadd.f32 %v3770_v36, %v6826_v53  ;;  %v2233_v24 = vld [vmem:[%s4863_s10 + $0x78] sm:$0xff]  ;;  %v2232_v36 = vld [vmem:[%s4863_s10 + $0x70] sm:$0xff] }
 0x444   : > { %v3933_v4 = vadd.f32 %v6902_v34, %v3894_v41  ;;  %v4411_v28 = vpop.f32.mrf.mxu1 }
 0x445   : > { %4027 = vst [vmem:[%s6921_s14 + $0x30] sm:$0xff] %v3995_v15  ;;  %v3998_v2 = vmax.f32 %v3966_v54, 0.0  ;;  %v3936_v40 = vadd.f32 %v6902_v34, %v3897_v50  ;;  %v3896_v23 = vmul.f32 %v6894_v22, %v3771_v42  ;;  %v3786_v45 = vadd.f32 %v4411_v28, %v6835_v33 }
 0x446   : > { %v3965_v26 = vadd.f32 %v3933_v4, %v2226_v39  ;;  %v3780_v12 = vpop.f32.mrf.mxu1  ;;  %v2235_v4 = vld [vmem:[%s4863_s10 + $0x88] sm:$0xff] }
 0x447   : > { %4030 = vst [vmem:[%s6921_s14 + $0x48] sm:$0xff] %v3998_v2  ;;  %v3968_v53 = vadd.f32 %v3936_v40, %v2229_v14  ;;  %v3935_v19 = vadd.f32 %v6902_v34, %v3896_v23  ;;  %v3899_v17 = vmul.f32 %v6894_v22, %v3786_v45  ;;  %v3781_v5 = vadd.f32 %v3780_v12, %v6832_v0  ;;  %v2234_v45 = vld [vmem:[%s4863_s10 + $0x80] sm:$0xff] }
 0x448   : > { %v3997_v11 = vmax.f32 %v3965_v26, 0.0  ;;  %v4414_v47 = vpop.f32.mrf.mxu1 }
 0x449   : > { %v4000_v60 = vmax.f32 %v3968_v53, 0.0  ;;  %v3967_v33 = vadd.f32 %v3935_v19, %v2228_v48  ;;  %v3938_v62 = vadd.f32 %v6902_v34, %v3899_v17  ;;  %v3898_v20 = vmul.f32 %v6894_v22, %v3781_v5  ;;  %v2237_v19 = vld [vmem:[%s4863_s10 + $0x98] sm:$0xff] }
 0x44a   : > { %4029 = vst [vmem:[%s6921_s14 + $0x40] sm:$0xff] %v3997_v11  ;;  %v3796_v38 = vadd.f32 %v4414_v47, %v6841_v27  ;;  %v3790_v58 = vpop.f32.mrf.mxu1 }
 0x44b   : > { %4032 = vst [vmem:[%s6921_s14 + $0x58] sm:$0xff] %v4000_v60  ;;  %v3999_v0 = vmax.f32 %v3967_v33, 0.0  ;;  %v3970_v37 = vadd.f32 %v3938_v62, %v2231_v43  ;;  %v3937_v8 = vadd.f32 %v6902_v34, %v3898_v20  ;;  %v3791_v7 = vadd.f32 %v3790_v58, %v6838_v1 }
 0x44c   : > { %v3901_v3 = vmul.f32 %v6894_v22, %v3796_v38  ;;  %v4417_v55 = vpop.f32.mrf.mxu1 }
 0x44d   : > { %4031 = vst [vmem:[%s6921_s14 + $0x50] sm:$0xff] %v3999_v0  ;;  %v4002_v10 = vmax.f32 %v3970_v37, 0.0  ;;  %v3969_v44 = vadd.f32 %v3937_v8, %v2230_v25  ;;  %v3900_v27 = vmul.f32 %v6894_v22, %v3791_v7  ;;  %v3806_v49 = vadd.f32 %v4417_v55, %v6847_v13  ;;  %v2236_v25 = vld [vmem:[%s4863_s10 + $0x90] sm:$0xff]  ;;  %v2239_v0 = vld [vmem:[%s4863_s10 + $0xa8] sm:$0xff] }
 0x44e   : > { %v3940_v41 = vadd.f32 %v6902_v34, %v3901_v3  ;;  %v3800_v15 = vpop.f32.mrf.mxu1 }
 0x44f   : > { %4034 = vst [vmem:[%s6921_s14 + $0x68] sm:$0xff] %v4002_v10  ;;  %v4001_v1 = vmax.f32 %v3969_v44, 0.0  ;;  %v3939_v54 = vadd.f32 %v6902_v34, %v3900_v27  ;;  %v3903_v39 = vmul.f32 %v6894_v22, %v3806_v49  ;;  %v3801_v50 = vadd.f32 %v3800_v15, %v6844_v29  ;;  %v2238_v10 = vld [vmem:[%s4863_s10 + $0xa0] sm:$0xff] }
 0x450   : > { %v3972_v42 = vadd.f32 %v3940_v41, %v2233_v24  ;;  %v4420_v14 = vpop.f32.mrf.mxu1 }
 0x451   : > { %4033 = vst [vmem:[%s6921_s14 + $0x60] sm:$0xff] %v4001_v1  ;;  %v3971_v13 = vadd.f32 %v3939_v54, %v2232_v36  ;;  %v3942_v28 = vadd.f32 %v6902_v34, %v3903_v39  ;;  %v3902_v2 = vmul.f32 %v6894_v22, %v3801_v50  ;;  %v3816_v40 = vadd.f32 %v4420_v14, %v6853_v9  ;;  %v2241_v36 = vld [vmem:[%s4863_s10 + $0xb8] sm:$0xff]  ;;  %v2240_v50 = vld [vmem:[%s4863_s10 + $0xb0] sm:$0xff] }
 0x452   : > { %v4004_v23 = vmax.f32 %v3972_v42, 0.0  ;;  %v3810_v26 = vpop.f32.mrf.mxu1 }
 0x453   : > { %v4003_v48 = vmax.f32 %v3971_v13, 0.0  ;;  %v3974_v29 = vadd.f32 %v3942_v28, %v2235_v4  ;;  %v3941_v12 = vadd.f32 %v6902_v34, %v3902_v2  ;;  %v3905_v53 = vmul.f32 %v6894_v22, %v3816_v40 }
 0x454   : > { %4036 = vst [vmem:[%s6921_s14 + $0x78] sm:$0xff] %v4004_v23  ;;  %v3811_v17 = vadd.f32 %v3810_v26, %v6850_v30  ;;  %v4423_v5 = vpop.f32.mrf.mxu1  ;;  %v2243_v26 = vld [vmem:[%s4863_s10 + $0xc8] sm:$0xff] }
 0x455   : > { %4035 = vst [vmem:[%s6921_s14 + $0x70] sm:$0xff] %v4003_v48  ;;  %v4006_v9 = vmax.f32 %v3974_v29, 0.0  ;;  %v3973_v11 = vadd.f32 %v3941_v12, %v2234_v45  ;;  %v3944_v43 = vadd.f32 %v6902_v34, %v3905_v53  ;;  %v3826_v47 = vadd.f32 %v4423_v5, %v6859_v57  ;;  %v2242_v53 = vld [vmem:[%s4863_s10 + $0xc0] sm:$0xff] }
 0x456   : > { %v3904_v60 = vmul.f32 %v6894_v22, %v3811_v17  ;;  %v3820_v33 = vpop.f32.mrf.mxu1  ;;  %v3641_v29 = vadd.f32 %v6884_v35, %v6880_v18 }
 0x457   : > { %4038 = vst [vmem:[%s6921_s14 + $0x88] sm:$0xff] %v4006_v9  ;;  %v4005_v62 = vmax.f32 %v3973_v11, 0.0  ;;  %v3976_v20 = vadd.f32 %v3944_v43, %v2237_v19  ;;  %v3907_v30 = vmul.f32 %v6894_v22, %v3826_v47  ;;  %v3821_v38 = vadd.f32 %v3820_v33, %v6856_v52  ;;  %v2245_v43 = vld [vmem:[%s4863_s10 + $0xd8] sm:$0xff] }
 0x458   : > { %v3943_v58 = vadd.f32 %v6902_v34, %v3904_v60  ;;  %v4426_v37 = vpop.f32.mrf.mxu1  ;;  %v3426_v11 = vadd.f32 %v6887_v59, %v6792_v46 }
 0x459   : > { %4037 = vst [vmem:[%s6921_s14 + $0x80] sm:$0xff] %v4005_v62  ;;  %v4008_v57 = vmax.f32 %v3976_v20, 0.0  ;;  %v3946_v8 = vadd.f32 %v6902_v34, %v3907_v30  ;;  %v3906_v7 = vmul.f32 %v6894_v22, %v3821_v38  ;;  %v3836_v3 = vadd.f32 %v4426_v37, %v6865_v16 }
 0x45a   : > { %v3975_v55 = vadd.f32 %v3943_v58, %v2236_v25  ;;  %v3830_v44 = vpop.f32.mrf.mxu1  ;;  %v3651_v62 = vadd.f32 %v6896_v21, %v3426_v11  ;;  %v2247_v58 = vld [vmem:[%s4863_s10 + $0xe8] sm:$0xff] }
 0x45b   : > { %4040 = vst [vmem:[%s6921_s14 + $0x98] sm:$0xff] %v4008_v57  ;;  %v3978_v52 = vadd.f32 %v3946_v8, %v2239_v0  ;;  %v3945_v24 = vadd.f32 %v6902_v34, %v3906_v7  ;;  %v3909_v27 = vmul.f32 %v6894_v22, %v3836_v3  ;;  %v3831_v49 = vadd.f32 %v3830_v44, %v6862_v32 }
 0x45c   : > { %v4007_v41 = vmax.f32 %v3975_v55, 0.0  ;;  %v4429_v15 = vpop.f32.mrf.mxu1 }
 0x45d   : > { %v4010_v1 = vmax.f32 %v3978_v52, 0.0  ;;  %v3977_v16 = vadd.f32 %v3945_v24, %v2238_v10  ;;  %v3948_v54 = vadd.f32 %v6902_v34, %v3909_v27  ;;  %v3908_v39 = vmul.f32 %v6894_v22, %v3831_v49  ;;  %v2249_v49 = vld [vmem:[%s4863_s10 + $0xf8] sm:$0xff] }
 0x45e   : > { %4039 = vst [vmem:[%s6921_s14 + $0x90] sm:$0xff] %v4007_v41  ;;  %v3846_v42 = vadd.f32 %v4429_v15, %v6871_v61  ;;  %v3840_v4 = vpop.f32.mrf.mxu1 }
 0x45f   : > { %4042 = vst [vmem:[%s6921_s14 + $0xa8] sm:$0xff] %v4010_v1  ;;  %v4009_v14 = vmax.f32 %v3977_v16, 0.0  ;;  %v3980_v32 = vadd.f32 %v3948_v54, %v2241_v36  ;;  %v3947_v13 = vadd.f32 %v6902_v34, %v3908_v39  ;;  %v3841_v28 = vadd.f32 %v3840_v4, %v6868_v51  ;;  %v2248_v16 = vld [vmem:[%s4863_s10 + $0xf0] sm:$0xff] }
 0x460   : > { %v3911_v2 = vmul.f32 %v6894_v22, %v3846_v42  ;;  %v4432_v40 = vpop.f32.mrf.mxu1 }
 0x461   : > { %4041 = vst [vmem:[%s6921_s14 + $0xa0] sm:$0xff] %v4009_v14  ;;  %v4012_v23 = vmax.f32 %v3980_v32, 0.0  ;;  %v3979_v45 = vadd.f32 %v3947_v13, %v2240_v50  ;;  %v3910_v61 = vmul.f32 %v6894_v22, %v3841_v28  ;;  %v3856_v48 = vadd.f32 %v4432_v40, %v6877_v31 }
 0x462   : > { %v3950_v12 = vadd.f32 %v6902_v34, %v3911_v2  ;;  %v3850_v51 = vpop.f32.mrf.mxu1 }
 0x463   : > { %4044 = vst [vmem:[%s6921_s14 + $0xb8] sm:$0xff] %v4012_v23  ;;  %v4011_v19 = vmax.f32 %v3979_v45, 0.0  ;;  %v3949_v17 = vadd.f32 %v6902_v34, %v3910_v61  ;;  %v3913_v5 = vmul.f32 %v6894_v22, %v3856_v48  ;;  %v3851_v9 = vadd.f32 %v3850_v51, %v6874_v6  ;;  %v2244_v6 = vld [vmem:[%s4863_s10 + $0xd0] sm:$0xff] }
 0x464   : > { %v3982_v31 = vadd.f32 %v3950_v12, %v2243_v26  ;;  %v4435_v18 = vpop.f32.mrf.mxu1 }
 0x465   : > { %4043 = vst [vmem:[%s6921_s14 + $0xb0] sm:$0xff] %v4011_v19  ;;  %v3981_v35 = vadd.f32 %v3949_v17, %v2242_v53  ;;  %v3952_v47 = vadd.f32 %v6902_v34, %v3913_v5  ;;  %v3912_v60 = vmul.f32 %v6894_v22, %v3851_v9  ;;  %v3866_v33 = vadd.f32 %v4435_v18, %v3641_v29 }
 0x466   : > { %v4014_v20 = vmax.f32 %v3982_v31, 0.0  ;;  %v3860_v25 = vpop.f32.mrf.mxu1 }
 0x467   : > { %v4013_v46 = vmax.f32 %v3981_v35, 0.0  ;;  %v3984_v59 = vadd.f32 %v3952_v47, %v2245_v43  ;;  %v3951_v30 = vadd.f32 %v6902_v34, %v3912_v60  ;;  %v3915_v38 = vmul.f32 %v6894_v22, %v3866_v33 }
 0x468   : > { %4046 = vst [vmem:[%s6921_s14 + $0xc8] sm:$0xff] %v4014_v20  ;;  %v3861_v0 = vadd.f32 %v3860_v25, %v6882_v63  ;;  %v4438_v37 = vpop.f32.mrf.mxu1  ;;  %v2246_v63 = vld [vmem:[%s4863_s10 + $0xe0] sm:$0xff]  ;;  %s4054_s10 = scalar_lea.sflag [#allocation5], %s4857_s17 }
 0x469   : > { %4045 = vst [vmem:[%s6921_s14 + $0xc0] sm:$0xff] %v4013_v46  ;;  %v4016_v21 = vmax.f32 %v3984_v59, 0.0  ;;  %v3983_v57 = vadd.f32 %v3951_v30, %v2244_v6  ;;  %v3954_v8 = vadd.f32 %v6902_v34, %v3915_v38  ;;  %v3876_v7 = vadd.f32 %v4438_v37, %v3651_v62 }
 0x46a   : > { %v3914_v3 = vmul.f32 %v6894_v22, %v3861_v0  ;;  %v3870_v55 = vpop.f32.mrf.mxu1 }
 0x46b   : > { %4048 = vst [vmem:[%s6921_s14 + $0xd8] sm:$0xff] %v4016_v21  ;;  %v4015_v10 = vmax.f32 %v3983_v57, 0.0  ;;  %v3986_v44 = vadd.f32 %v3954_v8, %v2247_v58  ;;  %v3917_v52 = vmul.f32 %v6894_v22, %v3876_v7  ;;  %v3871_v24 = vadd.f32 %v3870_v55, %v6889_v56 }
 0x46c   : > { %v3953_v27 = vadd.f32 %v6902_v34, %v3914_v3 }
 0x46d   : > { %4047 = vst [vmem:[%s6921_s14 + $0xd0] sm:$0xff] %v4015_v10  ;;  %v4018_v41 = vmax.f32 %v3986_v44, 0.0  ;;  %v3956_v36 = vadd.f32 %v6902_v34, %v3917_v52  ;;  %v3916_v15 = vmul.f32 %v6894_v22, %v3871_v24 }
 0x46e   : > { %v3985_v1 = vadd.f32 %v3953_v27, %v2246_v63 }
 0x46f   : > { %4050 = vst [vmem:[%s6921_s14 + $0xe8] sm:$0xff] %v4018_v41  ;;  %v3988_v54 = vadd.f32 %v3956_v36, %v2249_v49  ;;  %v3955_v56 = vadd.f32 %v6902_v34, %v3916_v15 }
 0x470   : > { %v4017_v39 = vmax.f32 %v3985_v1, 0.0 }
 0x471   : > { %v4020_v50 = vmax.f32 %v3988_v54, 0.0  ;;  %v3987_v42 = vadd.f32 %v3955_v56, %v2248_v16 }
 0x472   : > { %4049 = vst [vmem:[%s6921_s14 + $0xe0] sm:$0xff] %v4017_v39 }
 0x473   : > { %4052 = vst [vmem:[%s6921_s14 + $0xf8] sm:$0xff] %v4020_v50  ;;  %v4019_v22 = vmax.f32 %v3987_v42, 0.0 }
 0x475   : > { %4051 = vst [vmem:[%s6921_s14 + $0xf0] sm:$0xff] %v4019_v22 }
 0x476   : > { %4615 = shalt.err (!%p4612_p3)
}
 0x477   : > { %s4616_s29 = scalar_lea.hbm %s7073_s30, 4096  ;;  %s4620_s13 = scalar_lea.hbm %s7127_s7, 8192 }
 0x478   : > { %p4617_p11 = scmp.ne.s32.totalorder %s7073_s30, %s4616_s29  ;;  %p4621_p4 = scmp.lt.s32.totalorder %s7073_s30, %s7127_s7 }
 0x479   : > { %p4622_p6 = scmp.lt.s32.totalorder %s4620_s13, %s4616_s29 }
 0x47a   : > { %p4618_p9 = pnand %p4617_p11, %p7382_p2 }
 0x47b   : > { %p4623_p8 = por %p4622_p6, %p4621_p4 }
 0x47c   : > { %p4619_p1 = pneg %p4618_p9 }
 0x47e   : > { %p4624_p5 = pnand %p4623_p8, %p4619_p1 }
 0x480   : > { %4627 = shalt.err (!%p4624_p5)
}
 0x481   : > { %s4679_s1 = smov 128   ;;  %s4680_s15 = smov 8  }
 0x482   : > { %4449 = dma.vmem_to_hbm [thread:$0]  (%p7382_p2), %s7075_s18, 4096, %s7073_s30, %s4054_s10, %s4679_s1, %s4679_s1, %s4680_s15  }
 0x483 PF: > { %s4082_s28 = sand.u32 1, %s4658_s24   ;;  %p7383_p7 = scmp.ne.s32.totalorder %s7240_s8, 0 }
 0x484   : > { %p7384_p12 = scmp.ge.s32.totalorder %s4670_s27, 2  ;;  %s4083_s9 = scalar_lea.sflag [#allocation5], %s4082_s28 }
 0x486   : > { %p4463_p13 = pnand %p7384_p12, %p7383_p7 }
 0x488   : > { %p4464_p0 = pneg %p4463_p13 }
 0x48a   : > { %4653 = dma.done.wait (%p4464_p0), %s4083_s9, 4096  }
 0x48b   : > { %4655 = vsyncadd (%p4464_p0), %s4083_s9, 4294963200  ;;  %p21_p10 = scmp.ge.s32.totalorder %s4799_s23, 4   ;;  %s7385_s24 = smov %s4662_s25 }
 0x48c   : > { %s7386_s25 = smov %s4666_s26  ;;  %s7387_s26 = smov %s4815_s12 }
 0x48d   : > { %s7388_s27 = smov %s4799_s23  ;;  %23 = sbr.rel (!%p21_p10) target bundleno = 8 (0x8), region = 102 }
 0x492   :  { %4088 = vsyncpa [#allocation4], 1 }
 0x493   :  { %4090 = vsyncpa [#allocation4 + $0x1], 1 }
 0x494   :  { %4091 = vsyncpa [#allocation7], 1 }
 0x495   :  { %4092 = vsyncpa [#allocation5], 1 }
 0x496   :  { %4094 = vsyncpa [#allocation5 + $0x1], 1 }

</bundles_post_ra>
